<compile_context>
chip_gen: v5e
topology: v5e:2x2
jax: 0.10.0
libtpu: 0.0.40
codegen_flags: <defaults>
</compile_context>

<pallas_src>
import functools

import jax
import jax.numpy as jnp
from jax.experimental import pallas as pl
from jax.experimental.pallas import tpu as pltpu


# ----------------------------- kernel -------------------------------------- #

def _layer_norm(x, g, b, eps=1e-12):
    mu = jnp.mean(x, axis=-1, keepdims=True)
    var = jnp.mean((x - mu) ** 2, axis=-1, keepdims=True)
    return (x - mu) * jax.lax.rsqrt(var + eps) * g + b


def fused_bert_fc_gru_kernel(we_ref, pe_ref,
                             ln0g, ln0b,
                             wqkv, bqkv, wo, bo,
                             ln1g, ln1b,
                             w1, b1, w2, b2,
                             ln2g, ln2b,
                             fc_w, fc_b,
                             gru_wih, gru_whh, gru_bih, gru_bhh,
                             out_ref):
    """Whole forward pass in VMEM.  out_ref is a lane-dense (B, S*H) slab."""
    B, S, D = we_ref.shape
    H = gru_whh.shape[-1]
    f32 = jnp.float32

    # ---- synthetic 1-layer, single-head BERT encoder ----------------------
    # TODO(synk): no attention mask is applied (matches calling bert(q) with
    #             input_ids only); padded-token masking is not modeled.
    x = _layer_norm(we_ref[...] + pe_ref[...], ln0g[...], ln0b[...])

    # fused Q/K/V projection: one MXU push instead of three
    qkv = jnp.einsum('bsd,de->bse', x, wqkv[...],
                     preferred_element_type=f32) + bqkv[...]
    q = qkv[..., :D]
    k = qkv[..., D:2 * D]
    v = qkv[..., 2 * D:]

    scores = jnp.einsum('bqd,bkd->bqk', q, k,
                        preferred_element_type=f32) * (1.0 / float(D) ** 0.5)
    scores = scores - jnp.max(scores, axis=-1, keepdims=True)
    e = jnp.exp(scores)
    attn = e * pl.reciprocal(jnp.sum(e, axis=-1, keepdims=True), approx=True)
    ctx = jnp.einsum('bqk,bkd->bqd', attn, v, preferred_element_type=f32)
    attn_out = jnp.einsum('bsd,de->bse', ctx, wo[...],
                          preferred_element_type=f32) + bo[...]
    x = _layer_norm(x + attn_out, ln1g[...], ln1b[...])

    # TODO(synk): tanh-approx GELU; PyTorch/HF default is the exact erf form.
    hdn = jax.nn.gelu(jnp.einsum('bsd,df->bsf', x, w1[...],
                                 preferred_element_type=f32) + b1[...],
                      approximate=True)
    ffn = jnp.einsum('bsf,fd->bsd', hdn, w2[...],
                     preferred_element_type=f32) + b2[...]
    last_hidden = _layer_norm(x + ffn, ln2g[...], ln2b[...])

    # ---- FCNet([w_dim, rot_dim], 'ReLU', 0.0) (weight_norm == plain linear)
    fc = jnp.maximum(
        jnp.einsum('bsd,dr->bsr', last_hidden, fc_w[...],
                   preferred_element_type=f32) + fc_b[...], 0.0)      # (B,S,R)

    # ---- GRU (PyTorch gate order r,z,n), 1 layer, unidirectional ----------
    # Per-gate weights indexed on the leading axis (no lane-offset gate slices).
    wih_r, wih_z, wih_n = gru_wih[0], gru_wih[1], gru_wih[2]          # (R,H)
    whh_r, whh_z, whh_n = gru_whh[0], gru_whh[1], gru_whh[2]          # (H,H)
    bih_r, bih_z, bih_n = gru_bih[0], gru_bih[1], gru_bih[2]          # (1,H)
    bhh_r, bhh_z, bhh_n = gru_bhh[0], gru_bhh[1], gru_bhh[2]          # (1,H)

    # Input projections hoisted out of the recurrence (all S timesteps at once);
    # r/z biases folded into the hoisted term.
    gi_r = jnp.einsum('bsr,rh->bsh', fc, wih_r,
                      preferred_element_type=f32) + (bih_r + bhh_r)   # (B,S,H)
    gi_z = jnp.einsum('bsr,rh->bsh', fc, wih_z,
                      preferred_element_type=f32) + (bih_z + bhh_z)
    gi_n = jnp.einsum('bsr,rh->bsh', fc, wih_n,
                      preferred_element_type=f32) + bih_n

    hs = []

    # t = 0: h_prev == 0, so h @ whh_* == 0 -> drop the three matmuls from the
    # serial critical path for the first step.
    r0 = jax.nn.sigmoid(gi_r[:, 0, :])
    z0 = jax.nn.sigmoid(gi_z[:, 0, :])
    n0 = jnp.tanh(gi_n[:, 0, :] + r0 * bhh_n)
    h = n0 + z0 * (0.0 - n0)                               # == (1 - z0) * n0
    hs.append(h)

    # Serial recurrence: only h @ whh_* (3 independent, pipelined small pushes)
    # plus the gate nonlinearity sit on the per-step critical path.
    for t in range(1, S):   # S static & small -> fully unrolled
        gh_r = jnp.dot(h, whh_r, preferred_element_type=f32)
        gh_z = jnp.dot(h, whh_z, preferred_element_type=f32)
        gh_n = jnp.dot(h, whh_n, preferred_element_type=f32) + bhh_n
        r = jax.nn.sigmoid(gi_r[:, t, :] + gh_r)
        z = jax.nn.sigmoid(gi_z[:, t, :] + gh_z)
        n = jnp.tanh(gi_n[:, t, :] + r * gh_n)
        h = n + z * (h - n)                                # == (1-z)*n + z*h
        hs.append(h)

    # Single lane-dense store: (B, S*H) slab (wrapper reshapes to (B,S,H)).
    out_ref[...] = jnp.concatenate(hs, axis=-1)


# ----------------------------- wrapper -------------------------------------- #

def init_params(key, vocab, max_seq, w_dim, ffn_dim, rot_dim, q_dim):
    ks = jax.random.split(key, 12)
    s = 0.02
    f32 = jnp.float32
    p = {}
    # synthetic BERT
    p['word_emb'] = jax.random.normal(ks[0], (vocab, w_dim), f32) * s
    p['pos_emb'] = jax.random.normal(ks[1], (max_seq, w_dim), f32) * s
    p['ln0_g'] = jnp.ones((1, w_dim), f32)
    p['ln0_b'] = jnp.zeros((1, w_dim), f32)
    p['wqkv'] = jax.random.normal(ks[2], (w_dim, 3 * w_dim), f32) * s
    p['bqkv'] = jnp.zeros((1, 3 * w_dim), f32)
    p['wo'] = jax.random.normal(ks[3], (w_dim, w_dim), f32) * s
    p['bo'] = jnp.zeros((1, w_dim), f32)
    p['ln1_g'] = jnp.ones((1, w_dim), f32)
    p['ln1_b'] = jnp.zeros((1, w_dim), f32)
    p['w1'] = jax.random.normal(ks[4], (w_dim, ffn_dim), f32) * s
    p['b1'] = jnp.zeros((1, ffn_dim), f32)
    p['w2'] = jax.random.normal(ks[5], (ffn_dim, w_dim), f32) * s
    p['b2'] = jnp.zeros((1, w_dim), f32)
    p['ln2_g'] = jnp.ones((1, w_dim), f32)
    p['ln2_b'] = jnp.zeros((1, w_dim), f32)
    # FCNet([w_dim, rot_dim], 'ReLU', 0.0)
    p['fc_w'] = jax.random.normal(ks[6], (w_dim, rot_dim), f32) * s
    p['fc_b'] = jnp.zeros((1, rot_dim), f32)
    # GRU(rot_dim -> q_dim), per-gate layout (gate, in, hid) in r,z,n order
    k = 1.0 / (q_dim ** 0.5)
    p['gru_wih'] = jax.random.uniform(ks[7], (3, rot_dim, q_dim), f32, -k, k)
    p['gru_whh'] = jax.random.uniform(ks[8], (3, q_dim, q_dim), f32, -k, k)
    p['gru_bih'] = jax.random.uniform(ks[9], (3, 1, q_dim), f32, -k, k)
    p['gru_bhh'] = jax.random.uniform(ks[10], (3, 1, q_dim), f32, -k, k)
    return p


def bert_rnn_question_embedding(p, q_tokens):
    """Forward of BertRnnQuestionEmbedding: returns q_emb of shape (B, S, q_dim)."""
    B, S = q_tokens.shape
    H = p['gru_whh'].shape[-1]

    # glue: data-dependent embedding gather stays in plain JAX
    # TODO(synk): at real vocab sizes this gather should become an in-kernel
    #             DMA gather over an HBM-resident table.
    we = jnp.take(p['word_emb'], q_tokens, axis=0)        # (B, S, w_dim)
    pe = p['pos_emb'][:S]                                 # (S, w_dim)

    inputs = [we, pe,
              p['ln0_g'], p['ln0_b'],
              p['wqkv'], p['bqkv'], p['wo'], p['bo'],
              p['ln1_g'], p['ln1_b'],
              p['w1'], p['b1'], p['w2'], p['b2'],
              p['ln2_g'], p['ln2_b'],
              p['fc_w'], p['fc_b'],
              p['gru_wih'], p['gru_whh'], p['gru_bih'], p['gru_bhh']]

    # Single no-grid call; everything (<1 MiB at these sizes) lives in VMEM.
    # TODO(synk): at real BERT dims (w_dim=768, vocab~30k) this needs HBM-resident
    #             embeddings, seq/batch BlockSpec tiling and a "parallel" grid
    #             (v7x: 64 MiB VMEM, 2 TensorCores) plus bf16 matmul inputs.
    out_flat = pl.pallas_call(
        fused_bert_fc_gru_kernel,
        out_shape=jax.ShapeDtypeStruct((B, S * H), jnp.float32),
        in_specs=[pl.BlockSpec(memory_space=pltpu.MemorySpace.VMEM)] * len(inputs),
        out_specs=pl.BlockSpec(memory_space=pltpu.MemorySpace.VMEM),
    )(*inputs)

    # (B, S*H) -> (B, S, H): contiguous row-major reshape (no data movement).
    return out_flat.reshape(B, S, H)                      # (B, S, q_dim)


# ------------------------------- main --------------------------------------- #

if __name__ == "__main__":
    key = jax.random.PRNGKey(0)
    pk, dk = jax.random.split(key)

    VOCAB, B, S = 64, 2, 8
    W_DIM, FFN_DIM, ROT_DIM, Q_DIM = 32, 64, 32, 32

    params = init_params(pk, VOCAB, S, W_DIM, FFN_DIM, ROT_DIM, Q_DIM)
    q_tokens = jax.random.randint(dk, (B, S), 0, VOCAB, dtype=jnp.int32)

    fwd = jax.jit(functools.partial(bert_rnn_question_embedding, params))
    out = jax.block_until_ready(fwd(q_tokens))

    assert out.shape == (B, S, Q_DIM), out.shape
    assert out.dtype == jnp.float32
    assert bool(jnp.all(jnp.isfinite(out)))
    print("KERNEL_OK")
</pallas_src>

<mosaic_0001>
module attributes {stable_mosaic.version = 11 : i64} {
  func.func @fused_bert_fc_gru_kernel(%arg0: memref<2x8x32xf32, #tpu.memory_space<vmem>>, %arg1: memref<8x32xf32, #tpu.memory_space<vmem>>, %arg2: memref<1x32xf32, #tpu.memory_space<vmem>>, %arg3: memref<1x32xf32, #tpu.memory_space<vmem>>, %arg4: memref<32x96xf32, #tpu.memory_space<vmem>>, %arg5: memref<1x96xf32, #tpu.memory_space<vmem>>, %arg6: memref<32x32xf32, #tpu.memory_space<vmem>>, %arg7: memref<1x32xf32, #tpu.memory_space<vmem>>, %arg8: memref<1x32xf32, #tpu.memory_space<vmem>>, %arg9: memref<1x32xf32, #tpu.memory_space<vmem>>, %arg10: memref<32x64xf32, #tpu.memory_space<vmem>>, %arg11: memref<1x64xf32, #tpu.memory_space<vmem>>, %arg12: memref<64x32xf32, #tpu.memory_space<vmem>>, %arg13: memref<1x32xf32, #tpu.memory_space<vmem>>, %arg14: memref<1x32xf32, #tpu.memory_space<vmem>>, %arg15: memref<1x32xf32, #tpu.memory_space<vmem>>, %arg16: memref<32x32xf32, #tpu.memory_space<vmem>>, %arg17: memref<1x32xf32, #tpu.memory_space<vmem>>, %arg18: memref<3x32x32xf32, #tpu.memory_space<vmem>>, %arg19: memref<3x32x32xf32, #tpu.memory_space<vmem>>, %arg20: memref<3x1x32xf32, #tpu.memory_space<vmem>>, %arg21: memref<3x1x32xf32, #tpu.memory_space<vmem>>, %arg22: memref<2x256xf32, #tpu.memory_space<vmem>>) attributes {dimension_semantics = [], scalar_prefetch = 0 : i64, scratch_operands = 0 : i64, tpu.core_type = #tpu.core_type<tc>} {
    %c0 = arith.constant 0 : index
    %c0_0 = arith.constant 0 : index
    %c0_1 = arith.constant 0 : index
    %0 = vector.load %arg0[%c0, %c0_0, %c0_1] : memref<2x8x32xf32, #tpu.memory_space<vmem>>, vector<2x8x32xf32>
    %c0_2 = arith.constant 0 : index
    %c0_3 = arith.constant 0 : index
    %1 = vector.load %arg1[%c0_2, %c0_3] : memref<8x32xf32, #tpu.memory_space<vmem>>, vector<8x32xf32>
    %2 = vector.shape_cast %1 : vector<8x32xf32> to vector<1x8x32xf32>
    %3 = vector.broadcast %2 : vector<1x8x32xf32> to vector<2x8x32xf32>
    %4 = arith.addf %0, %3 : vector<2x8x32xf32>
    %c0_4 = arith.constant 0 : index
    %c0_5 = arith.constant 0 : index
    %5 = vector.load %arg2[%c0_4, %c0_5] : memref<1x32xf32, #tpu.memory_space<vmem>>, vector<1x32xf32>
    %c0_6 = arith.constant 0 : index
    %c0_7 = arith.constant 0 : index
    %6 = vector.load %arg3[%c0_6, %c0_7] : memref<1x32xf32, #tpu.memory_space<vmem>>, vector<1x32xf32>
    %cst = arith.constant dense<0.000000e+00> : vector<2x8xf32>
    %7 = vector.multi_reduction <add>, %4, %cst [2] : vector<2x8x32xf32> to vector<2x8xf32>
    %8 = vector.shape_cast %7 : vector<2x8xf32> to vector<2x8x1xf32>
    %cst_8 = arith.constant 3.200000e+01 : f32
    %9 = vector.broadcast %cst_8 : f32 to vector<2x8x1xf32>
    %10 = arith.divf %8, %9 : vector<2x8x1xf32>
    %11 = vector.broadcast %10 : vector<2x8x1xf32> to vector<2x8x32xf32>
    %12 = arith.subf %4, %11 : vector<2x8x32xf32>
    %13 = arith.mulf %12, %12 : vector<2x8x32xf32>
    %cst_9 = arith.constant dense<0.000000e+00> : vector<2x8xf32>
    %14 = vector.multi_reduction <add>, %13, %cst_9 [2] : vector<2x8x32xf32> to vector<2x8xf32>
    %15 = vector.shape_cast %14 : vector<2x8xf32> to vector<2x8x1xf32>
    %cst_10 = arith.constant 3.200000e+01 : f32
    %16 = vector.broadcast %cst_10 : f32 to vector<2x8x1xf32>
    %17 = arith.divf %15, %16 : vector<2x8x1xf32>
    %18 = vector.broadcast %10 : vector<2x8x1xf32> to vector<2x8x32xf32>
    %19 = arith.subf %4, %18 : vector<2x8x32xf32>
    %cst_11 = arith.constant 9.99999996E-13 : f32
    %20 = vector.broadcast %cst_11 : f32 to vector<2x8x1xf32>
    %21 = arith.addf %17, %20 : vector<2x8x1xf32>
    %22 = math.rsqrt %21 : vector<2x8x1xf32>
    %23 = vector.broadcast %22 : vector<2x8x1xf32> to vector<2x8x32xf32>
    %24 = arith.mulf %19, %23 : vector<2x8x32xf32>
    %25 = vector.shape_cast %5 : vector<1x32xf32> to vector<1x1x32xf32>
    %26 = vector.broadcast %25 : vector<1x1x32xf32> to vector<2x8x32xf32>
    %27 = arith.mulf %24, %26 : vector<2x8x32xf32>
    %28 = vector.shape_cast %6 : vector<1x32xf32> to vector<1x1x32xf32>
    %29 = vector.broadcast %28 : vector<1x1x32xf32> to vector<2x8x32xf32>
    %30 = arith.addf %27, %29 : vector<2x8x32xf32>
    %c0_12 = arith.constant 0 : index
    %c0_13 = arith.constant 0 : index
    %31 = vector.load %arg4[%c0_12, %c0_13] : memref<32x96xf32, #tpu.memory_space<vmem>>, vector<32x96xf32>
    "tpu.trace_start"() <{level = 10 : i32, message = "bsd,de->bse"}> : () -> ()
    %cst_14 = arith.constant dense<0.000000e+00> : vector<2x8x96xf32>
    %32 = tpu.matmul %30, %31, %cst_14 {dimension_numbers = #tpu.dot_dimension_numbers<[2], [0], [0, 1], [1], [0, 0, 0, 1, 1, 1], [], []>} : vector<2x8x32xf32>, vector<32x96xf32>, vector<2x8x96xf32> -> vector<2x8x96xf32>
    "tpu.trace_stop"() : () -> ()
    %c0_15 = arith.constant 0 : index
    %c0_16 = arith.constant 0 : index
    %33 = vector.load %arg5[%c0_15, %c0_16] : memref<1x96xf32, #tpu.memory_space<vmem>>, vector<1x96xf32>
    %34 = vector.shape_cast %33 : vector<1x96xf32> to vector<1x1x96xf32>
    %35 = vector.broadcast %34 : vector<1x1x96xf32> to vector<2x8x96xf32>
    %36 = arith.addf %32, %35 : vector<2x8x96xf32>
    %37 = vector.extract_strided_slice %36 {offsets = [0, 0, 0], sizes = [2, 8, 32], strides = [1, 1, 1]} : vector<2x8x96xf32> to vector<2x8x32xf32>
    %38 = vector.extract_strided_slice %36 {offsets = [0, 0, 32], sizes = [2, 8, 32], strides = [1, 1, 1]} : vector<2x8x96xf32> to vector<2x8x32xf32>
    %39 = vector.extract_strided_slice %36 {offsets = [0, 0, 64], sizes = [2, 8, 32], strides = [1, 1, 1]} : vector<2x8x96xf32> to vector<2x8x32xf32>
    "tpu.trace_start"() <{level = 10 : i32, message = "bqd,bkd->bqk"}> : () -> ()
    %cst_17 = arith.constant dense<0.000000e+00> : vector<2x8x8xf32>
    %40 = tpu.matmul %37, %38, %cst_17 {dimension_numbers = #tpu.dot_dimension_numbers<[2], [2], [1], [1], [0, 0, 0, 1, 1, 1], [0], [0]>} : vector<2x8x32xf32>, vector<2x8x32xf32>, vector<2x8x8xf32> -> vector<2x8x8xf32>
    "tpu.trace_stop"() : () -> ()
    %cst_18 = arith.constant 0.176776692 : f32
    %41 = vector.broadcast %cst_18 : f32 to vector<2x8x8xf32>
    %42 = arith.mulf %40, %41 : vector<2x8x8xf32>
    %cst_19 = arith.constant dense<0xFF800000> : vector<2x8xf32>
    %43 = vector.multi_reduction <maximumf>, %42, %cst_19 [2] : vector<2x8x8xf32> to vector<2x8xf32>
    %44 = vector.shape_cast %43 : vector<2x8xf32> to vector<2x8x1xf32>
    %45 = vector.broadcast %44 : vector<2x8x1xf32> to vector<2x8x8xf32>
    %46 = arith.subf %42, %45 : vector<2x8x8xf32>
    %47 = math.exp %46 : vector<2x8x8xf32>
    %cst_20 = arith.constant dense<0.000000e+00> : vector<2x8xf32>
    %48 = vector.multi_reduction <add>, %47, %cst_20 [2] : vector<2x8x8xf32> to vector<2x8xf32>
    %49 = vector.shape_cast %48 : vector<2x8xf32> to vector<2x8x1xf32>
    %50 = tpu.reciprocal %49 {approx = true} : vector<2x8x1xf32> -> vector<2x8x1xf32>
    %51 = vector.broadcast %50 : vector<2x8x1xf32> to vector<2x8x8xf32>
    %52 = arith.mulf %47, %51 : vector<2x8x8xf32>
    "tpu.trace_start"() <{level = 10 : i32, message = "bqk,bkd->bqd"}> : () -> ()
    %cst_21 = arith.constant dense<0.000000e+00> : vector<2x8x32xf32>
    %53 = tpu.matmul %52, %39, %cst_21 {dimension_numbers = #tpu.dot_dimension_numbers<[2], [1], [1], [2], [0, 0, 0, 1, 1, 2], [0], [0]>} : vector<2x8x8xf32>, vector<2x8x32xf32>, vector<2x8x32xf32> -> vector<2x8x32xf32>
    "tpu.trace_stop"() : () -> ()
    %c0_22 = arith.constant 0 : index
    %c0_23 = arith.constant 0 : index
    %54 = vector.load %arg6[%c0_22, %c0_23] : memref<32x32xf32, #tpu.memory_space<vmem>>, vector<32x32xf32>
    "tpu.trace_start"() <{level = 10 : i32, message = "bsd,de->bse"}> : () -> ()
    %cst_24 = arith.constant dense<0.000000e+00> : vector<2x8x32xf32>
    %55 = tpu.matmul %53, %54, %cst_24 {dimension_numbers = #tpu.dot_dimension_numbers<[2], [0], [0, 1], [1], [0, 0, 0, 1, 1, 1], [], []>} : vector<2x8x32xf32>, vector<32x32xf32>, vector<2x8x32xf32> -> vector<2x8x32xf32>
    "tpu.trace_stop"() : () -> ()
    %c0_25 = arith.constant 0 : index
    %c0_26 = arith.constant 0 : index
    %56 = vector.load %arg7[%c0_25, %c0_26] : memref<1x32xf32, #tpu.memory_space<vmem>>, vector<1x32xf32>
    %57 = vector.shape_cast %56 : vector<1x32xf32> to vector<1x1x32xf32>
    %58 = vector.broadcast %57 : vector<1x1x32xf32> to vector<2x8x32xf32>
    %59 = arith.addf %55, %58 : vector<2x8x32xf32>
    %60 = arith.addf %30, %59 : vector<2x8x32xf32>
    %c0_27 = arith.constant 0 : index
    %c0_28 = arith.constant 0 : index
    %61 = vector.load %arg8[%c0_27, %c0_28] : memref<1x32xf32, #tpu.memory_space<vmem>>, vector<1x32xf32>
    %c0_29 = arith.constant 0 : index
    %c0_30 = arith.constant 0 : index
    %62 = vector.load %arg9[%c0_29, %c0_30] : memref<1x32xf32, #tpu.memory_space<vmem>>, vector<1x32xf32>
    %cst_31 = arith.constant dense<0.000000e+00> : vector<2x8xf32>
    %63 = vector.multi_reduction <add>, %60, %cst_31 [2] : vector<2x8x32xf32> to vector<2x8xf32>
    %64 = vector.shape_cast %63 : vector<2x8xf32> to vector<2x8x1xf32>
    %cst_32 = arith.constant 3.200000e+01 : f32
    %65 = vector.broadcast %cst_32 : f32 to vector<2x8x1xf32>
    %66 = arith.divf %64, %65 : vector<2x8x1xf32>
    %67 = vector.broadcast %66 : vector<2x8x1xf32> to vector<2x8x32xf32>
    %68 = arith.subf %60, %67 : vector<2x8x32xf32>
    %69 = arith.mulf %68, %68 : vector<2x8x32xf32>
    %cst_33 = arith.constant dense<0.000000e+00> : vector<2x8xf32>
    %70 = vector.multi_reduction <add>, %69, %cst_33 [2] : vector<2x8x32xf32> to vector<2x8xf32>
    %71 = vector.shape_cast %70 : vector<2x8xf32> to vector<2x8x1xf32>
    %cst_34 = arith.constant 3.200000e+01 : f32
    %72 = vector.broadcast %cst_34 : f32 to vector<2x8x1xf32>
    %73 = arith.divf %71, %72 : vector<2x8x1xf32>
    %74 = vector.broadcast %66 : vector<2x8x1xf32> to vector<2x8x32xf32>
    %75 = arith.subf %60, %74 : vector<2x8x32xf32>
    %cst_35 = arith.constant 9.99999996E-13 : f32
    %76 = vector.broadcast %cst_35 : f32 to vector<2x8x1xf32>
    %77 = arith.addf %73, %76 : vector<2x8x1xf32>
    %78 = math.rsqrt %77 : vector<2x8x1xf32>
    %79 = vector.broadcast %78 : vector<2x8x1xf32> to vector<2x8x32xf32>
    %80 = arith.mulf %75, %79 : vector<2x8x32xf32>
    %81 = vector.shape_cast %61 : vector<1x32xf32> to vector<1x1x32xf32>
    %82 = vector.broadcast %81 : vector<1x1x32xf32> to vector<2x8x32xf32>
    %83 = arith.mulf %80, %82 : vector<2x8x32xf32>
    %84 = vector.shape_cast %62 : vector<1x32xf32> to vector<1x1x32xf32>
    %85 = vector.broadcast %84 : vector<1x1x32xf32> to vector<2x8x32xf32>
    %86 = arith.addf %83, %85 : vector<2x8x32xf32>
    %c0_36 = arith.constant 0 : index
    %c0_37 = arith.constant 0 : index
    %87 = vector.load %arg10[%c0_36, %c0_37] : memref<32x64xf32, #tpu.memory_space<vmem>>, vector<32x64xf32>
    "tpu.trace_start"() <{level = 10 : i32, message = "bsd,df->bsf"}> : () -> ()
    %cst_38 = arith.constant dense<0.000000e+00> : vector<2x8x64xf32>
    %88 = tpu.matmul %86, %87, %cst_38 {dimension_numbers = #tpu.dot_dimension_numbers<[2], [0], [0, 1], [1], [0, 0, 0, 1, 1, 1], [], []>} : vector<2x8x32xf32>, vector<32x64xf32>, vector<2x8x64xf32> -> vector<2x8x64xf32>
    "tpu.trace_stop"() : () -> ()
    %c0_39 = arith.constant 0 : index
    %c0_40 = arith.constant 0 : index
    %89 = vector.load %arg11[%c0_39, %c0_40] : memref<1x64xf32, #tpu.memory_space<vmem>>, vector<1x64xf32>
    %90 = vector.shape_cast %89 : vector<1x64xf32> to vector<1x1x64xf32>
    %91 = vector.broadcast %90 : vector<1x1x64xf32> to vector<2x8x64xf32>
    %92 = arith.addf %88, %91 : vector<2x8x64xf32>
    %93 = arith.mulf %92, %92 : vector<2x8x64xf32>
    %94 = arith.mulf %92, %93 : vector<2x8x64xf32>
    %cst_41 = arith.constant 4.471500e-02 : f32
    %95 = vector.broadcast %cst_41 : f32 to vector<2x8x64xf32>
    %96 = arith.mulf %95, %94 : vector<2x8x64xf32>
    %97 = arith.addf %92, %96 : vector<2x8x64xf32>
    %cst_42 = arith.constant 0.797884583 : f32
    %98 = vector.broadcast %cst_42 : f32 to vector<2x8x64xf32>
    %99 = arith.mulf %98, %97 : vector<2x8x64xf32>
    %100 = math.tanh %99 : vector<2x8x64xf32>
    %cst_43 = arith.constant 1.000000e+00 : f32
    %101 = vector.broadcast %cst_43 : f32 to vector<2x8x64xf32>
    %102 = arith.addf %101, %100 : vector<2x8x64xf32>
    %cst_44 = arith.constant 5.000000e-01 : f32
    %103 = vector.broadcast %cst_44 : f32 to vector<2x8x64xf32>
    %104 = arith.mulf %103, %102 : vector<2x8x64xf32>
    %105 = arith.mulf %92, %104 : vector<2x8x64xf32>
    %c0_45 = arith.constant 0 : index
    %c0_46 = arith.constant 0 : index
    %106 = vector.load %arg12[%c0_45, %c0_46] : memref<64x32xf32, #tpu.memory_space<vmem>>, vector<64x32xf32>
    "tpu.trace_start"() <{level = 10 : i32, message = "bsf,fd->bsd"}> : () -> ()
    %cst_47 = arith.constant dense<0.000000e+00> : vector<2x8x32xf32>
    %107 = tpu.matmul %105, %106, %cst_47 {dimension_numbers = #tpu.dot_dimension_numbers<[2], [0], [0, 1], [1], [0, 0, 0, 1, 1, 1], [], []>} : vector<2x8x64xf32>, vector<64x32xf32>, vector<2x8x32xf32> -> vector<2x8x32xf32>
    "tpu.trace_stop"() : () -> ()
    %c0_48 = arith.constant 0 : index
    %c0_49 = arith.constant 0 : index
    %108 = vector.load %arg13[%c0_48, %c0_49] : memref<1x32xf32, #tpu.memory_space<vmem>>, vector<1x32xf32>
    %109 = vector.shape_cast %108 : vector<1x32xf32> to vector<1x1x32xf32>
    %110 = vector.broadcast %109 : vector<1x1x32xf32> to vector<2x8x32xf32>
    %111 = arith.addf %107, %110 : vector<2x8x32xf32>
    %112 = arith.addf %86, %111 : vector<2x8x32xf32>
    %c0_50 = arith.constant 0 : index
    %c0_51 = arith.constant 0 : index
    %113 = vector.load %arg14[%c0_50, %c0_51] : memref<1x32xf32, #tpu.memory_space<vmem>>, vector<1x32xf32>
    %c0_52 = arith.constant 0 : index
    %c0_53 = arith.constant 0 : index
    %114 = vector.load %arg15[%c0_52, %c0_53] : memref<1x32xf32, #tpu.memory_space<vmem>>, vector<1x32xf32>
    %cst_54 = arith.constant dense<0.000000e+00> : vector<2x8xf32>
    %115 = vector.multi_reduction <add>, %112, %cst_54 [2] : vector<2x8x32xf32> to vector<2x8xf32>
    %116 = vector.shape_cast %115 : vector<2x8xf32> to vector<2x8x1xf32>
    %cst_55 = arith.constant 3.200000e+01 : f32
    %117 = vector.broadcast %cst_55 : f32 to vector<2x8x1xf32>
    %118 = arith.divf %116, %117 : vector<2x8x1xf32>
    %119 = vector.broadcast %118 : vector<2x8x1xf32> to vector<2x8x32xf32>
    %120 = arith.subf %112, %119 : vector<2x8x32xf32>
    %121 = arith.mulf %120, %120 : vector<2x8x32xf32>
    %cst_56 = arith.constant dense<0.000000e+00> : vector<2x8xf32>
    %122 = vector.multi_reduction <add>, %121, %cst_56 [2] : vector<2x8x32xf32> to vector<2x8xf32>
    %123 = vector.shape_cast %122 : vector<2x8xf32> to vector<2x8x1xf32>
    %cst_57 = arith.constant 3.200000e+01 : f32
    %124 = vector.broadcast %cst_57 : f32 to vector<2x8x1xf32>
    %125 = arith.divf %123, %124 : vector<2x8x1xf32>
    %126 = vector.broadcast %118 : vector<2x8x1xf32> to vector<2x8x32xf32>
    %127 = arith.subf %112, %126 : vector<2x8x32xf32>
    %cst_58 = arith.constant 9.99999996E-13 : f32
    %128 = vector.broadcast %cst_58 : f32 to vector<2x8x1xf32>
    %129 = arith.addf %125, %128 : vector<2x8x1xf32>
    %130 = math.rsqrt %129 : vector<2x8x1xf32>
    %131 = vector.broadcast %130 : vector<2x8x1xf32> to vector<2x8x32xf32>
    %132 = arith.mulf %127, %131 : vector<2x8x32xf32>
    %133 = vector.shape_cast %113 : vector<1x32xf32> to vector<1x1x32xf32>
    %134 = vector.broadcast %133 : vector<1x1x32xf32> to vector<2x8x32xf32>
    %135 = arith.mulf %132, %134 : vector<2x8x32xf32>
    %136 = vector.shape_cast %114 : vector<1x32xf32> to vector<1x1x32xf32>
    %137 = vector.broadcast %136 : vector<1x1x32xf32> to vector<2x8x32xf32>
    %138 = arith.addf %135, %137 : vector<2x8x32xf32>
    %c0_59 = arith.constant 0 : index
    %c0_60 = arith.constant 0 : index
    %139 = vector.load %arg16[%c0_59, %c0_60] : memref<32x32xf32, #tpu.memory_space<vmem>>, vector<32x32xf32>
    "tpu.trace_start"() <{level = 10 : i32, message = "bsd,dr->bsr"}> : () -> ()
    %cst_61 = arith.constant dense<0.000000e+00> : vector<2x8x32xf32>
    %140 = tpu.matmul %138, %139, %cst_61 {dimension_numbers = #tpu.dot_dimension_numbers<[2], [0], [0, 1], [1], [0, 0, 0, 1, 1, 1], [], []>} : vector<2x8x32xf32>, vector<32x32xf32>, vector<2x8x32xf32> -> vector<2x8x32xf32>
    "tpu.trace_stop"() : () -> ()
    %c0_62 = arith.constant 0 : index
    %c0_63 = arith.constant 0 : index
    %141 = vector.load %arg17[%c0_62, %c0_63] : memref<1x32xf32, #tpu.memory_space<vmem>>, vector<1x32xf32>
    %142 = vector.shape_cast %141 : vector<1x32xf32> to vector<1x1x32xf32>
    %143 = vector.broadcast %142 : vector<1x1x32xf32> to vector<2x8x32xf32>
    %144 = arith.addf %140, %143 : vector<2x8x32xf32>
    %cst_64 = arith.constant 0.000000e+00 : f32
    %145 = vector.broadcast %cst_64 : f32 to vector<2x8x32xf32>
    %146 = arith.maximumf %144, %145 : vector<2x8x32xf32>
    %c0_65 = arith.constant 0 : index
    %c0_66 = arith.constant 0 : index
    %c0_67 = arith.constant 0 : index
    %147 = vector.load %arg18[%c0_65, %c0_66, %c0_67] : memref<3x32x32xf32, #tpu.memory_space<vmem>>, vector<1x32x32xf32>
    %148 = vector.shape_cast %147 : vector<1x32x32xf32> to vector<32x32xf32>
    %c1 = arith.constant 1 : index
    %c0_68 = arith.constant 0 : index
    %c0_69 = arith.constant 0 : index
    %149 = vector.load %arg18[%c1, %c0_68, %c0_69] : memref<3x32x32xf32, #tpu.memory_space<vmem>>, vector<1x32x32xf32>
    %150 = vector.shape_cast %149 : vector<1x32x32xf32> to vector<32x32xf32>
    %c2 = arith.constant 2 : index
    %c0_70 = arith.constant 0 : index
    %c0_71 = arith.constant 0 : index
    %151 = vector.load %arg18[%c2, %c0_70, %c0_71] : memref<3x32x32xf32, #tpu.memory_space<vmem>>, vector<1x32x32xf32>
    %152 = vector.shape_cast %151 : vector<1x32x32xf32> to vector<32x32xf32>
    %c0_72 = arith.constant 0 : index
    %c0_73 = arith.constant 0 : index
    %c0_74 = arith.constant 0 : index
    %153 = vector.load %arg19[%c0_72, %c0_73, %c0_74] : memref<3x32x32xf32, #tpu.memory_space<vmem>>, vector<1x32x32xf32>
    %154 = vector.shape_cast %153 : vector<1x32x32xf32> to vector<32x32xf32>
    %c1_75 = arith.constant 1 : index
    %c0_76 = arith.constant 0 : index
    %c0_77 = arith.constant 0 : index
    %155 = vector.load %arg19[%c1_75, %c0_76, %c0_77] : memref<3x32x32xf32, #tpu.memory_space<vmem>>, vector<1x32x32xf32>
    %156 = vector.shape_cast %155 : vector<1x32x32xf32> to vector<32x32xf32>
    %c2_78 = arith.constant 2 : index
    %c0_79 = arith.constant 0 : index
    %c0_80 = arith.constant 0 : index
    %157 = vector.load %arg19[%c2_78, %c0_79, %c0_80] : memref<3x32x32xf32, #tpu.memory_space<vmem>>, vector<1x32x32xf32>
    %158 = vector.shape_cast %157 : vector<1x32x32xf32> to vector<32x32xf32>
    %c0_81 = arith.constant 0 : index
    %c0_82 = arith.constant 0 : index
    %c0_83 = arith.constant 0 : index
    %159 = vector.load %arg20[%c0_81, %c0_82, %c0_83] : memref<3x1x32xf32, #tpu.memory_space<vmem>>, vector<1x1x32xf32>
    %160 = vector.shape_cast %159 : vector<1x1x32xf32> to vector<1x32xf32>
    %c1_84 = arith.constant 1 : index
    %c0_85 = arith.constant 0 : index
    %c0_86 = arith.constant 0 : index
    %161 = vector.load %arg20[%c1_84, %c0_85, %c0_86] : memref<3x1x32xf32, #tpu.memory_space<vmem>>, vector<1x1x32xf32>
    %162 = vector.shape_cast %161 : vector<1x1x32xf32> to vector<1x32xf32>
    %c2_87 = arith.constant 2 : index
    %c0_88 = arith.constant 0 : index
    %c0_89 = arith.constant 0 : index
    %163 = vector.load %arg20[%c2_87, %c0_88, %c0_89] : memref<3x1x32xf32, #tpu.memory_space<vmem>>, vector<1x1x32xf32>
    %164 = vector.shape_cast %163 : vector<1x1x32xf32> to vector<1x32xf32>
    %c0_90 = arith.constant 0 : index
    %c0_91 = arith.constant 0 : index
    %c0_92 = arith.constant 0 : index
    %165 = vector.load %arg21[%c0_90, %c0_91, %c0_92] : memref<3x1x32xf32, #tpu.memory_space<vmem>>, vector<1x1x32xf32>
    %166 = vector.shape_cast %165 : vector<1x1x32xf32> to vector<1x32xf32>
    %c1_93 = arith.constant 1 : index
    %c0_94 = arith.constant 0 : index
    %c0_95 = arith.constant 0 : index
    %167 = vector.load %arg21[%c1_93, %c0_94, %c0_95] : memref<3x1x32xf32, #tpu.memory_space<vmem>>, vector<1x1x32xf32>
    %168 = vector.shape_cast %167 : vector<1x1x32xf32> to vector<1x32xf32>
    %c2_96 = arith.constant 2 : index
    %c0_97 = arith.constant 0 : index
    %c0_98 = arith.constant 0 : index
    %169 = vector.load %arg21[%c2_96, %c0_97, %c0_98] : memref<3x1x32xf32, #tpu.memory_space<vmem>>, vector<1x1x32xf32>
    %170 = vector.shape_cast %169 : vector<1x1x32xf32> to vector<1x32xf32>
    "tpu.trace_start"() <{level = 10 : i32, message = "bsr,rh->bsh"}> : () -> ()
    %cst_99 = arith.constant dense<0.000000e+00> : vector<2x8x32xf32>
    %171 = tpu.matmul %146, %148, %cst_99 {dimension_numbers = #tpu.dot_dimension_numbers<[2], [0], [0, 1], [1], [0, 0, 0, 1, 1, 1], [], []>} : vector<2x8x32xf32>, vector<32x32xf32>, vector<2x8x32xf32> -> vector<2x8x32xf32>
    "tpu.trace_stop"() : () -> ()
    %172 = arith.addf %160, %166 : vector<1x32xf32>
    %173 = vector.shape_cast %172 : vector<1x32xf32> to vector<1x1x32xf32>
    %174 = vector.broadcast %173 : vector<1x1x32xf32> to vector<2x8x32xf32>
    %175 = arith.addf %171, %174 : vector<2x8x32xf32>
    "tpu.trace_start"() <{level = 10 : i32, message = "bsr,rh->bsh"}> : () -> ()
    %cst_100 = arith.constant dense<0.000000e+00> : vector<2x8x32xf32>
    %176 = tpu.matmul %146, %150, %cst_100 {dimension_numbers = #tpu.dot_dimension_numbers<[2], [0], [0, 1], [1], [0, 0, 0, 1, 1, 1], [], []>} : vector<2x8x32xf32>, vector<32x32xf32>, vector<2x8x32xf32> -> vector<2x8x32xf32>
    "tpu.trace_stop"() : () -> ()
    %177 = arith.addf %162, %168 : vector<1x32xf32>
    %178 = vector.shape_cast %177 : vector<1x32xf32> to vector<1x1x32xf32>
    %179 = vector.broadcast %178 : vector<1x1x32xf32> to vector<2x8x32xf32>
    %180 = arith.addf %176, %179 : vector<2x8x32xf32>
    "tpu.trace_start"() <{level = 10 : i32, message = "bsr,rh->bsh"}> : () -> ()
    %cst_101 = arith.constant dense<0.000000e+00> : vector<2x8x32xf32>
    %181 = tpu.matmul %146, %152, %cst_101 {dimension_numbers = #tpu.dot_dimension_numbers<[2], [0], [0, 1], [1], [0, 0, 0, 1, 1, 1], [], []>} : vector<2x8x32xf32>, vector<32x32xf32>, vector<2x8x32xf32> -> vector<2x8x32xf32>
    "tpu.trace_stop"() : () -> ()
    %182 = vector.shape_cast %164 : vector<1x32xf32> to vector<1x1x32xf32>
    %183 = vector.broadcast %182 : vector<1x1x32xf32> to vector<2x8x32xf32>
    %184 = arith.addf %181, %183 : vector<2x8x32xf32>
    %185 = vector.extract_strided_slice %175 {offsets = [0, 0, 0], sizes = [2, 1, 32], strides = [1, 1, 1]} : vector<2x8x32xf32> to vector<2x1x32xf32>
    %186 = vector.shape_cast %185 : vector<2x1x32xf32> to vector<2x32xf32>
    %187 = arith.negf %186 : vector<2x32xf32>
    %188 = math.exp %187 : vector<2x32xf32>
    %cst_102 = arith.constant 1.000000e+00 : f32
    %189 = vector.broadcast %cst_102 : f32 to vector<2x32xf32>
    %190 = arith.addf %189, %188 : vector<2x32xf32>
    %191 = arith.divf %189, %190 : vector<2x32xf32>
    %192 = vector.extract_strided_slice %180 {offsets = [0, 0, 0], sizes = [2, 1, 32], strides = [1, 1, 1]} : vector<2x8x32xf32> to vector<2x1x32xf32>
    %193 = vector.shape_cast %192 : vector<2x1x32xf32> to vector<2x32xf32>
    %194 = arith.negf %193 : vector<2x32xf32>
    %195 = math.exp %194 : vector<2x32xf32>
    %cst_103 = arith.constant 1.000000e+00 : f32
    %196 = vector.broadcast %cst_103 : f32 to vector<2x32xf32>
    %197 = arith.addf %196, %195 : vector<2x32xf32>
    %198 = arith.divf %196, %197 : vector<2x32xf32>
    %199 = vector.extract_strided_slice %184 {offsets = [0, 0, 0], sizes = [2, 1, 32], strides = [1, 1, 1]} : vector<2x8x32xf32> to vector<2x1x32xf32>
    %200 = vector.shape_cast %199 : vector<2x1x32xf32> to vector<2x32xf32>
    %201 = vector.broadcast %170 : vector<1x32xf32> to vector<2x32xf32>
    %202 = arith.mulf %191, %201 : vector<2x32xf32>
    %203 = arith.addf %200, %202 : vector<2x32xf32>
    %204 = math.tanh %203 : vector<2x32xf32>
    %cst_104 = arith.constant 0.000000e+00 : f32
    %205 = vector.broadcast %cst_104 : f32 to vector<2x32xf32>
    %206 = arith.subf %205, %204 : vector<2x32xf32>
    %207 = arith.mulf %198, %206 : vector<2x32xf32>
    %208 = arith.addf %204, %207 : vector<2x32xf32>
    %cst_105 = arith.constant dense<0.000000e+00> : vector<2x32xf32>
    %209 = tpu.matmul %208, %154, %cst_105 {dimension_numbers = #tpu.dot_dimension_numbers<[1], [0], [0], [1], [0, 0, 1, 1], [], []>} : vector<2x32xf32>, vector<32x32xf32>, vector<2x32xf32> -> vector<2x32xf32>
    %cst_106 = arith.constant dense<0.000000e+00> : vector<2x32xf32>
    %210 = tpu.matmul %208, %156, %cst_106 {dimension_numbers = #tpu.dot_dimension_numbers<[1], [0], [0], [1], [0, 0, 1, 1], [], []>} : vector<2x32xf32>, vector<32x32xf32>, vector<2x32xf32> -> vector<2x32xf32>
    %cst_107 = arith.constant dense<0.000000e+00> : vector<2x32xf32>
    %211 = tpu.matmul %208, %158, %cst_107 {dimension_numbers = #tpu.dot_dimension_numbers<[1], [0], [0], [1], [0, 0, 1, 1], [], []>} : vector<2x32xf32>, vector<32x32xf32>, vector<2x32xf32> -> vector<2x32xf32>
    %212 = vector.broadcast %170 : vector<1x32xf32> to vector<2x32xf32>
    %213 = arith.addf %211, %212 : vector<2x32xf32>
    %214 = vector.extract_strided_slice %175 {offsets = [0, 1, 0], sizes = [2, 1, 32], strides = [1, 1, 1]} : vector<2x8x32xf32> to vector<2x1x32xf32>
    %215 = vector.shape_cast %214 : vector<2x1x32xf32> to vector<2x32xf32>
    %216 = arith.addf %215, %209 : vector<2x32xf32>
    %217 = arith.negf %216 : vector<2x32xf32>
    %218 = math.exp %217 : vector<2x32xf32>
    %cst_108 = arith.constant 1.000000e+00 : f32
    %219 = vector.broadcast %cst_108 : f32 to vector<2x32xf32>
    %220 = arith.addf %219, %218 : vector<2x32xf32>
    %221 = arith.divf %219, %220 : vector<2x32xf32>
    %222 = vector.extract_strided_slice %180 {offsets = [0, 1, 0], sizes = [2, 1, 32], strides = [1, 1, 1]} : vector<2x8x32xf32> to vector<2x1x32xf32>
    %223 = vector.shape_cast %222 : vector<2x1x32xf32> to vector<2x32xf32>
    %224 = arith.addf %223, %210 : vector<2x32xf32>
    %225 = arith.negf %224 : vector<2x32xf32>
    %226 = math.exp %225 : vector<2x32xf32>
    %cst_109 = arith.constant 1.000000e+00 : f32
    %227 = vector.broadcast %cst_109 : f32 to vector<2x32xf32>
    %228 = arith.addf %227, %226 : vector<2x32xf32>
    %229 = arith.divf %227, %228 : vector<2x32xf32>
    %230 = vector.extract_strided_slice %184 {offsets = [0, 1, 0], sizes = [2, 1, 32], strides = [1, 1, 1]} : vector<2x8x32xf32> to vector<2x1x32xf32>
    %231 = vector.shape_cast %230 : vector<2x1x32xf32> to vector<2x32xf32>
    %232 = arith.mulf %221, %213 : vector<2x32xf32>
    %233 = arith.addf %231, %232 : vector<2x32xf32>
    %234 = math.tanh %233 : vector<2x32xf32>
    %235 = arith.subf %208, %234 : vector<2x32xf32>
    %236 = arith.mulf %229, %235 : vector<2x32xf32>
    %237 = arith.addf %234, %236 : vector<2x32xf32>
    %cst_110 = arith.constant dense<0.000000e+00> : vector<2x32xf32>
    %238 = tpu.matmul %237, %154, %cst_110 {dimension_numbers = #tpu.dot_dimension_numbers<[1], [0], [0], [1], [0, 0, 1, 1], [], []>} : vector<2x32xf32>, vector<32x32xf32>, vector<2x32xf32> -> vector<2x32xf32>
    %cst_111 = arith.constant dense<0.000000e+00> : vector<2x32xf32>
    %239 = tpu.matmul %237, %156, %cst_111 {dimension_numbers = #tpu.dot_dimension_numbers<[1], [0], [0], [1], [0, 0, 1, 1], [], []>} : vector<2x32xf32>, vector<32x32xf32>, vector<2x32xf32> -> vector<2x32xf32>
    %cst_112 = arith.constant dense<0.000000e+00> : vector<2x32xf32>
    %240 = tpu.matmul %237, %158, %cst_112 {dimension_numbers = #tpu.dot_dimension_numbers<[1], [0], [0], [1], [0, 0, 1, 1], [], []>} : vector<2x32xf32>, vector<32x32xf32>, vector<2x32xf32> -> vector<2x32xf32>
    %241 = vector.broadcast %170 : vector<1x32xf32> to vector<2x32xf32>
    %242 = arith.addf %240, %241 : vector<2x32xf32>
    %243 = vector.extract_strided_slice %175 {offsets = [0, 2, 0], sizes = [2, 1, 32], strides = [1, 1, 1]} : vector<2x8x32xf32> to vector<2x1x32xf32>
    %244 = vector.shape_cast %243 : vector<2x1x32xf32> to vector<2x32xf32>
    %245 = arith.addf %244, %238 : vector<2x32xf32>
    %246 = arith.negf %245 : vector<2x32xf32>
    %247 = math.exp %246 : vector<2x32xf32>
    %cst_113 = arith.constant 1.000000e+00 : f32
    %248 = vector.broadcast %cst_113 : f32 to vector<2x32xf32>
    %249 = arith.addf %248, %247 : vector<2x32xf32>
    %250 = arith.divf %248, %249 : vector<2x32xf32>
    %251 = vector.extract_strided_slice %180 {offsets = [0, 2, 0], sizes = [2, 1, 32], strides = [1, 1, 1]} : vector<2x8x32xf32> to vector<2x1x32xf32>
    %252 = vector.shape_cast %251 : vector<2x1x32xf32> to vector<2x32xf32>
    %253 = arith.addf %252, %239 : vector<2x32xf32>
    %254 = arith.negf %253 : vector<2x32xf32>
    %255 = math.exp %254 : vector<2x32xf32>
    %cst_114 = arith.constant 1.000000e+00 : f32
    %256 = vector.broadcast %cst_114 : f32 to vector<2x32xf32>
    %257 = arith.addf %256, %255 : vector<2x32xf32>
    %258 = arith.divf %256, %257 : vector<2x32xf32>
    %259 = vector.extract_strided_slice %184 {offsets = [0, 2, 0], sizes = [2, 1, 32], strides = [1, 1, 1]} : vector<2x8x32xf32> to vector<2x1x32xf32>
    %260 = vector.shape_cast %259 : vector<2x1x32xf32> to vector<2x32xf32>
    %261 = arith.mulf %250, %242 : vector<2x32xf32>
    %262 = arith.addf %260, %261 : vector<2x32xf32>
    %263 = math.tanh %262 : vector<2x32xf32>
    %264 = arith.subf %237, %263 : vector<2x32xf32>
    %265 = arith.mulf %258, %264 : vector<2x32xf32>
    %266 = arith.addf %263, %265 : vector<2x32xf32>
    %cst_115 = arith.constant dense<0.000000e+00> : vector<2x32xf32>
    %267 = tpu.matmul %266, %154, %cst_115 {dimension_numbers = #tpu.dot_dimension_numbers<[1], [0], [0], [1], [0, 0, 1, 1], [], []>} : vector<2x32xf32>, vector<32x32xf32>, vector<2x32xf32> -> vector<2x32xf32>
    %cst_116 = arith.constant dense<0.000000e+00> : vector<2x32xf32>
    %268 = tpu.matmul %266, %156, %cst_116 {dimension_numbers = #tpu.dot_dimension_numbers<[1], [0], [0], [1], [0, 0, 1, 1], [], []>} : vector<2x32xf32>, vector<32x32xf32>, vector<2x32xf32> -> vector<2x32xf32>
    %cst_117 = arith.constant dense<0.000000e+00> : vector<2x32xf32>
    %269 = tpu.matmul %266, %158, %cst_117 {dimension_numbers = #tpu.dot_dimension_numbers<[1], [0], [0], [1], [0, 0, 1, 1], [], []>} : vector<2x32xf32>, vector<32x32xf32>, vector<2x32xf32> -> vector<2x32xf32>
    %270 = vector.broadcast %170 : vector<1x32xf32> to vector<2x32xf32>
    %271 = arith.addf %269, %270 : vector<2x32xf32>
    %272 = vector.extract_strided_slice %175 {offsets = [0, 3, 0], sizes = [2, 1, 32], strides = [1, 1, 1]} : vector<2x8x32xf32> to vector<2x1x32xf32>
    %273 = vector.shape_cast %272 : vector<2x1x32xf32> to vector<2x32xf32>
    %274 = arith.addf %273, %267 : vector<2x32xf32>
    %275 = arith.negf %274 : vector<2x32xf32>
    %276 = math.exp %275 : vector<2x32xf32>
    %cst_118 = arith.constant 1.000000e+00 : f32
    %277 = vector.broadcast %cst_118 : f32 to vector<2x32xf32>
    %278 = arith.addf %277, %276 : vector<2x32xf32>
    %279 = arith.divf %277, %278 : vector<2x32xf32>
    %280 = vector.extract_strided_slice %180 {offsets = [0, 3, 0], sizes = [2, 1, 32], strides = [1, 1, 1]} : vector<2x8x32xf32> to vector<2x1x32xf32>
    %281 = vector.shape_cast %280 : vector<2x1x32xf32> to vector<2x32xf32>
    %282 = arith.addf %281, %268 : vector<2x32xf32>
    %283 = arith.negf %282 : vector<2x32xf32>
    %284 = math.exp %283 : vector<2x32xf32>
    %cst_119 = arith.constant 1.000000e+00 : f32
    %285 = vector.broadcast %cst_119 : f32 to vector<2x32xf32>
    %286 = arith.addf %285, %284 : vector<2x32xf32>
    %287 = arith.divf %285, %286 : vector<2x32xf32>
    %288 = vector.extract_strided_slice %184 {offsets = [0, 3, 0], sizes = [2, 1, 32], strides = [1, 1, 1]} : vector<2x8x32xf32> to vector<2x1x32xf32>
    %289 = vector.shape_cast %288 : vector<2x1x32xf32> to vector<2x32xf32>
    %290 = arith.mulf %279, %271 : vector<2x32xf32>
    %291 = arith.addf %289, %290 : vector<2x32xf32>
    %292 = math.tanh %291 : vector<2x32xf32>
    %293 = arith.subf %266, %292 : vector<2x32xf32>
    %294 = arith.mulf %287, %293 : vector<2x32xf32>
    %295 = arith.addf %292, %294 : vector<2x32xf32>
    %cst_120 = arith.constant dense<0.000000e+00> : vector<2x32xf32>
    %296 = tpu.matmul %295, %154, %cst_120 {dimension_numbers = #tpu.dot_dimension_numbers<[1], [0], [0], [1], [0, 0, 1, 1], [], []>} : vector<2x32xf32>, vector<32x32xf32>, vector<2x32xf32> -> vector<2x32xf32>
    %cst_121 = arith.constant dense<0.000000e+00> : vector<2x32xf32>
    %297 = tpu.matmul %295, %156, %cst_121 {dimension_numbers = #tpu.dot_dimension_numbers<[1], [0], [0], [1], [0, 0, 1, 1], [], []>} : vector<2x32xf32>, vector<32x32xf32>, vector<2x32xf32> -> vector<2x32xf32>
    %cst_122 = arith.constant dense<0.000000e+00> : vector<2x32xf32>
    %298 = tpu.matmul %295, %158, %cst_122 {dimension_numbers = #tpu.dot_dimension_numbers<[1], [0], [0], [1], [0, 0, 1, 1], [], []>} : vector<2x32xf32>, vector<32x32xf32>, vector<2x32xf32> -> vector<2x32xf32>
    %299 = vector.broadcast %170 : vector<1x32xf32> to vector<2x32xf32>
    %300 = arith.addf %298, %299 : vector<2x32xf32>
    %301 = vector.extract_strided_slice %175 {offsets = [0, 4, 0], sizes = [2, 1, 32], strides = [1, 1, 1]} : vector<2x8x32xf32> to vector<2x1x32xf32>
    %302 = vector.shape_cast %301 : vector<2x1x32xf32> to vector<2x32xf32>
    %303 = arith.addf %302, %296 : vector<2x32xf32>
    %304 = arith.negf %303 : vector<2x32xf32>
    %305 = math.exp %304 : vector<2x32xf32>
    %cst_123 = arith.constant 1.000000e+00 : f32
    %306 = vector.broadcast %cst_123 : f32 to vector<2x32xf32>
    %307 = arith.addf %306, %305 : vector<2x32xf32>
    %308 = arith.divf %306, %307 : vector<2x32xf32>
    %309 = vector.extract_strided_slice %180 {offsets = [0, 4, 0], sizes = [2, 1, 32], strides = [1, 1, 1]} : vector<2x8x32xf32> to vector<2x1x32xf32>
    %310 = vector.shape_cast %309 : vector<2x1x32xf32> to vector<2x32xf32>
    %311 = arith.addf %310, %297 : vector<2x32xf32>
    %312 = arith.negf %311 : vector<2x32xf32>
    %313 = math.exp %312 : vector<2x32xf32>
    %cst_124 = arith.constant 1.000000e+00 : f32
    %314 = vector.broadcast %cst_124 : f32 to vector<2x32xf32>
    %315 = arith.addf %314, %313 : vector<2x32xf32>
    %316 = arith.divf %314, %315 : vector<2x32xf32>
    %317 = vector.extract_strided_slice %184 {offsets = [0, 4, 0], sizes = [2, 1, 32], strides = [1, 1, 1]} : vector<2x8x32xf32> to vector<2x1x32xf32>
    %318 = vector.shape_cast %317 : vector<2x1x32xf32> to vector<2x32xf32>
    %319 = arith.mulf %308, %300 : vector<2x32xf32>
    %320 = arith.addf %318, %319 : vector<2x32xf32>
    %321 = math.tanh %320 : vector<2x32xf32>
    %322 = arith.subf %295, %321 : vector<2x32xf32>
    %323 = arith.mulf %316, %322 : vector<2x32xf32>
    %324 = arith.addf %321, %323 : vector<2x32xf32>
    %cst_125 = arith.constant dense<0.000000e+00> : vector<2x32xf32>
    %325 = tpu.matmul %324, %154, %cst_125 {dimension_numbers = #tpu.dot_dimension_numbers<[1], [0], [0], [1], [0, 0, 1, 1], [], []>} : vector<2x32xf32>, vector<32x32xf32>, vector<2x32xf32> -> vector<2x32xf32>
    %cst_126 = arith.constant dense<0.000000e+00> : vector<2x32xf32>
    %326 = tpu.matmul %324, %156, %cst_126 {dimension_numbers = #tpu.dot_dimension_numbers<[1], [0], [0], [1], [0, 0, 1, 1], [], []>} : vector<2x32xf32>, vector<32x32xf32>, vector<2x32xf32> -> vector<2x32xf32>
    %cst_127 = arith.constant dense<0.000000e+00> : vector<2x32xf32>
    %327 = tpu.matmul %324, %158, %cst_127 {dimension_numbers = #tpu.dot_dimension_numbers<[1], [0], [0], [1], [0, 0, 1, 1], [], []>} : vector<2x32xf32>, vector<32x32xf32>, vector<2x32xf32> -> vector<2x32xf32>
    %328 = vector.broadcast %170 : vector<1x32xf32> to vector<2x32xf32>
    %329 = arith.addf %327, %328 : vector<2x32xf32>
    %330 = vector.extract_strided_slice %175 {offsets = [0, 5, 0], sizes = [2, 1, 32], strides = [1, 1, 1]} : vector<2x8x32xf32> to vector<2x1x32xf32>
    %331 = vector.shape_cast %330 : vector<2x1x32xf32> to vector<2x32xf32>
    %332 = arith.addf %331, %325 : vector<2x32xf32>
    %333 = arith.negf %332 : vector<2x32xf32>
    %334 = math.exp %333 : vector<2x32xf32>
    %cst_128 = arith.constant 1.000000e+00 : f32
    %335 = vector.broadcast %cst_128 : f32 to vector<2x32xf32>
    %336 = arith.addf %335, %334 : vector<2x32xf32>
    %337 = arith.divf %335, %336 : vector<2x32xf32>
    %338 = vector.extract_strided_slice %180 {offsets = [0, 5, 0], sizes = [2, 1, 32], strides = [1, 1, 1]} : vector<2x8x32xf32> to vector<2x1x32xf32>
    %339 = vector.shape_cast %338 : vector<2x1x32xf32> to vector<2x32xf32>
    %340 = arith.addf %339, %326 : vector<2x32xf32>
    %341 = arith.negf %340 : vector<2x32xf32>
    %342 = math.exp %341 : vector<2x32xf32>
    %cst_129 = arith.constant 1.000000e+00 : f32
    %343 = vector.broadcast %cst_129 : f32 to vector<2x32xf32>
    %344 = arith.addf %343, %342 : vector<2x32xf32>
    %345 = arith.divf %343, %344 : vector<2x32xf32>
    %346 = vector.extract_strided_slice %184 {offsets = [0, 5, 0], sizes = [2, 1, 32], strides = [1, 1, 1]} : vector<2x8x32xf32> to vector<2x1x32xf32>
    %347 = vector.shape_cast %346 : vector<2x1x32xf32> to vector<2x32xf32>
    %348 = arith.mulf %337, %329 : vector<2x32xf32>
    %349 = arith.addf %347, %348 : vector<2x32xf32>
    %350 = math.tanh %349 : vector<2x32xf32>
    %351 = arith.subf %324, %350 : vector<2x32xf32>
    %352 = arith.mulf %345, %351 : vector<2x32xf32>
    %353 = arith.addf %350, %352 : vector<2x32xf32>
    %cst_130 = arith.constant dense<0.000000e+00> : vector<2x32xf32>
    %354 = tpu.matmul %353, %154, %cst_130 {dimension_numbers = #tpu.dot_dimension_numbers<[1], [0], [0], [1], [0, 0, 1, 1], [], []>} : vector<2x32xf32>, vector<32x32xf32>, vector<2x32xf32> -> vector<2x32xf32>
    %cst_131 = arith.constant dense<0.000000e+00> : vector<2x32xf32>
    %355 = tpu.matmul %353, %156, %cst_131 {dimension_numbers = #tpu.dot_dimension_numbers<[1], [0], [0], [1], [0, 0, 1, 1], [], []>} : vector<2x32xf32>, vector<32x32xf32>, vector<2x32xf32> -> vector<2x32xf32>
    %cst_132 = arith.constant dense<0.000000e+00> : vector<2x32xf32>
    %356 = tpu.matmul %353, %158, %cst_132 {dimension_numbers = #tpu.dot_dimension_numbers<[1], [0], [0], [1], [0, 0, 1, 1], [], []>} : vector<2x32xf32>, vector<32x32xf32>, vector<2x32xf32> -> vector<2x32xf32>
    %357 = vector.broadcast %170 : vector<1x32xf32> to vector<2x32xf32>
    %358 = arith.addf %356, %357 : vector<2x32xf32>
    %359 = vector.extract_strided_slice %175 {offsets = [0, 6, 0], sizes = [2, 1, 32], strides = [1, 1, 1]} : vector<2x8x32xf32> to vector<2x1x32xf32>
    %360 = vector.shape_cast %359 : vector<2x1x32xf32> to vector<2x32xf32>
    %361 = arith.addf %360, %354 : vector<2x32xf32>
    %362 = arith.negf %361 : vector<2x32xf32>
    %363 = math.exp %362 : vector<2x32xf32>
    %cst_133 = arith.constant 1.000000e+00 : f32
    %364 = vector.broadcast %cst_133 : f32 to vector<2x32xf32>
    %365 = arith.addf %364, %363 : vector<2x32xf32>
    %366 = arith.divf %364, %365 : vector<2x32xf32>
    %367 = vector.extract_strided_slice %180 {offsets = [0, 6, 0], sizes = [2, 1, 32], strides = [1, 1, 1]} : vector<2x8x32xf32> to vector<2x1x32xf32>
    %368 = vector.shape_cast %367 : vector<2x1x32xf32> to vector<2x32xf32>
    %369 = arith.addf %368, %355 : vector<2x32xf32>
    %370 = arith.negf %369 : vector<2x32xf32>
    %371 = math.exp %370 : vector<2x32xf32>
    %cst_134 = arith.constant 1.000000e+00 : f32
    %372 = vector.broadcast %cst_134 : f32 to vector<2x32xf32>
    %373 = arith.addf %372, %371 : vector<2x32xf32>
    %374 = arith.divf %372, %373 : vector<2x32xf32>
    %375 = vector.extract_strided_slice %184 {offsets = [0, 6, 0], sizes = [2, 1, 32], strides = [1, 1, 1]} : vector<2x8x32xf32> to vector<2x1x32xf32>
    %376 = vector.shape_cast %375 : vector<2x1x32xf32> to vector<2x32xf32>
    %377 = arith.mulf %366, %358 : vector<2x32xf32>
    %378 = arith.addf %376, %377 : vector<2x32xf32>
    %379 = math.tanh %378 : vector<2x32xf32>
    %380 = arith.subf %353, %379 : vector<2x32xf32>
    %381 = arith.mulf %374, %380 : vector<2x32xf32>
    %382 = arith.addf %379, %381 : vector<2x32xf32>
    %cst_135 = arith.constant dense<0.000000e+00> : vector<2x32xf32>
    %383 = tpu.matmul %382, %154, %cst_135 {dimension_numbers = #tpu.dot_dimension_numbers<[1], [0], [0], [1], [0, 0, 1, 1], [], []>} : vector<2x32xf32>, vector<32x32xf32>, vector<2x32xf32> -> vector<2x32xf32>
    %cst_136 = arith.constant dense<0.000000e+00> : vector<2x32xf32>
    %384 = tpu.matmul %382, %156, %cst_136 {dimension_numbers = #tpu.dot_dimension_numbers<[1], [0], [0], [1], [0, 0, 1, 1], [], []>} : vector<2x32xf32>, vector<32x32xf32>, vector<2x32xf32> -> vector<2x32xf32>
    %cst_137 = arith.constant dense<0.000000e+00> : vector<2x32xf32>
    %385 = tpu.matmul %382, %158, %cst_137 {dimension_numbers = #tpu.dot_dimension_numbers<[1], [0], [0], [1], [0, 0, 1, 1], [], []>} : vector<2x32xf32>, vector<32x32xf32>, vector<2x32xf32> -> vector<2x32xf32>
    %386 = vector.broadcast %170 : vector<1x32xf32> to vector<2x32xf32>
    %387 = arith.addf %385, %386 : vector<2x32xf32>
    %388 = vector.extract_strided_slice %175 {offsets = [0, 7, 0], sizes = [2, 1, 32], strides = [1, 1, 1]} : vector<2x8x32xf32> to vector<2x1x32xf32>
    %389 = vector.shape_cast %388 : vector<2x1x32xf32> to vector<2x32xf32>
    %390 = arith.addf %389, %383 : vector<2x32xf32>
    %391 = arith.negf %390 : vector<2x32xf32>
    %392 = math.exp %391 : vector<2x32xf32>
    %cst_138 = arith.constant 1.000000e+00 : f32
    %393 = vector.broadcast %cst_138 : f32 to vector<2x32xf32>
    %394 = arith.addf %393, %392 : vector<2x32xf32>
    %395 = arith.divf %393, %394 : vector<2x32xf32>
    %396 = vector.extract_strided_slice %180 {offsets = [0, 7, 0], sizes = [2, 1, 32], strides = [1, 1, 1]} : vector<2x8x32xf32> to vector<2x1x32xf32>
    %397 = vector.shape_cast %396 : vector<2x1x32xf32> to vector<2x32xf32>
    %398 = arith.addf %397, %384 : vector<2x32xf32>
    %399 = arith.negf %398 : vector<2x32xf32>
    %400 = math.exp %399 : vector<2x32xf32>
    %cst_139 = arith.constant 1.000000e+00 : f32
    %401 = vector.broadcast %cst_139 : f32 to vector<2x32xf32>
    %402 = arith.addf %401, %400 : vector<2x32xf32>
    %403 = arith.divf %401, %402 : vector<2x32xf32>
    %404 = vector.extract_strided_slice %184 {offsets = [0, 7, 0], sizes = [2, 1, 32], strides = [1, 1, 1]} : vector<2x8x32xf32> to vector<2x1x32xf32>
    %405 = vector.shape_cast %404 : vector<2x1x32xf32> to vector<2x32xf32>
    %406 = arith.mulf %395, %387 : vector<2x32xf32>
    %407 = arith.addf %405, %406 : vector<2x32xf32>
    %408 = math.tanh %407 : vector<2x32xf32>
    %409 = arith.subf %382, %408 : vector<2x32xf32>
    %410 = arith.mulf %403, %409 : vector<2x32xf32>
    %411 = arith.addf %408, %410 : vector<2x32xf32>
    %412 = tpu.concatenate %208, %237, %266, %295, %324, %353, %382, %411 in 1 : vector<2x32xf32>, vector<2x32xf32>, vector<2x32xf32>, vector<2x32xf32>, vector<2x32xf32>, vector<2x32xf32>, vector<2x32xf32>, vector<2x32xf32> -> vector<2x256xf32>
    %c0_140 = arith.constant 0 : index
    %c0_141 = arith.constant 0 : index
    %413 = vector.load %arg22[%c0_140, %c0_141] : memref<2x256xf32, #tpu.memory_space<vmem>>, vector<2x256xf32>
    tpu.vector_store %arg22[%c0_140, %c0_141], %412 {strides = array<i32>} : memref<2x256xf32, #tpu.memory_space<vmem>>, vector<2x256xf32>,
    return
  }
}

</mosaic_0001>

<bundles_post_ra>
// kernel: bert_rnn_question_embedding.1
= control target key start
LH: loop header
LB: loop body
LE: loop exit
PB: predicated region body
PF: predicated region fallthrough
CT: control target
= control target key end

     0   :  { %s3550_s0 = inlined_call_operand.vmem [shape: f32[2,8,32], index: 0, kind: input, shape index: {}]   ;;  %s3551_s1 = inlined_call_operand.vmem [shape: f32[8,32], index: 1, kind: input, shape index: {}]   ;;  %s3552_s2 = inlined_call_operand.vmem [shape: f32[1,32], index: 2, kind: input, shape index: {}, may-alias: {2,8,14}]   ;;  %s3553_s3 = inlined_call_operand.vmem [shape: f32[1,32], index: 3, kind: input, shape index: {}, may-alias: {3,7,9,13,15,17}]   ;;  %s3554_s4 = inlined_call_operand.hbm [shape: f32[32,96], index: 4, kind: input, shape index: {}]   ;;  %s3555_s5 = inlined_call_operand.vmem [shape: f32[1,96], index: 5, kind: input, shape index: {}]   ;;  %s3556_s6 = inlined_call_operand.hbm [shape: f32[32,32], index: 6, kind: input, shape index: {}]   ;;  %s3557_s7 = inlined_call_operand.vmem [shape: f32[1,32], index: 7, kind: input, shape index: {}, may-alias: {3,7,9,13,15,17}]   ;;  %s3558_s8 = inlined_call_operand.vmem [shape: f32[1,32], index: 8, kind: input, shape index: {}, may-alias: {2,8,14}]   ;;  %s3559_s9 = inlined_call_operand.vmem [shape: f32[1,32], index: 9, kind: input, shape index: {}, may-alias: {3,7,9,13,15,17}]   ;;  %s3560_s10 = inlined_call_operand.hbm [shape: f32[32,64], index: 10, kind: input, shape index: {}]   ;;  %s3561_s11 = inlined_call_operand.vmem [shape: f32[1,64], index: 11, kind: input, shape index: {}]   ;;  %s3562_s12 = inlined_call_operand.hbm [shape: f32[64,32], index: 12, kind: input, shape index: {}]   ;;  %s3563_s13 = inlined_call_operand.vmem [shape: f32[1,32], index: 13, kind: input, shape index: {}, may-alias: {3,7,9,13,15,17}]   ;;  %s3564_s14 = inlined_call_operand.vmem [shape: f32[1,32], index: 14, kind: input, shape index: {}, may-alias: {2,8,14}]   ;;  %s3565_s15 = inlined_call_operand.vmem [shape: f32[1,32], index: 15, kind: input, shape index: {}, may-alias: {3,7,9,13,15,17}]   ;;  %s3566_s16 = inlined_call_operand.hbm [shape: f32[32,32], index: 16, kind: input, shape index: {}]   ;;  %s3567_s17 = inlined_call_operand.vmem [shape: f32[1,32], index: 17, kind: input, shape index: {}, may-alias: {3,7,9,13,15,17}]   ;;  %s3568_s18 = inlined_call_operand.vmem [shape: f32[3,32,32], index: 18, kind: input, shape index: {}]   ;;  %s3569_s19 = inlined_call_operand.vmem [shape: f32[3,32,32], index: 19, kind: input, shape index: {}]   ;;  %s3570_s20 = inlined_call_operand.vmem [shape: f32[3,1,32], index: 20, kind: input, shape index: {}]   ;;  %s3571_s21 = inlined_call_operand.hbm [shape: f32[3,1,32], index: 21, kind: input, shape index: {}]   ;;  %s3572_s22 = inlined_call_operand.vmem [shape: f32[2,256], index: 22, kind: output, shape index: {}]  }
   0x1   :  { %3574 = sst [smem:[#allocation16_spill]] %s3550_s0 }
   0x2   :  { %3575 = sst [smem:[#allocation17_spill]] %s3551_s1 }
   0x3   :  { %3576 = sst [smem:[#allocation18_spill]] %s3552_s2 }
   0x4   :  { %3577 = sst [smem:[#allocation19_spill]] %s3553_s3 }
   0x5   :  { %3578 = sst [smem:[#allocation20_spill]] %s3554_s4 }
   0x6   :  { %3579 = sst [smem:[#allocation21_spill]] %s3555_s5 }
   0x7   :  { %3580 = sst [smem:[#allocation22_spill]] %s3556_s6 }
   0x8   :  { %27 = vsyncpa [#allocation3], 0 }
   0x9   :  { %28 = vsyncpa [#allocation5], 0 }
   0xa   :  { %29 = vsyncpa [#allocation8], 0 }
   0xb   :  { %30 = vsyncpa [#allocation11], 0  ;;  %s3581_s29 = sld [smem:[#allocation22_spill]]  ;;  %s2722_s4 = smov [#allocation4]  }
   0xc   :  { %s60_s0 = sshll.u32 %s2722_s4, 4  ;;  %s92_s5 = sshll.u32 %s3562_s12, 4  ;;  %s61_s0 = int_to_ptr.vmem [resolvable:$true] %s60_s0  ;;  %s93_s5 = int_to_ptr.hbm [resolvable:$true] %s92_s5 }
   0xd   :  { %s2723_s24 = smov 128   ;;  %s2724_s6 = smov 8  }
   0xe   :  { %s2725_s25 = smov [#allocation7]   ;;  %s3582_s3 = sld [smem:[#allocation20_spill]] }
   0xf   :  { %s94_s26 = sshll.u32 %s2725_s25, 4  ;;  %s77_s4 = sshll.u32 %s3560_s10, 4  ;;  %s95_s26 = int_to_ptr.vmem [resolvable:$true] %s94_s26  ;;  %s78_s4 = int_to_ptr.hbm [resolvable:$true] %s77_s4 }
  0x10   :  { %100 = dma.hbm_to_vmem [thread:$0]  %s93_s5, 1024, %s95_s26, [#allocation8], %s2723_s24, %s2723_s24, %s2724_s6  }
  0x11   :  { %s58_s30 = sshll.u32 %s3581_s29, 4  ;;  %s2726_s23 = smov [#allocation2]   ;;  %s59_s30 = int_to_ptr.hbm [resolvable:$true] %s58_s30 }
  0x12   :  { %66 = dma.hbm_to_vmem [thread:$0]  %s59_s30, 512, %s61_s0, [#allocation5], %s2723_s24, %s2723_s24, %s2724_s6  }
  0x13   :  { %s45_s1 = sshll.u32 %s2726_s23, 4  ;;  %s2727_s30 = smov [#allocation6]   ;;  %s46_s1 = int_to_ptr.vmem [resolvable:$true] %s45_s1 }
  0x14   :  { %s43_s28 = sshll.u32 %s3582_s3, 4  ;;  %s79_s0 = sshll.u32 %s2727_s30, 4  ;;  %s44_s28 = int_to_ptr.hbm [resolvable:$true] %s43_s28  ;;  %s80_s0 = int_to_ptr.vmem [resolvable:$true] %s79_s0 }
  0x15   :  { %51 = dma.hbm_to_vmem [thread:$0]  %s44_s28, 512, %s46_s1, [#allocation3], %s2723_s24, %s2723_s24, %s2724_s6  }
  0x16   :  { %s111_s27 = sshll.u32 %s3566_s16, 4  ;;  %s132_s26 = sshll.u32 %s3571_s21, 4  ;;  %s112_s27 = int_to_ptr.hbm [resolvable:$true] %s111_s27  ;;  %s133_s26 = int_to_ptr.hbm [resolvable:$true] %s132_s26 }
  0x17   :  { %85 = dma.hbm_to_vmem [thread:$0]  %s78_s4, 512, %s80_s0, [#allocation5], %s2723_s24, %s2723_s24, %s2724_s6  }
  0x18   :  { %s2728_s3 = smov [#allocation9]   ;;  %s2729_s28 = smov [#allocation10]  }
  0x19   :  { %s113_s12 = sshll.u32 %s2728_s3, 4  ;;  %s134_s16 = sshll.u32 %s2729_s28, 4  ;;  %s114_s12 = int_to_ptr.vmem [resolvable:$true] %s113_s12  ;;  %s135_s16 = int_to_ptr.vmem [resolvable:$true] %s134_s16 }
  0x1a   :  { %119 = dma.hbm_to_vmem [thread:$0]  %s112_s27, 512, %s114_s12, [#allocation8], %s2723_s24, %s2723_s24, %s2724_s6  }
  0x1b   :  { %s2730_s29 = smov 16   ;;  %s2731_s23 = smov 1  }
  0x1c   :  { %140 = dma.hbm_to_vmem [thread:$0]  %s133_s26, 48, %s135_s16, [#allocation11], %s2730_s29, %s2730_s29, %s2731_s23  }
  0x1d   :  { %2714 = dma.done.wait [#allocation3], 512  }
  0x1e   :  { %2715 = vsyncadd [#allocation3], 4294966784 }
  0x1f   :  { %2716 = dma.done.wait [#allocation5], 1024  }
  0x20   :  { %2717 = vsyncadd [#allocation5], 4294966272 }
  0x21   :  { %2718 = dma.done.wait [#allocation8], 1536  }
  0x22   :  { %2719 = vsyncadd [#allocation8], 4294965760 }
  0x23   :  { %2720 = dma.done.wait [#allocation11], 48  }
  0x24   :  { %2721 = vsyncadd [#allocation11], 4294967248  ;;  %s3583_s1 = sld [smem:[#allocation16_spill]]  ;;  %vm172_vm0 = vcmask 261120   ;;  %v2732_v7 = vmov 32.0   ;;  %v237_v24 = vld [vmem:[#allocation2 + $0x18] sm:$0xff] }
  0x25   :  { %s3584_s6 = sld [smem:[#allocation17_spill]]  ;;  %2371 = vrcp.f32 %v2732_v7  ;;  %260 = vmatpush.msra.mxu0 %v237_v24  ;;  %v236_v25 = vld [vmem:[#allocation2 + $0x10] sm:$0xff]  ;;  %v235_v26 = vld [vmem:[#allocation2 + $0x8] sm:$0xff]  ;;  %v234_v27 = vld [vmem:[#allocation2] sm:$0xff]  ;;  %s2733_s29 = smov 96   ;;  %vm327_vm8 = vcmask 64512  }
  0x26   :  { %s3585_s10 = sld [smem:[#allocation18_spill]]  ;;  %s2734_s23 = smov 64   ;;  %vm564_vm15 = vcmask 523264  }
  0x27   :  { %261 = vmatpush.msra.mxu0 %v236_v25  ;;  %s3586_s3 = sld [smem:[#allocation19_spill]] }
  0x28   :  { %s3587_s16 = sld [smem:[#allocation21_spill]] }
  0x29   :  { %262 = vmatpush.msra.mxu0 %v235_v26 }
  0x2a   :  { %v165_v0 = vld [vmem:[%s3583_s1] sm:$0xff]  ;;  %v166_v3 = vld [vmem:[%s3583_s1 + $0x8] sm:$0xff] }
  0x2b   :  { %v167_v1 = vld [vmem:[%s3584_s6] sm:$0xff]  ;;  %v2372_v8 = vpop.eup %2371  ;;  %263 = vmatpush.msra.mxu0 %v234_v27 }
  0x2c   :  { %v168_v2 = vadd.f32 %v167_v1, %v165_v0  ;;  %v169_v5 = vadd.f32 %v167_v1, %v166_v3  ;;  %v180_v9 = vmul.f32 32.0, %v2372_v8  ;;  %vm184_vm1 = vweird.f32 %v2372_v8  ;;  %v2358_v42 = vld [vmem:[%s3585_s10] ss:$0 sm:$0xff] }
  0x2d   :  { %v2359_v46 = vld [vmem:[%s3586_s3] ss:$0 sm:$0xff] }
  0x2e   :  { %v173_v4 = vsel %vm172_vm0, %v168_v2, 0.0  ;;  %v176_v6 = vsel %vm172_vm0, %v169_v5, 0.0  ;;  %v181_v10 = vsub.f32 1.0, %v180_v9  ;;  %v2360_v56 = vld [vmem:[%s3587_s16] ss:$0 sm:$0xff] }
  0x2f   :  { %174 = vadd.xlane.f32.xlu0 %v173_v4  ;;  %v402_v27 = vld [vmem:[#allocation4] sm:$0xff] }
  0x30   :  { %v182_v11 = vmul.f32 %v2372_v8, %v181_v10 }
  0x32   :  { %v183_v12 = vadd.f32 %v2372_v8, %v182_v11 }
  0x34   :  { %v2895_v13 = vsel %vm184_vm1, %v2372_v8, %v183_v12 }
  0x37   :  { %177 = vadd.xlane.f32.xlu0 %v176_v6 }
  0xa2   :  { %v175_v14 = vpop.xlane.xlu0 %174 }
  0xa3   :  { %v186_v15 = vmul.f32 %v2895_v13, %v175_v14 }
  0xa5   :  { %v188_v16 = vsub.f32 %v168_v2, %v186_v15 }
  0xa7   :  { %v190_v17 = vmul.f32 %v188_v16, %v188_v16 }
  0xa9   :  { %v192_v18 = vsel %vm172_vm0, %v190_v17, 0.0 }
  0xaa   :  { %193 = vadd.xlane.f32.xlu1 %v192_v18  ;;  %v178_v19 = vpop.xlane.xlu0 %177  ;;  %v405_v18 = vld [vmem:[#allocation4 + $0x18] sm:$0xff] }
  0xab   :  { %v187_v20 = vmul.f32 %v2895_v13, %v178_v19  ;;  %v404_v19 = vld [vmem:[#allocation4 + $0x10] sm:$0xff] }
  0xad   :  { %v189_v21 = vsub.f32 %v169_v5, %v187_v20  ;;  %v403_v20 = vld [vmem:[#allocation4 + $0x8] sm:$0xff] }
  0xaf   :  { %v191_v22 = vmul.f32 %v189_v21, %v189_v21 }
  0xb1   :  { %v195_v23 = vsel %vm172_vm0, %v191_v22, 0.0 }
  0xb2   :  { %196 = vadd.xlane.f32.xlu1 %v195_v23 }
 0x11d   :  { %v194_v28 = vpop.xlane.xlu1 %193 }
 0x11e   :  { %v198_v29 = vmul.f32 %v194_v28, %v2895_v13 }
 0x120   :  { %v200_v30 = vadd.f32 1e-12, %v198_v29 }
 0x122   :  { %2373 = vrsqrt.f32 %v200_v30  ;;  %vm208_vm3 = vweird.f32 %v200_v30 }
 0x125   :  { %v197_v31 = vpop.xlane.xlu1 %196 }
 0x126   :  { %v199_v32 = vmul.f32 %v197_v31, %v2895_v13 }
 0x128   :  { %v2374_v33 = vpop.eup %2373  ;;  %v201_v34 = vadd.f32 1e-12, %v199_v32 }
 0x129   :  { %v203_v35 = vmul.f32 %v2374_v33, %v200_v30  ;;  %vm209_vm2 = vweird.f32 %v2374_v33  ;;  %v2361_v30 = vld [vmem:[%s3557_s7] ss:$0 sm:$0xff] }
 0x12a   :  { %2375 = vrsqrt.f32 %v201_v34  ;;  %vm210_vm4 = vmor %vm208_vm3, %vm209_vm2  ;;  %vm218_vm6 = vweird.f32 %v201_v34 }
 0x12b   :  { %v204_v36 = vmul.f32 %v2374_v33, %v203_v35 }
 0x12d   :  { %v205_v37 = vmul.f32 0.5, %v204_v36 }
 0x12f   :  { %v206_v38 = vsub.f32 1.5, %v205_v37 }
 0x130   :  { %v2376_v39 = vpop.eup %2375 }
 0x131   :  { %v207_v40 = vmul.f32 %v2374_v33, %v206_v38  ;;  %v213_v41 = vmul.f32 %v2376_v39, %v201_v34  ;;  %vm219_vm5 = vweird.f32 %v2376_v39 }
 0x132   :  { %vm220_vm7 = vmor %vm218_vm6, %vm219_vm5 }
 0x133   :  { %v211_v43 = vsel %vm210_vm4, %v2374_v33, %v207_v40  ;;  %v214_v44 = vmul.f32 %v2376_v39, %v213_v41 }
 0x134   :  { %v222_v45 = vmul.f32 %v211_v43, %v188_v16 }
 0x135   :  { %v215_v47 = vmul.f32 0.5, %v214_v44 }
 0x136   :  { %v227_v48 = vmul.f32 %v2358_v42, %v222_v45 }
 0x137   :  { %v216_v49 = vsub.f32 1.5, %v215_v47 }
 0x138   :  { %v2909_v50 = vadd.f32 %v2359_v46, %v227_v48 }
 0x139   :  { %v217_v51 = vmul.f32 %v2376_v39, %v216_v49  ;;  %v500_v49 = vld [vmem:[#allocation6 + $0x18] sm:$0xff] }
 0x13a   :  { %2251 = vmatmul.msk.f32.vlgmr.msra.gmra.mxu0 %vm172_vm0, %v2909_v50 }
 0x13b   :  { %v221_v52 = vsel %vm220_vm7, %v2376_v39, %v217_v51  ;;  %v498_v51 = vld [vmem:[#allocation6 + $0x8] sm:$0xff] }
 0x13c   :  { %v223_v53 = vmul.f32 %v221_v52, %v189_v21  ;;  %v497_v52 = vld [vmem:[#allocation6] sm:$0xff] }
 0x13e   :  { %v228_v54 = vmul.f32 %v2358_v42, %v223_v53 }
 0x140   :  { %v2913_v55 = vadd.f32 %v2359_v46, %v228_v54 }
 0x142   :  { %2252 = vmatmul.msk.f32.gmra.mxu0 %vm172_vm0, %v2913_v55 }
 0x1b7   :  { %v265_v57 = vpop.f32.mrf.mxu0 }
 0x1b8   :  { %v266_v58 = vadd.f32 %v2360_v56, %v265_v57 }
 0x1ba   :  { %272 = vrot.lane.b32.xlu2 %v266_v58, %s2733_s29 }
 0x1bf   :  { %v268_v59 = vpop.f32.mrf.mxu0 }
 0x1c0   :  { %v269_v60 = vadd.f32 %v2360_v56, %v268_v59 }
 0x1c2   :  { %299 = vrot.lane.b32.xlu2 %v269_v60, %s2733_s29 }
 0x214   :  { %v273_v61 = vpop.permute.xlu2 %272 }
 0x215   :  { %2253 = vmatpush.xpose.msk.msra.mxu1 %vm172_vm0, %v273_v61 }
 0x218   :  { %2254 = vmatmul.msk.f32.vlgmr.msra.gmra.mxu1 %vm172_vm0, %v266_v58 }
 0x219   :  { %428 = vmatpush.msrb.mxu1 %v405_v18  ;;  %v559_v18 = vld [vmem:[#allocation7 + $0x38] sm:$0xff] }
 0x21a   :  { %579 = vmatpush.msrb.mxu0 %v559_v18  ;;  %v2366_v18 = vld [vmem:[%s3564_s14] ss:$0 sm:$0xff] }
 0x21b   :  { %429 = vmatpush.msrb.mxu1 %v404_v19  ;;  %v558_v19 = vld [vmem:[#allocation7 + $0x30] sm:$0xff] }
 0x21c   :  { %v300_v62 = vpop.permute.xlu2 %299  ;;  %580 = vmatpush.msrb.mxu0 %v558_v19 }
 0x21d   :  { %2255 = vmatpush.xpose.msk.msra.mxu2 %vm172_vm0, %v300_v62  ;;  %430 = vmatpush.msrb.mxu1 %v403_v20  ;;  %v2362_v62 = vld [vmem:[%s3558_s8] ss:$0 sm:$0xff]  ;;  %v557_v20 = vld [vmem:[#allocation7 + $0x28] sm:$0xff] }
 0x21e   :  { %581 = vmatpush.msrb.mxu0 %v557_v20  ;;  %v694_v20 = vld [vmem:[%s3568_s18 + $0x18] sm:$0xff] }
 0x21f   :  { %431 = vmatpush.msrb.mxu1 %v402_v27 }
 0x220   :  { %2256 = vmatmul.msk.f32.vlgmr.msra.gmra.mxu2 %vm172_vm0, %v269_v60 }
 0x221   :  { %523 = vmatpush.msrb.mxu2 %v500_v49  ;;  %v2365_v49 = vld [vmem:[%s3563_s13] ss:$0 sm:$0xff]  ;;  %751 = vmatpush.msra.mxu1 %v694_v20 }
 0x295   :  { %v295_v63 = vpop.f32.mrf.mxu1 }
 0x296   :  { %v325_v0 = vmul.f32 0.17677669, %v295_v63 }
 0x298   :  { %v328_v1 = vsel %vm327_vm8, %v325_v0, -inf }
 0x299   :  { %329 = vmax.xlane.f32.xlu0 %v328_v1  ;;  %v2363_v1 = vld [vmem:[%s3559_s9] ss:$0 sm:$0xff] }
 0x2a3   :  { %v322_v2 = vpop.f32.mrf.mxu2 }
 0x2a4   :  { %v326_v3 = vmul.f32 0.17677669, %v322_v2 }
 0x2a6   :  { %v331_v4 = vsel %vm327_vm8, %v326_v3, -inf }
 0x2a7   :  { %332 = vmax.xlane.f32.xlu1 %v331_v4 }
 0x2c0   :  { %350 = vrot.lane.b32.xlu1 %v266_v58, %s2734_s23 }
 0x30c   :  { %v330_v5 = vpop.xlane.xlu0 %329 }
 0x30d   :  { %v334_v6 = vsub.f32 %v325_v0, %v330_v5 }
 0x30f   :  { %v336_v7 = vmul.f32 1.442695, %v334_v6 }
 0x311   :  { %2377 = vpow2.f32 %v336_v7 }
 0x317   :  { %v2378_v8 = vpop.eup %2377 }
 0x318   :  { %v340_v9 = vsel %vm327_vm8, %v2378_v8, 0.0 }
 0x319   :  { %341 = vadd.xlane.f32.xlu2 %v340_v9 }
 0x31a   :  { %v333_v10 = vpop.xlane.xlu1 %332 }
 0x31b   :  { %v335_v11 = vsub.f32 %v326_v3, %v333_v10 }
 0x31d   :  { %v338_v12 = vmul.f32 1.442695, %v335_v11 }
 0x31f   :  { %2379 = vpow2.f32 %v338_v12 }
 0x325   :  { %v2380_v14 = vpop.eup %2379 }
 0x326   :  { %v343_v15 = vsel %vm327_vm8, %v2380_v14, 0.0 }
 0x327   :  { %344 = vadd.xlane.f32.xlu0 %v343_v15 }
 0x332   :  { %v351_v16 = vpop.permute.xlu1 %350 }
 0x333   :  { %371 = vmatpush.msra.mxu3 %v351_v16 }
 0x33b   :  { %376 = vrot.lane.b32.xlu0 %v269_v60, %s2734_s23 }
 0x38c   :  { %v342_v17 = vpop.xlane.xlu2 %341 }
 0x38d   :  { %2381 = vrcp.f32 %v342_v17 }
 0x393   :  { %v2382_v21 = vpop.eup %2381 }
 0x394   :  { %v348_v22 = vmul.f32 %v2382_v21, %v2378_v8  ;;  %v556_v21 = vld [vmem:[#allocation7 + $0x20] sm:$0xff] }
 0x395   :  { %582 = vmatpush.msrb.mxu0 %v556_v21  ;;  %v2270_v21 = vld [vmem:[%s3568_s18 + $0x38] sm:$0xff] }
 0x396   :  { %2257 = vmatmul.msk.f32.vlgmr.msra.gmra.mxu3 %vm327_vm8, %v348_v22  ;;  %v555_v22 = vld [vmem:[#allocation7 + $0x18] sm:$0xff] }
 0x397   :  { %583 = vmatpush.msrb.mxu0 %v555_v22  ;;  %v2274_v22 = vld [vmem:[%s3568_s18 + $0x58] sm:$0xff] }
 0x39a   :  { %v345_v23 = vpop.xlane.xlu0 %344 }
 0x39b   :  { %2383 = vrcp.f32 %v345_v23  ;;  %v554_v23 = vld [vmem:[#allocation7 + $0x10] sm:$0xff] }
 0x39c   :  { %584 = vmatpush.msrb.mxu0 %v554_v23 }
 0x3a1   :  { %v2384_v24 = vpop.eup %2383 }
 0x3a2   :  { %v349_v26 = vmul.f32 %v2384_v24, %v2380_v14  ;;  %v553_v24 = vld [vmem:[#allocation7 + $0x8] sm:$0xff] }
 0x3a3   :  { %585 = vmatpush.msrb.mxu0 %v553_v24  ;;  %v2367_v24 = vld [vmem:[%s3565_s15] ss:$0 sm:$0xff] }
 0x3ad   :  { %v377_v25 = vpop.permute.xlu0 %376 }
 0x3ae   :  { %397 = vmatpush.msrb.mxu3 %v377_v25  ;;  %v552_v25 = vld [vmem:[#allocation7] sm:$0xff] }
 0x3af   :  { %2258 = vmatmul.msk.f32.vlgmr.msrb.gmra.mxu3 %vm327_vm8, %v349_v26  ;;  %586 = vmatpush.msrb.mxu0 %v552_v25  ;;  %v2364_v26 = vld [vmem:[%s3561_s11] ss:$0 sm:$0xff] }
 0x419   :  { %v373_v28 = vpop.f32.mrf.mxu3 }
 0x41a   :  { %2259 = vmatmul.msk.f32.vlgmr.msrb.gmra.mxu1 %vm172_vm0, %v373_v28 }
 0x432   :  { %v399_v29 = vpop.f32.mrf.mxu3 }
 0x433   :  { %2260 = vmatmul.msk.f32.gmra.mxu1 %vm172_vm0, %v399_v29 }
 0x497   :  { %v433_v31 = vpop.f32.mrf.mxu1 }
 0x498   :  { %v434_v32 = vadd.f32 %v2361_v30, %v433_v31 }
 0x49a   :  { %v439_v33 = vadd.f32 %v434_v32, %v2909_v50  ;;  %v499_v50 = vld [vmem:[#allocation6 + $0x10] sm:$0xff] }
 0x49b   :  { %524 = vmatpush.msrb.mxu2 %v499_v50 }
 0x49c   :  { %v443_v34 = vsel %vm172_vm0, %v439_v33, 0.0 }
 0x49d   :  { %444 = vadd.xlane.f32.xlu1 %v443_v34  ;;  %525 = vmatpush.msrb.mxu2 %v498_v51 }
 0x49f   :  { %526 = vmatpush.msrb.mxu2 %v497_v52 }
 0x4a1   :  { %778 = vmatpush.msra.mxu2 %v2270_v21 }
 0x4b0   :  { %v436_v35 = vpop.f32.mrf.mxu1 }
 0x4b1   :  { %v437_v36 = vadd.f32 %v2361_v30, %v436_v35 }
 0x4b3   :  { %v440_v37 = vadd.f32 %v437_v36, %v2913_v55 }
 0x4b5   :  { %v446_v38 = vsel %vm172_vm0, %v440_v37, 0.0 }
 0x4b6   :  { %447 = vadd.xlane.f32.xlu0 %v446_v38 }
 0x510   :  { %v445_v39 = vpop.xlane.xlu1 %444 }
 0x511   :  { %v449_v40 = vmul.f32 %v445_v39, %v2895_v13 }
 0x513   :  { %v451_v41 = vsub.f32 %v439_v33, %v449_v40 }
 0x515   :  { %v453_v42 = vmul.f32 %v451_v41, %v451_v41 }
 0x517   :  { %v455_v43 = vsel %vm172_vm0, %v453_v42, 0.0 }
 0x518   :  { %456 = vadd.xlane.f32.xlu2 %v455_v43 }
 0x529   :  { %v448_v44 = vpop.xlane.xlu0 %447 }
 0x52a   :  { %v450_v45 = vmul.f32 %v448_v44, %v2895_v13 }
 0x52c   :  { %v452_v46 = vsub.f32 %v440_v37, %v450_v45 }
 0x52e   :  { %v454_v47 = vmul.f32 %v452_v46, %v452_v46 }
 0x530   :  { %v458_v48 = vsel %vm172_vm0, %v454_v47, 0.0 }
 0x531   :  { %459 = vadd.xlane.f32.xlu2 %v458_v48 }
 0x58b   :  { %v457_v53 = vpop.xlane.xlu2 %456 }
 0x58c   :  { %v461_v54 = vmul.f32 %v457_v53, %v2895_v13 }
 0x58e   :  { %v463_v55 = vadd.f32 1e-12, %v461_v54 }
 0x590   :  { %2385 = vrsqrt.f32 %v463_v55  ;;  %vm471_vm10 = vweird.f32 %v463_v55 }
 0x596   :  { %v2386_v56 = vpop.eup %2385 }
 0x597   :  { %v466_v57 = vmul.f32 %v2386_v56, %v463_v55  ;;  %vm472_vm9 = vweird.f32 %v2386_v56 }
 0x598   :  { %vm473_vm11 = vmor %vm471_vm10, %vm472_vm9 }
 0x599   :  { %v467_v58 = vmul.f32 %v2386_v56, %v466_v57 }
 0x59b   :  { %v468_v59 = vmul.f32 0.5, %v467_v58 }
 0x59d   :  { %v469_v60 = vsub.f32 1.5, %v468_v59 }
 0x59f   :  { %v470_v61 = vmul.f32 %v2386_v56, %v469_v60 }
 0x5a1   :  { %v474_v63 = vsel %vm473_vm11, %v2386_v56, %v470_v61 }
 0x5a2   :  { %v485_v0 = vmul.f32 %v474_v63, %v451_v41 }
 0x5a4   :  { %v460_v2 = vpop.xlane.xlu2 %459  ;;  %v490_v3 = vmul.f32 %v2362_v62, %v485_v0 }
 0x5a5   :  { %v462_v4 = vmul.f32 %v460_v2, %v2895_v13 }
 0x5a6   :  { %v2955_v5 = vadd.f32 %v2363_v1, %v490_v3 }
 0x5a7   :  { %v464_v6 = vadd.f32 1e-12, %v462_v4  ;;  %v655_v4 = vld [vmem:[#allocation9 + $0x18] sm:$0xff] }
 0x5a8   :  { %2261 = vmatmul.msk.f32.vlgmr.msrb.gmra.mxu2 %vm172_vm0, %v2955_v5  ;;  %678 = vmatpush.msra.mxu3 %v655_v4  ;;  %v3067_v4 = vld [vmem:[%s3569_s19 + $0x30] sm:$0xff] }
 0x5a9   :  { %2387 = vrsqrt.f32 %v464_v6  ;;  %vm481_vm13 = vweird.f32 %v464_v6 }
 0x5af   :  { %v2388_v7 = vpop.eup %2387 }
 0x5b0   :  { %v476_v8 = vmul.f32 %v2388_v7, %v464_v6  ;;  %vm482_vm12 = vweird.f32 %v2388_v7  ;;  %v653_v6 = vld [vmem:[#allocation9 + $0x8] sm:$0xff] }
 0x5b1   :  { %vm483_vm14 = vmor %vm481_vm13, %vm482_vm12 }
 0x5b2   :  { %v477_v9 = vmul.f32 %v2388_v7, %v476_v8 }
 0x5b4   :  { %v478_v10 = vmul.f32 0.5, %v477_v9 }
 0x5b6   :  { %v479_v11 = vsub.f32 1.5, %v478_v10 }
 0x5b8   :  { %v480_v12 = vmul.f32 %v2388_v7, %v479_v11 }
 0x5ba   :  { %v484_v14 = vsel %vm483_vm14, %v2388_v7, %v480_v12  ;;  %v652_v7 = vld [vmem:[#allocation9] sm:$0xff] }
 0x5bb   :  { %v486_v15 = vmul.f32 %v484_v14, %v452_v46 }
 0x5bd   :  { %v491_v16 = vmul.f32 %v2362_v62, %v486_v15 }
 0x5bf   :  { %v496_v17 = vadd.f32 %v2363_v1, %v491_v16 }
 0x5c1   :  { %2262 = vmatmul.msk.f32.gmra.mxu2 %vm172_vm0, %v496_v17 }
 0x62b   :  { %v528_v27 = vpop.f32.mrf.mxu2 }
 0x62c   :  { %v529_v28 = vadd.f32 %v2364_v26, %v528_v27 }
 0x62e   :  { %v534_v29 = vmul.f32 %v529_v28, %v529_v28 }
 0x630   :  { %v536_v30 = vmul.f32 %v534_v29, %v529_v28 }
 0x632   :  { %v538_v31 = vmul.f32 0.044715, %v536_v30 }
 0x634   :  { %v540_v32 = vadd.f32 %v538_v31, %v529_v28 }
 0x636   :  { %v542_v33 = vmul.f32 0.7978846, %v540_v32 }
 0x638   :  { %2389 = vtanh.f32 %v542_v33 }
 0x63e   :  { %v2390_v34 = vpop.eup %2389 }
 0x63f   :  { %v546_v35 = vadd.f32 1.0, %v2390_v34 }
 0x641   :  { %v548_v36 = vmul.f32 0.5, %v546_v35 }
 0x643   :  { %v550_v37 = vmul.f32 %v548_v36, %v529_v28 }
 0x644   :  { %v531_v38 = vpop.f32.mrf.mxu2 }
 0x645   :  { %v532_v39 = vadd.f32 %v2364_v26, %v531_v38  ;;  %2263 = vmatmul.msk.f32.vlgmr.msrb.gmra.mxu0 %vm564_vm15, %v550_v37 }
 0x647   :  { %v535_v40 = vmul.f32 %v532_v39, %v532_v39 }
 0x649   :  { %v537_v41 = vmul.f32 %v535_v40, %v532_v39  ;;  %v2269_v40 = vld [vmem:[%s3568_s18 + $0x30] sm:$0xff] }
 0x64a   :  { %779 = vmatpush.msra.mxu2 %v2269_v40  ;;  %v3146_v40 = vld [vmem:[#allocation10 + $0x2] ss:$0 sm:$0xff] }
 0x64b   :  { %v539_v42 = vmul.f32 0.044715, %v537_v41  ;;  %v2273_v41 = vld [vmem:[%s3568_s18 + $0x50] sm:$0xff] }
 0x64d   :  { %v541_v43 = vadd.f32 %v539_v42, %v532_v39  ;;  %v692_v42 = vld [vmem:[%s3568_s18 + $0x8] sm:$0xff] }
 0x64f   :  { %v543_v44 = vmul.f32 0.7978846, %v541_v43  ;;  %v2268_v43 = vld [vmem:[%s3568_s18 + $0x28] sm:$0xff] }
 0x650   :  { %780 = vmatpush.msra.mxu2 %v2268_v43 }
 0x651   :  { %2391 = vtanh.f32 %v543_v44  ;;  %v2272_v44 = vld [vmem:[%s3568_s18 + $0x48] sm:$0xff] }
 0x657   :  { %v2392_v45 = vpop.eup %2391 }
 0x658   :  { %v547_v46 = vadd.f32 1.0, %v2392_v45  ;;  %v691_v45 = vld [vmem:[%s3568_s18] sm:$0xff] }
 0x65a   :  { %v549_v47 = vmul.f32 0.5, %v547_v46  ;;  %v2267_v46 = vld [vmem:[%s3568_s18 + $0x20] sm:$0xff] }
 0x65b   :  { %781 = vmatpush.msra.mxu2 %v2267_v46 }
 0x65c   :  { %v551_v48 = vmul.f32 %v549_v47, %v532_v39  ;;  %v2271_v47 = vld [vmem:[%s3568_s18 + $0x40] sm:$0xff] }
 0x65e   :  { %2264 = vmatmul.msk.f32.gmra.mxu0 %vm564_vm15, %v551_v48  ;;  %v2368_v48 = vld [vmem:[%s3567_s17] ss:$0 sm:$0xff] }
 0x6c2   :  { %v588_v50 = vpop.f32.mrf.mxu0 }
 0x6c3   :  { %v589_v51 = vadd.f32 %v2365_v49, %v588_v50 }
 0x6c5   :  { %v594_v52 = vadd.f32 %v589_v51, %v2955_v5  ;;  %v654_v5 = vld [vmem:[#allocation9 + $0x10] sm:$0xff] }
 0x6c6   :  { %679 = vmatpush.msra.mxu3 %v654_v5  ;;  %v3072_v5 = vld [vmem:[%s3569_s19 + $0x50] sm:$0xff] }
 0x6c7   :  { %v598_v53 = vsel %vm172_vm0, %v594_v52, 0.0 }
 0x6c8   :  { %599 = vadd.xlane.f32.xlu2 %v598_v53  ;;  %680 = vmatpush.msra.mxu3 %v653_v6  ;;  %v3078_v6 = vld [vmem:[%s3569_s19 + $0x8] sm:$0xff] }
 0x6ca   :  { %681 = vmatpush.msra.mxu3 %v652_v7  ;;  %v3083_v7 = vld [vmem:[%s3569_s19 + $0x28] sm:$0xff] }
 0x6cc   :  { %804 = vmatpush.msrb.mxu3 %v2274_v22 }
 0x6ce   :  { %805 = vmatpush.msrb.mxu3 %v2273_v41 }
 0x6d0   :  { %806 = vmatpush.msrb.mxu3 %v2272_v44 }
 0x6d2   :  { %807 = vmatpush.msrb.mxu3 %v2271_v47 }
 0x6db   :  { %v591_v54 = vpop.f32.mrf.mxu0 }
 0x6dc   :  { %v592_v55 = vadd.f32 %v2365_v49, %v591_v54 }
 0x6de   :  { %v595_v56 = vadd.f32 %v592_v55, %v496_v17  ;;  %v719_v55 = vld [vmem:[%s3570_s20] sm:$0x1] }
 0x6e0   :  { %v601_v57 = vsel %vm172_vm0, %v595_v56, 0.0 }
 0x6e1   :  { %602 = vadd.xlane.f32.xlu2 %v601_v57 }
 0x73b   :  { %v600_v58 = vpop.xlane.xlu2 %599 }
 0x73c   :  { %v604_v59 = vmul.f32 %v600_v58, %v2895_v13 }
 0x73e   :  { %v606_v60 = vsub.f32 %v594_v52, %v604_v59 }
 0x740   :  { %v608_v61 = vmul.f32 %v606_v60, %v606_v60 }
 0x742   :  { %v610_v62 = vsel %vm172_vm0, %v608_v61, 0.0 }
 0x743   :  { %611 = vadd.xlane.f32.xlu2 %v610_v62  ;;  %v2283_v62 = vld [vmem:[%s3570_s20 + $0x1] sm:$0x1] }
 0x754   :  { %v603_v63 = vpop.xlane.xlu2 %602 }
 0x755   :  { %v605_v0 = vmul.f32 %v603_v63, %v2895_v13  ;;  %v726_v63 = vld [vmem:[#allocation10 + $0x1] sm:$0x1] }
 0x757   :  { %v607_v1 = vsub.f32 %v595_v56, %v605_v0  ;;  %v724_v56 = vld [vmem:[#allocation10] sm:$0x1]  ;;  %v3045_v0 = vld [vmem:[%s3569_s19 + $0x18] sm:$0xff] }
 0x758   :  { %v3033_v57 = vadd.f32 %v724_v56, %v719_v55  ;;  %925 = vmatpush.msra.mxu0 %v3045_v0 }
 0x759   :  { %v609_v2 = vmul.f32 %v607_v1, %v607_v1 }
 0x75a   :  { %v731_v58 = vperm.slane %v3033_v57, 0 }
 0x75b   :  { %v613_v3 = vsel %vm172_vm0, %v609_v2, 0.0  ;;  %v3055_v2 = vld [vmem:[%s3569_s19 + $0x58] sm:$0xff] }
 0x75c   :  { %614 = vadd.xlane.f32.xlu1 %v613_v3  ;;  %v3062_v3 = vld [vmem:[%s3569_s19 + $0x10] sm:$0xff]  ;;  %965 = vmatpush.msrb.mxu2 %v3055_v2 }
 0x75d   :  { %926 = vmatpush.msra.mxu0 %v3062_v3 }
 0x75e   :  { %966 = vmatpush.msrb.mxu2 %v3072_v5 }
 0x75f   :  { %927 = vmatpush.msra.mxu0 %v3078_v6 }
 0x7b6   :  { %v612_v8 = vpop.xlane.xlu2 %611 }
 0x7b7   :  { %v616_v9 = vmul.f32 %v612_v8, %v2895_v13  ;;  %v3091_v8 = vld [vmem:[%s3569_s19 + $0x48] sm:$0xff] }
 0x7b8   :  { %967 = vmatpush.msrb.mxu2 %v3091_v8 }
 0x7b9   :  { %v618_v10 = vadd.f32 1e-12, %v616_v9 }
 0x7bb   :  { %2393 = vrsqrt.f32 %v618_v10  ;;  %vm626_vm2 = vweird.f32 %v618_v10 }
 0x7c1   :  { %v2394_v11 = vpop.eup %2393 }
 0x7c2   :  { %v621_v12 = vmul.f32 %v2394_v11, %v618_v10  ;;  %vm627_vm1 = vweird.f32 %v2394_v11  ;;  %v762_v10 = vadd.f32 %v2283_v62, %v726_v63 }
 0x7c3   :  { %vm628_vm3 = vmor %vm626_vm2, %vm627_vm1 }
 0x7c4   :  { %v622_v14 = vmul.f32 %v2394_v11, %v621_v12  ;;  %v3102_v12 = vld [vmem:[%s3569_s19 + $0x20] sm:$0xff] }
 0x7c6   :  { %v623_v15 = vmul.f32 0.5, %v622_v14  ;;  %v3110_v14 = vld [vmem:[%s3569_s19 + $0x40] sm:$0xff] }
 0x7c7   :  { %968 = vmatpush.msrb.mxu2 %v3110_v14 }
 0x7c8   :  { %v624_v16 = vsub.f32 1.5, %v623_v15 }
 0x7ca   :  { %v625_v17 = vmul.f32 %v2394_v11, %v624_v16  ;;  %v764_v16 = vperm.slane %v762_v10, 0 }
 0x7cc   :  { %v629_v19 = vsel %vm628_vm3, %v2394_v11, %v625_v17  ;;  %v3097_v11 = vld [vmem:[%s3569_s19] sm:$0xff] }
 0x7cd   :  { %v640_v23 = vmul.f32 %v629_v19, %v606_v60  ;;  %928 = vmatpush.msra.mxu0 %v3097_v11 }
 0x7cf   :  { %v645_v25 = vmul.f32 %v2366_v18, %v640_v23  ;;  %v615_v26 = vpop.xlane.xlu1 %614  ;;  %1107 = vmatpush.msrb.mxu0 %v3045_v0 }
 0x7d0   :  { %v617_v27 = vmul.f32 %v615_v26, %v2895_v13  ;;  %v693_v13 = vld [vmem:[%s3568_s18 + $0x10] sm:$0xff] }
 0x7d1   :  { %v650_v28 = vadd.f32 %v2367_v24, %v645_v25  ;;  %752 = vmatpush.msra.mxu1 %v693_v13  ;;  %1108 = vmatpush.msrb.mxu0 %v3062_v3 }
 0x7d2   :  { %v619_v29 = vadd.f32 1e-12, %v617_v27 }
 0x7d3   :  { %2265 = vmatmul.msk.f32.vlgmr.msra.gmra.mxu3 %vm172_vm0, %v650_v28  ;;  %753 = vmatpush.msra.mxu1 %v692_v42 }
 0x7d4   :  { %2395 = vrsqrt.f32 %v619_v29  ;;  %vm636_vm5 = vweird.f32 %v619_v29  ;;  %1109 = vmatpush.msrb.mxu0 %v3078_v6 }
 0x7d5   :  { %754 = vmatpush.msra.mxu1 %v691_v45  ;;  %v2369_v45 = vld [vmem:[%s3570_s20 + $0x2] ss:$0 sm:$0xff]  ;;  %s2735_s20 = smov 32  }
 0x7d6   :  { %1110 = vmatpush.msrb.mxu0 %v3097_v11 }
 0x7da   :  { %v2396_v30 = vpop.eup %2395 }
 0x7db   :  { %v631_v31 = vmul.f32 %v2396_v30, %v619_v29  ;;  %vm637_vm4 = vweird.f32 %v2396_v30 }
 0x7dc   :  { %vm638_vm6 = vmor %vm636_vm5, %vm637_vm4 }
 0x7dd   :  { %v632_v32 = vmul.f32 %v2396_v30, %v631_v31 }
 0x7df   :  { %v633_v33 = vmul.f32 0.5, %v632_v32 }
 0x7e1   :  { %v634_v34 = vsub.f32 1.5, %v633_v33 }
 0x7e3   :  { %v635_v35 = vmul.f32 %v2396_v30, %v634_v34 }
 0x7e5   :  { %v639_v36 = vsel %vm638_vm6, %v2396_v30, %v635_v35 }
 0x7e6   :  { %v641_v37 = vmul.f32 %v639_v36, %v607_v1  ;;  %v3050_v1 = vld [vmem:[%s3569_s19 + $0x38] sm:$0xff] }
 0x7e7   :  { %945 = vmatpush.msrb.mxu1 %v3050_v1  ;;  %1127 = vmatpush.msra.mxu3 %v3050_v1 }
 0x7e8   :  { %v646_v38 = vmul.f32 %v2366_v18, %v641_v37 }
 0x7e9   :  { %946 = vmatpush.msrb.mxu1 %v3067_v4  ;;  %1128 = vmatpush.msra.mxu3 %v3067_v4 }
 0x7ea   :  { %v651_v39 = vadd.f32 %v2367_v24, %v646_v38 }
 0x7eb   :  { %947 = vmatpush.msrb.mxu1 %v3083_v7  ;;  %1129 = vmatpush.msra.mxu3 %v3083_v7 }
 0x7ec   :  { %2266 = vmatmul.msk.f32.gmra.mxu3 %vm172_vm0, %v651_v39 }
 0x7ed   :  { %948 = vmatpush.msrb.mxu1 %v3102_v12  ;;  %1130 = vmatpush.msra.mxu3 %v3102_v12 }
 0x856   :  { %v683_v49 = vpop.f32.mrf.mxu3 }
 0x857   :  { %v684_v50 = vadd.f32 %v2368_v48, %v683_v49 }
 0x859   :  { %v689_v51 = vmax.f32 %v684_v50, 0.0 }
 0x85b   :  { %2285 = vmatmul.msk.f32.vlgmr.msra.gmra.mxu1 %vm172_vm0, %v689_v51  ;;  %2287 = vmatmul.msk.f32.vlgmr.msra.gmra.mxu2 %vm172_vm0, %v689_v51 }
 0x85c   :  { %2289 = vmatmul.msk.f32.vlgmr.msrb.gmra.mxu3 %vm172_vm0, %v689_v51  ;;  %1147 = vmatpush.msra.mxu1 %v3055_v2 }
 0x85d   :  { %1293 = vmatpush.msra.mxu2 %v3045_v0  ;;  %1333 = vmatpush.msrb.mxu3 %v3055_v2 }
 0x85e   :  { %1148 = vmatpush.msra.mxu1 %v3072_v5 }
 0x85f   :  { %1294 = vmatpush.msra.mxu2 %v3062_v3  ;;  %1334 = vmatpush.msrb.mxu3 %v3072_v5 }
 0x860   :  { %1149 = vmatpush.msra.mxu1 %v3091_v8 }
 0x861   :  { %1295 = vmatpush.msra.mxu2 %v3078_v6  ;;  %1335 = vmatpush.msrb.mxu3 %v3091_v8 }
 0x862   :  { %1150 = vmatpush.msra.mxu1 %v3110_v14 }
 0x863   :  { %1296 = vmatpush.msra.mxu2 %v3097_v11  ;;  %1336 = vmatpush.msrb.mxu3 %v3110_v14 }
 0x86f   :  { %v686_v52 = vpop.f32.mrf.mxu3 }
 0x870   :  { %v687_v53 = vadd.f32 %v2368_v48, %v686_v52 }
 0x872   :  { %v690_v54 = vmax.f32 %v687_v53, 0.0 }
 0x874   :  { %2286 = vmatmul.msk.f32.gmra.mxu1 %vm172_vm0, %v690_v54  ;;  %2288 = vmatmul.msk.f32.gmra.mxu2 %vm172_vm0, %v690_v54 }
 0x875   :  { %2290 = vmatmul.msk.f32.gmra.mxu3 %vm172_vm0, %v690_v54 }
 0x8d8   :  { %v756_v59 = vpop.f32.mrf.mxu1 }
 0x8d9   :  { %v3036_v60 = vadd.f32 %v756_v59, %v731_v58 }
 0x8db   :  { %v2291_v61 = vmul.f32 -1.442695, %v3036_v60 }
 0x8dd   :  { %2397 = vpow2.f32 %v2291_v61 }
 0x8de   :  { %v783_v17 = vpop.f32.mrf.mxu2 }
 0x8df   :  { %v3124_v18 = vadd.f32 %v783_v17, %v764_v16  ;;  %v809_v42 = vpop.f32.mrf.mxu3 }
 0x8e0   :  { %v3153_v51 = vadd.f32 %v2369_v45, %v809_v42 }
 0x8e1   :  { %v2293_v20 = vmul.f32 -1.442695, %v3124_v18 }
 0x8e3   :  { %v2398_v9 = vpop.eup %2397 }
 0x8e4   :  { %v821_v15 = vadd.f32 1.0, %v2398_v9 }
 0x8e6   :  { %2399 = vrcp.f32 %v821_v15  ;;  %v834_v35 = vand.u32 2147483648, %v821_v15  ;;  %vm828_vm8 = vweird.f32 %v821_v15  ;;  %v832_v36 = vand.u32 2147483647, %v821_v15 }
 0x8e7   :  { %2401 = vpow2.f32 %v2293_v20 }
 0x8e8   :  { %v835_v39 = vor.u32 1.1754944e-38, %v834_v35  ;;  %vm833_vm10 = vcmp.eq.f32.partialorder %v832_v36, 8.507059e+37 }
 0x8ec   :  { %v2400_v19 = vpop.eup %2399 }
 0x8ed   :  { %v824_v23 = vmul.f32 %v2400_v19, %v821_v15  ;;  %v2402_v28 = vpop.eup %2401  ;;  %vm829_vm7 = vweird.f32 %v2400_v19 }
 0x8ee   :  { %v3143_v32 = vadd.f32 1.0, %v2402_v28  ;;  %vm830_vm9 = vmor %vm828_vm8, %vm829_vm7 }
 0x8ef   :  { %v825_v25 = vsub.f32 1.0, %v824_v23 }
 0x8f0   :  { %vm866_vm3 = vweird.f32 %v3143_v32 }
 0x8f1   :  { %v759_v21 = vpop.f32.mrf.mxu1  ;;  %v826_v30 = vmul.f32 %v2400_v19, %v825_v25 }
 0x8f2   :  { %v3137_v22 = vadd.f32 %v759_v21, %v731_v58 }
 0x8f3   :  { %v827_v34 = vadd.f32 %v2400_v19, %v826_v30 }
 0x8f4   :  { %v2292_v24 = vmul.f32 -1.442695, %v3137_v22 }
 0x8f5   :  { %v831_v38 = vsel %vm830_vm9, %v2400_v19, %v827_v34  ;;  %vm909_vm9 = vcmask 1041409  }
 0x8f6   :  { %2403 = vpow2.f32 %v2292_v24  ;;  %v836_v43 = vsel %vm833_vm10, %v835_v39, %v831_v38  ;;  %v872_v24 = vand.u32 2147483648, %v3143_v32 }
 0x8f7   :  { %v786_v26 = vpop.f32.mrf.mxu2  ;;  %v894_v48 = vmul.f32 %v3146_v40, %v836_v43 }
 0x8f8   :  { %v3140_v27 = vadd.f32 %v786_v26, %v764_v16  ;;  %v812_v58 = vpop.f32.mrf.mxu3  ;;  %v870_v26 = vand.u32 2147483647, %v3143_v32  ;;  %v873_v34 = vor.u32 1.1754944e-38, %v872_v24 }
 0x8f9   :  { %v896_v57 = vadd.f32 %v894_v48, %v3153_v51  ;;  %v3156_v10 = vadd.f32 %v2369_v45, %v812_v58 }
 0x8fa   :  { %v2294_v29 = vmul.f32 -1.442695, %v3140_v27  ;;  %vm871_vm7 = vcmp.eq.f32.partialorder %v870_v26, 8.507059e+37 }
 0x8fc   :  { %v2404_v31 = vpop.eup %2403  ;;  %2405 = vpow2.f32 %v2294_v29 }
 0x8fd   :  { %v822_v33 = vadd.f32 1.0, %v2404_v31 }
 0x8ff   :  { %2407 = vrcp.f32 %v822_v33  ;;  %v849_v49 = vand.u32 2147483648, %v822_v33  ;;  %v847_v53 = vand.u32 2147483647, %v822_v33  ;;  %vm843_vm12 = vweird.f32 %v822_v33 }
 0x900   :  { %2409 = vrcp.f32 %v3143_v32 }
 0x901   :  { %v850_v59 = vor.u32 1.1754944e-38, %v849_v49  ;;  %vm848_vm14 = vcmp.eq.f32.partialorder %v847_v53, 8.507059e+37 }
 0x902   :  { %v2406_v37 = vpop.eup %2405 }
 0x903   :  { %v860_v13 = vadd.f32 1.0, %v2406_v37 }
 0x905   :  { %v2408_v41 = vpop.eup %2407  ;;  %2411 = vrcp.f32 %v860_v13  ;;  %v887_v25 = vand.u32 2147483648, %v860_v13  ;;  %vm881_vm5 = vweird.f32 %v860_v13  ;;  %v885_v28 = vand.u32 2147483647, %v860_v13 }
 0x906   :  { %v2410_v44 = vpop.eup %2409  ;;  %v839_v46 = vmul.f32 %v2408_v41, %v822_v33  ;;  %vm844_vm11 = vweird.f32 %v2408_v41  ;;  %2413 = vtanh.f32 %v896_v57 }
 0x907   :  { %v862_v50 = vmul.f32 %v2410_v44, %v3143_v32  ;;  %vm845_vm13 = vmor %vm843_vm12, %vm844_vm11  ;;  %vm867_vm1 = vweird.f32 %v2410_v44  ;;  %v888_v35 = vor.u32 1.1754944e-38, %v887_v25  ;;  %vm886_vm8 = vcmp.eq.f32.partialorder %v885_v28, 8.507059e+37 }
 0x908   :  { %v840_v47 = vsub.f32 1.0, %v839_v46  ;;  %vm868_vm4 = vmor %vm866_vm3, %vm867_vm1 }
 0x909   :  { %v863_v61 = vsub.f32 1.0, %v862_v50 }
 0x90a   :  { %v841_v52 = vmul.f32 %v2408_v41, %v840_v47 }
 0x90b   :  { %v2412_v54 = vpop.eup %2411  ;;  %v864_v16 = vmul.f32 %v2410_v44, %v863_v61 }
 0x90c   :  { %v842_v55 = vadd.f32 %v2408_v41, %v841_v52  ;;  %v877_v56 = vmul.f32 %v2412_v54, %v860_v13  ;;  %vm882_vm2 = vweird.f32 %v2412_v54  ;;  %v2414_v23 = vpop.eup %2413 }
 0x90d   :  { %v865_v20 = vadd.f32 %v2410_v44, %v864_v16  ;;  %vm883_vm6 = vmor %vm881_vm5, %vm882_vm2  ;;  %v900_v31 = vsub.f32 0.0, %v2414_v23 }
 0x90e   :  { %v846_v62 = vsel %vm845_vm13, %v2408_v41, %v842_v55  ;;  %v878_v63 = vsub.f32 1.0, %v877_v56 }
 0x90f   :  { %v851_v9 = vsel %vm848_vm14, %v850_v59, %v846_v62  ;;  %v869_v29 = vsel %vm868_vm4, %v2410_v44, %v865_v20 }
 0x910   :  { %v895_v15 = vmul.f32 %v3146_v40, %v851_v9  ;;  %v879_v17 = vmul.f32 %v2412_v54, %v878_v63  ;;  %v874_v37 = vsel %vm871_vm7, %v873_v34, %v869_v29 }
 0x911   :  { %v902_v39 = vmul.f32 %v900_v31, %v874_v37 }
 0x912   :  { %v897_v19 = vadd.f32 %v895_v15, %v3156_v10  ;;  %v880_v21 = vadd.f32 %v2412_v54, %v879_v17 }
 0x913   :  { %v3165_v32 = vadd.f32 %v2414_v23, %v902_v39 }
 0x914   :  { %2415 = vtanh.f32 %v897_v19  ;;  %v884_v30 = vsel %vm883_vm6, %v2412_v54, %v880_v21 }
 0x915   :  { %v889_v38 = vsel %vm886_vm8, %v888_v35, %v884_v30 }
 0x91a   :  { %v2416_v33 = vpop.eup %2415 }
 0x91b   :  { %v901_v36 = vsub.f32 0.0, %v2416_v33 }
 0x91d   :  { %v903_v41 = vmul.f32 %v901_v36, %v889_v38 }
 0x91f   :  { %v3163_v42 = vadd.f32 %v2416_v33, %v903_v41 }
 0x921   :  { %v908_v13 = vrot.slane %v3163_v42, 7 }
 0x923   :  { %v3170_v43 = vsel %vm909_vm9, %v908_v13, %v3165_v32 }
 0x924   :  { %2295 = vmatmul.msk.f32.vlgmr.msra.gmra.mxu0 %vm172_vm0, %v3170_v43  ;;  %2296 = vmatmul.msk.f32.vlgmr.msrb.gmra.mxu1 %vm172_vm0, %v3170_v43 }
 0x925   :  { %2297 = vmatmul.msk.f32.vlgmr.msrb.gmra.mxu2 %vm172_vm0, %v3170_v43  ;;  %1313 = vmatpush.msra.mxu0 %v3050_v1 }
 0x926   :  { %1479 = vmatpush.msrb.mxu1 %v3045_v0  ;;  %1499 = vmatpush.msrb.mxu2 %v3050_v1 }
 0x927   :  { %1314 = vmatpush.msra.mxu0 %v3067_v4 }
 0x928   :  { %1480 = vmatpush.msrb.mxu1 %v3062_v3  ;;  %1500 = vmatpush.msrb.mxu2 %v3067_v4 }
 0x929   :  { %1315 = vmatpush.msra.mxu0 %v3083_v7 }
 0x92a   :  { %1481 = vmatpush.msrb.mxu1 %v3078_v6  ;;  %1501 = vmatpush.msrb.mxu2 %v3083_v7 }
 0x92b   :  { %1316 = vmatpush.msra.mxu0 %v3102_v12 }
 0x92c   :  { %1482 = vmatpush.msrb.mxu1 %v3097_v11  ;;  %1502 = vmatpush.msrb.mxu2 %v3102_v12 }
 0x9a1   :  { %v930_v44 = vpop.f32.mrf.mxu0  ;;  %v950_v45 = vpop.f32.mrf.mxu1 }
 0x9a2   :  { %v974_v46 = vrot.slane %v930_v44, 7  ;;  %v978_v47 = vadd.f32 %v930_v44, %v3137_v22  ;;  %v1018_v48 = vrot.slane %v950_v45, 7  ;;  %v1022_v49 = vadd.f32 %v950_v45, %v3140_v27 }
 0x9a4   :  { %v977_v50 = vadd.f32 %v974_v46, %v3036_v60  ;;  %v2299_v52 = vmul.f32 -1.442695, %v978_v47  ;;  %v1021_v53 = vadd.f32 %v1018_v48, %v3124_v18  ;;  %v2301_v54 = vmul.f32 -1.442695, %v1022_v49 }
 0x9a6   :  { %v2298_v55 = vmul.f32 -1.442695, %v977_v50  ;;  %2417 = vpow2.f32 %v2299_v52  ;;  %v2300_v56 = vmul.f32 -1.442695, %v1021_v53 }
 0x9a7   :  { %2419 = vpow2.f32 %v2301_v54 }
 0x9a8   :  { %2421 = vpow2.f32 %v2298_v55  ;;  %v970_v20 = vpop.f32.mrf.mxu2 }
 0x9a9   :  { %2423 = vpow2.f32 %v2300_v56  ;;  %v971_v30 = vadd.f32 %v3146_v40, %v970_v20 }
 0x9ab   :  { %v1062_v47 = vrot.slane %v971_v30, 7 }
 0x9ac   :  { %v2418_v57 = vpop.eup %2417 }
 0x9ad   :  { %v2420_v58 = vpop.eup %2419  ;;  %v986_v59 = vadd.f32 1.0, %v2418_v57 }
 0x9ae   :  { %v2422_v61 = vpop.eup %2421  ;;  %v3194_v9 = vadd.f32 1.0, %v2420_v58 }
 0x9af   :  { %v2424_v62 = vpop.eup %2423  ;;  %v985_v63 = vadd.f32 1.0, %v2422_v61  ;;  %2425 = vrcp.f32 %v986_v59  ;;  %v1013_v24 = vand.u32 2147483648, %v986_v59  ;;  %v1011_v28 = vand.u32 2147483647, %v986_v59 }
 0x9b0   :  { %v3196_v15 = vadd.f32 1.0, %v2424_v62  ;;  %vm1007_vm11 = vweird.f32 %v986_v59  ;;  %vm1051_vm7 = vweird.f32 %v3194_v9 }
 0x9b1   :  { %2427 = vrcp.f32 %v985_v63  ;;  %v998_v31 = vand.u32 2147483648, %v985_v63  ;;  %v996_v35 = vand.u32 2147483647, %v985_v63  ;;  %v1014_v37 = vor.u32 1.1754944e-38, %v1013_v24 }
 0x9b2   :  { %2429 = vrcp.f32 %v3194_v9  ;;  %vm992_vm14 = vweird.f32 %v985_v63  ;;  %vm1012_vm1 = vcmp.eq.f32.partialorder %v1011_v28, 8.507059e+37  ;;  %vm1036_vm6 = vweird.f32 %v3196_v15 }
 0x9b3   :  { %2431 = vrcp.f32 %v3196_v15  ;;  %v999_v44 = vor.u32 1.1754944e-38, %v998_v31  ;;  %vm997_vm3 = vcmp.eq.f32.partialorder %v996_v35, 8.507059e+37  ;;  %v1040_v20 = vand.u32 2147483647, %v3196_v15 }
 0x9b5   :  { %v2426_v16 = vpop.eup %2425 }
 0x9b6   :  { %v1003_v17 = vmul.f32 %v2426_v16, %v986_v59  ;;  %vm1008_vm10 = vweird.f32 %v2426_v16 }
 0x9b7   :  { %v2428_v19 = vpop.eup %2427  ;;  %vm1009_vm13 = vmor %vm1007_vm11, %vm1008_vm10  ;;  %vm1041_vm11 = vcmp.eq.f32.partialorder %v1040_v20, 8.507059e+37 }
 0x9b8   :  { %v988_v21 = vmul.f32 %v2428_v19, %v985_v63  ;;  %v1004_v23 = vsub.f32 1.0, %v1003_v17  ;;  %v3200_v29 = vpop.eup %2429  ;;  %vm993_vm12 = vweird.f32 %v2428_v19  ;;  %v1057_v17 = vand.u32 2147483648, %v3194_v9 }
 0x9b9   :  { %v2432_v33 = vpop.eup %2431  ;;  %v1047_v13 = vmul.f32 %v3200_v29, %v3194_v9  ;;  %vm994_vm2 = vmor %vm992_vm14, %vm993_vm12  ;;  %vm1052_vm4 = vweird.f32 %v3200_v29 }
 0x9ba   :  { %v989_v25 = vsub.f32 1.0, %v988_v21  ;;  %v1005_v26 = vmul.f32 %v2426_v16, %v1004_v23  ;;  %v1032_v41 = vmul.f32 %v2432_v33, %v3196_v15  ;;  %vm1037_vm5 = vweird.f32 %v2432_v33  ;;  %vm1053_vm8 = vmor %vm1051_vm7, %vm1052_vm4 }
 0x9bb   :  { %v1048_v54 = vsub.f32 1.0, %v1047_v13  ;;  %v1055_v21 = vand.u32 2147483647, %v3194_v9  ;;  %vm1038_vm10 = vmor %vm1036_vm6, %vm1037_vm5  ;;  %v1058_v31 = vor.u32 1.1754944e-38, %v1057_v17 }
 0x9bc   :  { %v990_v34 = vmul.f32 %v2428_v19, %v989_v25  ;;  %v1006_v36 = vadd.f32 %v2426_v16, %v1005_v26  ;;  %v1033_v53 = vsub.f32 1.0, %v1032_v41 }
 0x9bd   :  { %v1049_v57 = vmul.f32 %v3200_v29, %v1048_v54  ;;  %vm1056_vm12 = vcmp.eq.f32.partialorder %v1055_v21, 8.507059e+37 }
 0x9be   :  { %v991_v38 = vadd.f32 %v2428_v19, %v990_v34  ;;  %v1010_v39 = vsel %vm1009_vm13, %v2426_v16, %v1006_v36  ;;  %v1034_v56 = vmul.f32 %v2432_v33, %v1033_v53  ;;  %v1042_v16 = vand.u32 2147483648, %v3196_v15 }
 0x9bf   :  { %v1015_v45 = vsel %vm1012_vm1, %v1014_v37, %v1010_v39  ;;  %v1050_v62 = vadd.f32 %v3200_v29, %v1049_v57 }
 0x9c0   :  { %v995_v46 = vsel %vm994_vm2, %v2428_v19, %v991_v38  ;;  %v1066_v48 = vmul.f32 %v1015_v45, %v971_v30  ;;  %v1035_v61 = vadd.f32 %v2432_v33, %v1034_v56  ;;  %v1043_v30 = vor.u32 1.1754944e-38, %v1042_v16 }
 0x9c1   :  { %v1000_v49 = vsel %vm997_vm3, %v999_v44, %v995_v46  ;;  %v1054_v25 = vsel %vm1053_vm8, %v3200_v29, %v1050_v62 }
 0x9c2   :  { %v1065_v50 = vmul.f32 %v1062_v47, %v1000_v49  ;;  %v1068_v52 = vadd.f32 %v1066_v48, %v3156_v10  ;;  %v1039_v24 = vsel %vm1038_vm10, %v2432_v33, %v1035_v61  ;;  %v1059_v36 = vsel %vm1056_vm12, %v1058_v31, %v1054_v25 }
 0x9c3   :  { %v1044_v35 = vsel %vm1041_vm11, %v1043_v30, %v1039_v24 }
 0x9c4   :  { %v1067_v55 = vadd.f32 %v1065_v50, %v3153_v51  ;;  %2433 = vtanh.f32 %v1068_v52 }
 0x9c6   :  { %2435 = vtanh.f32 %v1067_v55 }
 0x9ca   :  { %v2434_v58 = vpop.eup %2433 }
 0x9cb   :  { %v1074_v59 = vrot.slane %v2434_v58, 1 }
 0x9cc   :  { %v2436_v63 = vpop.eup %2435 }
 0x9cd   :  { %v1073_v19 = vrot.slane %v2436_v63, 1  ;;  %v1078_v23 = vsub.f32 %v3163_v42, %v1074_v59 }
 0x9cf   :  { %v1077_v26 = vsub.f32 %v3165_v32, %v1073_v19  ;;  %v1082_v28 = vrot.slane %v1078_v23, 7 }
 0x9d1   :  { %v1081_v34 = vrot.slane %v1077_v26, 7  ;;  %v1086_v37 = vmul.f32 %v1082_v28, %v1059_v36 }
 0x9d3   :  { %v1085_v15 = vmul.f32 %v1081_v34, %v1044_v35  ;;  %v3222_v9 = vadd.f32 %v2434_v58, %v1086_v37 }
 0x9d5   :  { %v3220_v38 = vadd.f32 %v2436_v63, %v1085_v15 }
 0x9d7   :  { %v1091_v42 = vrot.slane %v3220_v38, 1 }
 0x9d9   :  { %v1092_v29 = vsel %vm909_vm9, %v3222_v9, %v1091_v42 }
 0x9da   :  { %2205 = vrot.lane.b32.xlu1 %v1092_v29, %s2735_s20  ;;  %2302 = vmatmul.msk.f32.vlgmr.msrb.gmra.mxu0 %vm172_vm0, %v1092_v29 }
 0x9db   :  { %2303 = vmatmul.msk.f32.vlgmr.msra.gmra.mxu3 %vm172_vm0, %v1092_v29  ;;  %2304 = vmatmul.msk.f32.vlgmr.msra.gmra.mxu1 %vm172_vm0, %v1092_v29 }
 0x9dc   :  { %1519 = vmatpush.msrb.mxu0 %v3055_v2  ;;  %1665 = vmatpush.msra.mxu3 %v3045_v0 }
 0x9dd   :  { %1685 = vmatpush.msra.mxu1 %v3050_v1 }
 0x9de   :  { %1520 = vmatpush.msrb.mxu0 %v3072_v5  ;;  %1666 = vmatpush.msra.mxu3 %v3062_v3 }
 0x9df   :  { %1686 = vmatpush.msra.mxu1 %v3067_v4 }
 0x9e0   :  { %1521 = vmatpush.msrb.mxu0 %v3091_v8  ;;  %1667 = vmatpush.msra.mxu3 %v3078_v6 }
 0x9e1   :  { %1687 = vmatpush.msra.mxu1 %v3083_v7 }
 0x9e2   :  { %1522 = vmatpush.msrb.mxu0 %v3110_v14  ;;  %1668 = vmatpush.msra.mxu3 %v3097_v11 }
 0x9e3   :  { %1688 = vmatpush.msra.mxu1 %v3102_v12 }
 0xa57   :  { %v1112_v32 = vpop.f32.mrf.mxu0 }
 0xa58   :  { %v1156_v33 = vrot.slane %v1112_v32, 6  ;;  %v1157_v39 = vrot.slane %v1112_v32, 7  ;;  %v1152_v63 = vpop.f32.mrf.mxu1 }
 0xa59   :  { %v1153_v21 = vadd.f32 %v3146_v40, %v1152_v63 }
 0xa5a   :  { %v1160_v41 = vadd.f32 %v1156_v33, %v3036_v60  ;;  %v1161_v13 = vadd.f32 %v1157_v39, %v3137_v22 }
 0xa5b   :  { %v1246_v15 = vrot.slane %v1153_v21, 6 }
 0xa5c   :  { %v2305_v44 = vmul.f32 -1.442695, %v1160_v41  ;;  %v2306_v45 = vmul.f32 -1.442695, %v1161_v13 }
 0xa5e   :  { %2437 = vpow2.f32 %v2305_v44  ;;  %v1132_v46 = vpop.f32.mrf.mxu3 }
 0xa5f   :  { %2439 = vpow2.f32 %v2306_v45  ;;  %v1201_v47 = vrot.slane %v1132_v46, 6  ;;  %v1202_v48 = vrot.slane %v1132_v46, 7  ;;  %v1247_v45 = vrot.slane %v1153_v21, 7 }
 0xa61   :  { %v1205_v49 = vadd.f32 %v1201_v47, %v3124_v18  ;;  %v1206_v50 = vadd.f32 %v1202_v48, %v3140_v27 }
 0xa63   :  { %v2307_v52 = vmul.f32 -1.442695, %v1205_v49  ;;  %v2308_v53 = vmul.f32 -1.442695, %v1206_v50 }
 0xa64   :  { %v2438_v54 = vpop.eup %2437 }
 0xa65   :  { %v2440_v55 = vpop.eup %2439  ;;  %v1168_v56 = vadd.f32 1.0, %v2438_v54  ;;  %2441 = vpow2.f32 %v2307_v52 }
 0xa66   :  { %v1169_v57 = vadd.f32 1.0, %v2440_v55  ;;  %2443 = vpow2.f32 %v2308_v53 }
 0xa67   :  { %2445 = vrcp.f32 %v1168_v56  ;;  %v1181_v24 = vand.u32 2147483648, %v1168_v56  ;;  %v1179_v28 = vand.u32 2147483647, %v1168_v56  ;;  %vm1175_vm1 = vweird.f32 %v1168_v56 }
 0xa68   :  { %2447 = vrcp.f32 %v1169_v57  ;;  %v1196_v30 = vand.u32 2147483648, %v1169_v57  ;;  %v1194_v34 = vand.u32 2147483647, %v1169_v57  ;;  %vm1190_vm3 = vweird.f32 %v1169_v57 }
 0xa69   :  { %v1182_v42 = vor.u32 1.1754944e-38, %v1181_v24  ;;  %vm1180_vm4 = vcmp.eq.f32.partialorder %v1179_v28, 8.507059e+37 }
 0xa6a   :  { %v1197_v39 = vor.u32 1.1754944e-38, %v1196_v30  ;;  %vm1195_vm6 = vcmp.eq.f32.partialorder %v1194_v34, 8.507059e+37 }
 0xa6b   :  { %v2442_v58 = vpop.eup %2441 }
 0xa6c   :  { %v2444_v59 = vpop.eup %2443  ;;  %v3247_v61 = vadd.f32 1.0, %v2442_v58 }
 0xa6d   :  { %v2446_v62 = vpop.eup %2445  ;;  %v3249_v16 = vadd.f32 1.0, %v2444_v59 }
 0xa6e   :  { %v2448_v17 = vpop.eup %2447  ;;  %v1171_v19 = vmul.f32 %v2446_v62, %v1168_v56  ;;  %2449 = vrcp.f32 %v3247_v61  ;;  %vm1176_vm13 = vweird.f32 %v2446_v62  ;;  %v1226_v58 = vand.u32 2147483648, %v3247_v61 }
 0xa6f   :  { %v1186_v20 = vmul.f32 %v2448_v17, %v1169_v57  ;;  %2451 = vrcp.f32 %v3249_v16  ;;  %vm1191_vm14 = vweird.f32 %v2448_v17  ;;  %vm1177_vm2 = vmor %vm1175_vm1, %vm1176_vm13  ;;  %vm1220_vm10 = vweird.f32 %v3247_v61 }
 0xa70   :  { %v1172_v23 = vsub.f32 1.0, %v1171_v19  ;;  %vm1192_vm5 = vmor %vm1190_vm3, %vm1191_vm14  ;;  %v1224_v19 = vand.u32 2147483647, %v3247_v61  ;;  %vm1235_vm11 = vweird.f32 %v3249_v16  ;;  %v1239_v21 = vand.u32 2147483647, %v3249_v16 }
 0xa71   :  { %v1187_v25 = vsub.f32 1.0, %v1186_v20 }
 0xa72   :  { %v1173_v26 = vmul.f32 %v2446_v62, %v1172_v23  ;;  %vm1225_vm14 = vcmp.eq.f32.partialorder %v1224_v19, 8.507059e+37  ;;  %vm1240_vm1 = vcmp.eq.f32.partialorder %v1239_v21, 8.507059e+37 }
 0xa73   :  { %v1188_v31 = vmul.f32 %v2448_v17, %v1187_v25 }
 0xa74   :  { %v2450_v35 = vpop.eup %2449  ;;  %v1174_v36 = vadd.f32 %v2446_v62, %v1173_v26  ;;  %v1227_v26 = vor.u32 1.1754944e-38, %v1226_v58 }
 0xa75   :  { %v2452_v37 = vpop.eup %2451  ;;  %v1189_v29 = vadd.f32 %v2448_v17, %v1188_v31  ;;  %v1216_v32 = vmul.f32 %v2450_v35, %v3247_v61  ;;  %vm1221_vm7 = vweird.f32 %v2450_v35 }
 0xa76   :  { %v1178_v33 = vsel %vm1177_vm2, %v2446_v62, %v1174_v36  ;;  %v1231_v41 = vmul.f32 %v2452_v37, %v3249_v16  ;;  %vm1236_vm8 = vweird.f32 %v2452_v37  ;;  %vm1222_vm12 = vmor %vm1220_vm10, %vm1221_vm7 }
 0xa77   :  { %v1183_v13 = vsel %vm1180_vm4, %v1182_v42, %v1178_v33  ;;  %v1193_v44 = vsel %vm1192_vm5, %v2448_v17, %v1189_v29  ;;  %v1217_v49 = vsub.f32 1.0, %v1216_v32  ;;  %v1241_v17 = vand.u32 2147483648, %v3249_v16  ;;  %vm1237_vm13 = vmor %vm1235_vm11, %vm1236_vm8 }
 0xa78   :  { %v1198_v46 = vsel %vm1195_vm6, %v1197_v39, %v1193_v44  ;;  %v1250_v47 = vmul.f32 %v1246_v15, %v1183_v13  ;;  %v1232_v52 = vsub.f32 1.0, %v1231_v41 }
 0xa79   :  { %v1251_v48 = vmul.f32 %v1247_v45, %v1198_v46  ;;  %v1218_v54 = vmul.f32 %v2450_v35, %v1217_v49  ;;  %v1242_v30 = vor.u32 1.1754944e-38, %v1241_v17 }
 0xa7a   :  { %v1252_v50 = vadd.f32 %v1250_v47, %v3153_v51  ;;  %v1233_v55 = vmul.f32 %v2452_v37, %v1232_v52 }
 0xa7b   :  { %v1253_v53 = vadd.f32 %v1251_v48, %v3156_v10  ;;  %v1219_v56 = vadd.f32 %v2450_v35, %v1218_v54 }
 0xa7c   :  { %2453 = vtanh.f32 %v1252_v50  ;;  %v1234_v59 = vadd.f32 %v2452_v37, %v1233_v55 }
 0xa7d   :  { %2455 = vtanh.f32 %v1253_v53  ;;  %v1223_v24 = vsel %vm1222_vm12, %v2450_v35, %v1219_v56 }
 0xa7e   :  { %v1238_v28 = vsel %vm1237_vm13, %v2452_v37, %v1234_v59  ;;  %v1228_v34 = vsel %vm1225_vm14, %v1227_v26, %v1223_v24 }
 0xa7f   :  { %v1243_v36 = vsel %vm1240_vm1, %v1242_v30, %v1238_v28 }
 0xa82   :  { %v2454_v57 = vpop.eup %2453 }
 0xa83   :  { %v2456_v62 = vpop.eup %2455  ;;  %v1258_v63 = vrot.slane %v2454_v57, 1 }
 0xa84   :  { %v1259_v20 = vrot.slane %v2456_v62, 1 }
 0xa85   :  { %v1262_v23 = vsub.f32 %v3220_v38, %v1258_v63 }
 0xa86   :  { %v1263_v25 = vsub.f32 %v3222_v9, %v1259_v20 }
 0xa87   :  { %v1266_v31 = vrot.slane %v1262_v23, 7 }
 0xa88   :  { %v1267_v61 = vrot.slane %v1263_v25, 7 }
 0xa89   :  { %v1270_v15 = vmul.f32 %v1266_v31, %v1228_v34 }
 0xa8a   :  { %v1271_v42 = vmul.f32 %v1267_v61, %v1243_v36 }
 0xa8b   :  { %v3266_v29 = vadd.f32 %v2454_v57, %v1270_v15 }
 0xa8c   :  { %v3268_v16 = vadd.f32 %v2456_v62, %v1271_v42 }
 0xa8d   :  { %v1276_v38 = vrot.slane %v3266_v29, 2 }
 0xa8e   :  { %v1277_v35 = vrot.slane %v3268_v16, 1 }
 0xa90   :  { %v3273_v9 = vsel %vm909_vm9, %v1277_v35, %v1276_v38 }
 0xa91   :  { %2309 = vmatmul.msk.f32.vlgmr.msra.gmra.mxu2 %vm172_vm0, %v3273_v9  ;;  %2310 = vmatmul.msk.f32.vlgmr.msra.gmra.mxu0 %vm172_vm0, %v3273_v9 }
 0xa92   :  { %2311 = vmatmul.msk.f32.vlgmr.msrb.gmra.mxu3 %vm172_vm0, %v3273_v9  ;;  %1705 = vmatpush.msra.mxu2 %v3055_v2 }
 0xa93   :  { %1851 = vmatpush.msra.mxu0 %v3045_v0  ;;  %1871 = vmatpush.msrb.mxu3 %v3050_v1 }
 0xa94   :  { %1706 = vmatpush.msra.mxu2 %v3072_v5 }
 0xa95   :  { %1852 = vmatpush.msra.mxu0 %v3062_v3  ;;  %1872 = vmatpush.msrb.mxu3 %v3067_v4 }
 0xa96   :  { %1707 = vmatpush.msra.mxu2 %v3091_v8 }
 0xa97   :  { %1853 = vmatpush.msra.mxu0 %v3078_v6  ;;  %1873 = vmatpush.msrb.mxu3 %v3083_v7 }
 0xa98   :  { %1708 = vmatpush.msra.mxu2 %v3110_v14 }
 0xa99   :  { %1854 = vmatpush.msra.mxu0 %v3097_v11  ;;  %1874 = vmatpush.msrb.mxu3 %v3102_v12 }
 0xb0e   :  { %v1318_v0 = vpop.f32.mrf.mxu0 }
 0xb0f   :  { %v1387_v1 = vrot.slane %v1318_v0, 5  ;;  %v1388_v2 = vrot.slane %v1318_v0, 6 }
 0xb11   :  { %v1391_v5 = vadd.f32 %v1387_v1, %v3124_v18  ;;  %v1392_v4 = vadd.f32 %v1388_v2, %v3140_v27 }
 0xb13   :  { %v2314_v32 = vmul.f32 -1.442695, %v1391_v5  ;;  %v2315_v14 = vmul.f32 -1.442695, %v1392_v4 }
 0xb14   :  { %v1298_v3 = vpop.f32.mrf.mxu2 }
 0xb15   :  { %v1342_v37 = vrot.slane %v1298_v3, 5  ;;  %v1343_v8 = vrot.slane %v1298_v3, 6  ;;  %2457 = vpow2.f32 %v2314_v32  ;;  %v1338_v49 = vpop.f32.mrf.mxu3 }
 0xb16   :  { %v1339_v54 = vadd.f32 %v3146_v40, %v1338_v49 }
 0xb17   :  { %v1346_v6 = vadd.f32 %v1342_v37, %v3036_v60  ;;  %v1347_v7 = vadd.f32 %v1343_v8, %v3137_v22 }
 0xb18   :  { %v1432_v23 = vrot.slane %v1339_v54, 5  ;;  %v1433_v36 = vrot.slane %v1339_v54, 6 }
 0xb19   :  { %v2312_v33 = vmul.f32 -1.442695, %v1346_v6  ;;  %v2313_v11 = vmul.f32 -1.442695, %v1347_v7 }
 0xb1b   :  { %2459 = vpow2.f32 %v2312_v33  ;;  %v2458_v12 = vpop.eup %2457 }
 0xb1c   :  { %2461 = vpow2.f32 %v2313_v11  ;;  %v3297_v46 = vadd.f32 1.0, %v2458_v12 }
 0xb1d   :  { %2463 = vpow2.f32 %v2315_v14 }
 0xb1e   :  { %v1412_v8 = vand.u32 2147483648, %v3297_v46  ;;  %vm1406_vm13 = vweird.f32 %v3297_v46  ;;  %v1410_v33 = vand.u32 2147483647, %v3297_v46 }
 0xb21   :  { %v2460_v39 = vpop.eup %2459 }
 0xb22   :  { %v2462_v41 = vpop.eup %2461  ;;  %v1354_v13 = vadd.f32 1.0, %v2460_v39 }
 0xb23   :  { %v2464_v44 = vpop.eup %2463  ;;  %v1355_v45 = vadd.f32 1.0, %v2462_v41 }
 0xb24   :  { %2465 = vrcp.f32 %v1354_v13  ;;  %v3299_v47 = vadd.f32 1.0, %v2464_v44  ;;  %v1367_v56 = vand.u32 2147483648, %v1354_v13  ;;  %v1365_v62 = vand.u32 2147483647, %v1354_v13 }
 0xb25   :  { %2467 = vrcp.f32 %v1355_v45  ;;  %v1382_v63 = vand.u32 2147483648, %v1355_v45  ;;  %v1380_v20 = vand.u32 2147483647, %v1355_v45  ;;  %vm1361_vm4 = vweird.f32 %v1354_v13 }
 0xb26   :  { %2469 = vrcp.f32 %v3297_v46  ;;  %v1368_v25 = vor.u32 1.1754944e-38, %v1367_v56  ;;  %vm1376_vm6 = vweird.f32 %v1355_v45  ;;  %vm1366_vm7 = vcmp.eq.f32.partialorder %v1365_v62, 8.507059e+37  ;;  %v3353_v62 = vld [vmem:[%s3569_s19 + $0x50] sm:$0xff] }
 0xb27   :  { %2471 = vrcp.f32 %v3299_v47  ;;  %v1383_v31 = vor.u32 1.1754944e-38, %v1382_v63  ;;  %vm1381_vm10 = vcmp.eq.f32.partialorder %v1380_v20, 8.507059e+37  ;;  %v1427_v7 = vand.u32 2147483648, %v3299_v47  ;;  %v2561_v63 = vld [vmem:[%s3569_s19 + $0x10] sm:$0xff]  ;;  %v2564_v20 = vld [vmem:[%s3569_s19 + $0x8] sm:$0xff] }
 0xb28   :  { %vm1421_vm14 = vweird.f32 %v3299_v47  ;;  %v1425_v12 = vand.u32 2147483647, %v3299_v47 }
 0xb2a   :  { %v2466_v48 = vpop.eup %2465 }
 0xb2b   :  { %v2468_v50 = vpop.eup %2467  ;;  %v1357_v52 = vmul.f32 %v2466_v48, %v1354_v13  ;;  %vm1362_vm2 = vweird.f32 %v2466_v48  ;;  %v1413_v13 = vor.u32 1.1754944e-38, %v1412_v8 }
 0xb2c   :  { %v1372_v53 = vmul.f32 %v2468_v50, %v1355_v45  ;;  %v3304_v58 = vpop.eup %2469  ;;  %vm1377_vm3 = vweird.f32 %v2468_v50  ;;  %vm1363_vm5 = vmor %vm1361_vm4, %vm1362_vm2  ;;  %vm1426_vm4 = vcmp.eq.f32.partialorder %v1425_v12, 8.507059e+37 }
 0xb2d   :  { %v1358_v55 = vsub.f32 1.0, %v1357_v52  ;;  %v2472_v17 = vpop.eup %2471  ;;  %v1402_v24 = vmul.f32 %v3304_v58, %v3297_v46  ;;  %vm1378_vm8 = vmor %vm1376_vm6, %vm1377_vm3  ;;  %vm1407_vm11 = vweird.f32 %v3304_v58  ;;  %vm1411_vm3 = vcmp.eq.f32.partialorder %v1410_v33, 8.507059e+37 }
 0xb2e   :  { %v1373_v57 = vsub.f32 1.0, %v1372_v53  ;;  %v1417_v28 = vmul.f32 %v2472_v17, %v3299_v47  ;;  %vm1422_vm12 = vweird.f32 %v2472_v17  ;;  %vm1408_vm1 = vmor %vm1406_vm13, %vm1407_vm11 }
 0xb2f   :  { %v1359_v59 = vmul.f32 %v2466_v48, %v1358_v55  ;;  %v1403_v38 = vsub.f32 1.0, %v1402_v24  ;;  %vm1423_vm2 = vmor %vm1421_vm14, %vm1422_vm12  ;;  %v2567_v24 = vld [vmem:[%s3569_s19] sm:$0xff] }
 0xb30   :  { %v1374_v19 = vmul.f32 %v2468_v50, %v1373_v57  ;;  %v1418_v0 = vsub.f32 1.0, %v1417_v28  ;;  %v3341_v57 = vld [vmem:[%s3569_s19 + $0x58] sm:$0xff] }
 0xb31   :  { %v1360_v21 = vadd.f32 %v2466_v48, %v1359_v59  ;;  %v1404_v5 = vmul.f32 %v3304_v58, %v1403_v38  ;;  %v2559_v59 = vld [vmem:[%s3569_s19 + $0x38] sm:$0xff] }
 0xb32   :  { %v1375_v26 = vadd.f32 %v2468_v50, %v1374_v19  ;;  %v1419_v3 = vmul.f32 %v2472_v17, %v1418_v0  ;;  %v3365_v19 = vld [vmem:[%s3569_s19 + $0x48] sm:$0xff] }
 0xb33   :  { %v1364_v30 = vsel %vm1363_vm5, %v2466_v48, %v1360_v21  ;;  %v1405_v4 = vadd.f32 %v3304_v58, %v1404_v5  ;;  %v1428_v48 = vor.u32 1.1754944e-38, %v1427_v7  ;;  %v2565_v21 = vld [vmem:[%s3569_s19 + $0x28] sm:$0xff] }
 0xb34   :  { %v1369_v34 = vsel %vm1366_vm7, %v1368_v25, %v1364_v30  ;;  %v1379_v61 = vsel %vm1378_vm8, %v2468_v50, %v1375_v26  ;;  %v1420_v32 = vadd.f32 %v2472_v17, %v1419_v3  ;;  %v2568_v25 = vld [vmem:[%s3569_s19 + $0x20] sm:$0xff] }
 0xb35   :  { %v1384_v15 = vsel %vm1381_vm10, %v1383_v31, %v1379_v61  ;;  %v1436_v42 = vmul.f32 %v1432_v23, %v1369_v34  ;;  %v1409_v41 = vsel %vm1408_vm1, %v3304_v58, %v1405_v4  ;;  %v2558_v58 = vld [vmem:[%s3569_s19 + $0x18] sm:$0xff]  ;;  %v3377_v23 = vld [vmem:[%s3569_s19 + $0x40] sm:$0xff] }
 0xb36   :  { %v1437_v35 = vmul.f32 %v1433_v36, %v1384_v15  ;;  %v1424_v45 = vsel %vm1423_vm2, %v2472_v17, %v1420_v32  ;;  %v1414_v50 = vsel %vm1411_vm3, %v1413_v13, %v1409_v41  ;;  %v2562_v17 = vld [vmem:[%s3569_s19 + $0x30] sm:$0xff] }
 0xb37   :  { %v1438_v1 = vadd.f32 %v1436_v42, %v3153_v51  ;;  %v1429_v52 = vsel %vm1426_vm4, %v1428_v48, %v1424_v45 }
 0xb38   :  { %v1439_v2 = vadd.f32 %v1437_v35, %v3156_v10 }
 0xb39   :  { %2473 = vtanh.f32 %v1438_v1 }
 0xb3a   :  { %2475 = vtanh.f32 %v1439_v2 }
 0xb3f   :  { %v2474_v37 = vpop.eup %2473 }
 0xb40   :  { %v2476_v6 = vpop.eup %2475  ;;  %v1444_v14 = vrot.slane %v2474_v37, 1 }
 0xb41   :  { %v1445_v11 = vrot.slane %v2476_v6, 1 }
 0xb42   :  { %v1448_v39 = vsub.f32 %v3266_v29, %v1444_v14 }
 0xb43   :  { %v1449_v44 = vsub.f32 %v3268_v16, %v1445_v11 }
 0xb44   :  { %v1452_v49 = vrot.slane %v1448_v39, 7 }
 0xb45   :  { %v1453_v46 = vrot.slane %v1449_v44, 7 }
 0xb46   :  { %v1456_v53 = vmul.f32 %v1452_v49, %v1414_v50 }
 0xb47   :  { %v1457_v54 = vmul.f32 %v1453_v46, %v1429_v52 }
 0xb48   :  { %v3323_v55 = vadd.f32 %v2474_v37, %v1456_v53 }
 0xb49   :  { %v3325_v47 = vadd.f32 %v2476_v6, %v1457_v54 }
 0xb4a   :  { %v1462_v29 = vrot.slane %v3323_v55, 3 }
 0xb4b   :  { %v1463_v56 = vrot.slane %v3325_v47, 2 }
 0xb4d   :  { %v3330_v16 = vsel %vm909_vm9, %v1463_v56, %v1462_v29 }
 0xb4e   :  { %2316 = vmatmul.msk.f32.vlgmr.msrb.gmra.mxu1 %vm172_vm0, %v3330_v16  ;;  %2317 = vmatmul.msk.f32.vlgmr.msrb.gmra.mxu2 %vm172_vm0, %v3330_v16 }
 0xb4f   :  { %2318 = vmatmul.msk.f32.vlgmr.msrb.gmra.mxu0 %vm172_vm0, %v3330_v16  ;;  %1891 = vmatpush.msrb.mxu1 %v3341_v57 }
 0xb50   :  { %2037 = vmatpush.msrb.mxu2 %v2558_v58  ;;  %2057 = vmatpush.msrb.mxu0 %v2559_v59 }
 0xb51   :  { %1892 = vmatpush.msrb.mxu1 %v3353_v62 }
 0xb52   :  { %2038 = vmatpush.msrb.mxu2 %v2561_v63  ;;  %2058 = vmatpush.msrb.mxu0 %v2562_v17 }
 0xb53   :  { %1893 = vmatpush.msrb.mxu1 %v3365_v19 }
 0xb54   :  { %2039 = vmatpush.msrb.mxu2 %v2564_v20  ;;  %2059 = vmatpush.msrb.mxu0 %v2565_v21 }
 0xb55   :  { %1894 = vmatpush.msrb.mxu1 %v3377_v23 }
 0xb56   :  { %2040 = vmatpush.msrb.mxu2 %v2567_v24  ;;  %2060 = vmatpush.msrb.mxu0 %v2568_v25 }
 0xbcb   :  { %v1484_v26 = vpop.f32.mrf.mxu1 }
 0xbcc   :  { %v1528_v28 = vrot.slane %v1484_v26, 4  ;;  %v1529_v30 = vrot.slane %v1484_v26, 5  ;;  %v1524_v33 = vpop.f32.mrf.mxu0 }
 0xbcd   :  { %v1525_v41 = vadd.f32 %v3146_v40, %v1524_v33 }
 0xbce   :  { %v1532_v31 = vadd.f32 %v1528_v28, %v3036_v60  ;;  %v1533_v34 = vadd.f32 %v1529_v30, %v3137_v22 }
 0xbcf   :  { %v1618_v56 = vrot.slane %v1525_v41, 4  ;;  %v1619_v25 = vrot.slane %v1525_v41, 5 }
 0xbd0   :  { %v2319_v61 = vmul.f32 -1.442695, %v1532_v31  ;;  %v2320_v36 = vmul.f32 -1.442695, %v1533_v34 }
 0xbd1   :  { %v1504_v15 = vpop.f32.mrf.mxu2 }
 0xbd2   :  { %2477 = vpow2.f32 %v2319_v61  ;;  %v1573_v42 = vrot.slane %v1504_v15, 4  ;;  %v1574_v38 = vrot.slane %v1504_v15, 5 }
 0xbd3   :  { %2479 = vpow2.f32 %v2320_v36 }
 0xbd4   :  { %v1577_v35 = vadd.f32 %v1573_v42, %v3124_v18  ;;  %v1578_v0 = vadd.f32 %v1574_v38, %v3140_v27 }
 0xbd6   :  { %v2321_v1 = vmul.f32 -1.442695, %v1577_v35  ;;  %v2322_v2 = vmul.f32 -1.442695, %v1578_v0 }
 0xbd8   :  { %v2478_v5 = vpop.eup %2477  ;;  %2481 = vpow2.f32 %v2321_v1 }
 0xbd9   :  { %v2480_v3 = vpop.eup %2479  ;;  %v1540_v4 = vadd.f32 1.0, %v2478_v5  ;;  %2483 = vpow2.f32 %v2322_v2 }
 0xbda   :  { %v1541_v37 = vadd.f32 1.0, %v2480_v3 }
 0xbdb   :  { %2485 = vrcp.f32 %v1540_v4  ;;  %v1553_v44 = vand.u32 2147483648, %v1540_v4  ;;  %v1551_v49 = vand.u32 2147483647, %v1540_v4  ;;  %vm1547_vm7 = vweird.f32 %v1540_v4 }
 0xbdc   :  { %2487 = vrcp.f32 %v1541_v37  ;;  %v1568_v50 = vand.u32 2147483648, %v1541_v37  ;;  %v1566_v53 = vand.u32 2147483647, %v1541_v37  ;;  %vm1562_vm10 = vweird.f32 %v1541_v37 }
 0xbdd   :  { %v1554_v58 = vor.u32 1.1754944e-38, %v1553_v44  ;;  %vm1552_vm11 = vcmp.eq.f32.partialorder %v1551_v49, 8.507059e+37 }
 0xbde   :  { %v2482_v8 = vpop.eup %2481  ;;  %v1569_v17 = vor.u32 1.1754944e-38, %v1568_v50  ;;  %vm1567_vm13 = vcmp.eq.f32.partialorder %v1566_v53, 8.507059e+37 }
 0xbdf   :  { %v2484_v32 = vpop.eup %2483  ;;  %v3390_v6 = vadd.f32 1.0, %v2482_v8 }
 0xbe0   :  { %v3392_v7 = vadd.f32 1.0, %v2484_v32 }
 0xbe1   :  { %v2486_v14 = vpop.eup %2485  ;;  %2489 = vrcp.f32 %v3390_v6  ;;  %v1598_v0 = vand.u32 2147483648, %v3390_v6  ;;  %vm1592_vm2 = vweird.f32 %v3390_v6 }
 0xbe2   :  { %v2488_v11 = vpop.eup %2487  ;;  %v1543_v12 = vmul.f32 %v2486_v14, %v1540_v4  ;;  %2491 = vrcp.f32 %v3392_v7  ;;  %vm1548_vm5 = vweird.f32 %v2486_v14  ;;  %v1613_v3 = vand.u32 2147483648, %v3392_v7 }
 0xbe3   :  { %v1558_v39 = vmul.f32 %v2488_v11, %v1541_v37  ;;  %vm1563_vm6 = vweird.f32 %v2488_v11  ;;  %vm1549_vm8 = vmor %vm1547_vm7, %vm1548_vm5  ;;  %v1596_v4 = vand.u32 2147483647, %v3390_v6  ;;  %vm1607_vm3 = vweird.f32 %v3392_v7 }
 0xbe4   :  { %v1544_v13 = vsub.f32 1.0, %v1543_v12  ;;  %vm1564_vm12 = vmor %vm1562_vm10, %vm1563_vm6  ;;  %v1611_v8 = vand.u32 2147483647, %v3392_v7 }
 0xbe5   :  { %v1559_v45 = vsub.f32 1.0, %v1558_v39  ;;  %v1614_v39 = vor.u32 1.1754944e-38, %v1613_v3  ;;  %vm1597_vm6 = vcmp.eq.f32.partialorder %v1596_v4, 8.507059e+37 }
 0xbe6   :  { %v1545_v48 = vmul.f32 %v2486_v14, %v1544_v13  ;;  %vm1612_vm7 = vcmp.eq.f32.partialorder %v1611_v8, 8.507059e+37 }
 0xbe7   :  { %v2490_v46 = vpop.eup %2489  ;;  %v1560_v52 = vmul.f32 %v2488_v11, %v1559_v45 }
 0xbe8   :  { %v2492_v54 = vpop.eup %2491  ;;  %v1546_v29 = vadd.f32 %v2486_v14, %v1545_v48  ;;  %v1588_v40 = vmul.f32 %v2490_v46, %v3390_v6  ;;  %vm1593_vm14 = vweird.f32 %v2490_v46 }
 0xbe9   :  { %v1561_v59 = vadd.f32 %v2488_v11, %v1560_v52  ;;  %v1603_v20 = vmul.f32 %v2492_v54, %v3392_v7  ;;  %vm1608_vm1 = vweird.f32 %v2492_v54  ;;  %vm1594_vm4 = vmor %vm1592_vm2, %vm1593_vm14 }
 0xbea   :  { %v1550_v63 = vsel %vm1549_vm8, %v2486_v14, %v1546_v29  ;;  %v1589_v31 = vsub.f32 1.0, %v1588_v40  ;;  %vm1609_vm5 = vmor %vm1607_vm3, %vm1608_vm1 }
 0xbeb   :  { %v1555_v21 = vsel %vm1552_vm11, %v1554_v58, %v1550_v63  ;;  %v1565_v24 = vsel %vm1564_vm12, %v2488_v11, %v1561_v59  ;;  %v1604_v61 = vsub.f32 1.0, %v1603_v20  ;;  %v1599_v11 = vor.u32 1.1754944e-38, %v1598_v0 }
 0xbec   :  { %v1570_v26 = vsel %vm1567_vm13, %v1569_v17, %v1565_v24  ;;  %v1622_v28 = vmul.f32 %v1618_v56, %v1555_v21  ;;  %v1590_v15 = vmul.f32 %v2490_v46, %v1589_v31 }
 0xbed   :  { %v1623_v30 = vmul.f32 %v1619_v25, %v1570_v26  ;;  %v1605_v42 = vmul.f32 %v2492_v54, %v1604_v61 }
 0xbee   :  { %v1624_v34 = vadd.f32 %v1622_v28, %v3153_v51  ;;  %v1591_v38 = vadd.f32 %v2490_v46, %v1590_v15 }
 0xbef   :  { %v1625_v36 = vadd.f32 %v1623_v30, %v3156_v10  ;;  %v1606_v1 = vadd.f32 %v2492_v54, %v1605_v42  ;;  %v3438_v42 = vld [vmem:[#allocation10 + $0x2] ss:$0 sm:$0xff] }
 0xbf0   :  { %2493 = vtanh.f32 %v1624_v34  ;;  %v1595_v14 = vsel %vm1594_vm4, %v2490_v46, %v1591_v38 }
 0xbf1   :  { %2495 = vtanh.f32 %v1625_v36  ;;  %v1610_v12 = vsel %vm1609_vm5, %v2492_v54, %v1606_v1  ;;  %v1600_v13 = vsel %vm1597_vm6, %v1599_v11, %v1595_v14 }
 0xbf2   :  { %v1615_v44 = vsel %vm1612_vm7, %v1614_v39, %v1610_v12 }
 0xbf6   :  { %v2494_v35 = vpop.eup %2493 }
 0xbf7   :  { %v2496_v2 = vpop.eup %2495  ;;  %v1630_v5 = vrot.slane %v2494_v35, 1 }
 0xbf8   :  { %v1631_v37 = vrot.slane %v2496_v2, 1 }
 0xbf9   :  { %v1634_v32 = vsub.f32 %v3323_v55, %v1630_v5 }
 0xbfa   :  { %v1635_v33 = vsub.f32 %v3325_v47, %v1631_v37 }
 0xbfb   :  { %v1638_v41 = vrot.slane %v1634_v32, 7 }
 0xbfc   :  { %v1639_v6 = vrot.slane %v1635_v33, 7 }
 0xbfd   :  { %v1642_v45 = vmul.f32 %v1638_v41, %v1600_v13 }
 0xbfe   :  { %v1643_v48 = vmul.f32 %v1639_v6, %v1615_v44 }
 0xbff   :  { %v3409_v49 = vadd.f32 %v2494_v35, %v1642_v45 }
 0xc00   :  { %v3411_v7 = vadd.f32 %v2496_v2, %v1643_v48 }
 0xc01   :  { %v1648_v55 = vrot.slane %v3409_v49, 4 }
 0xc02   :  { %v1649_v50 = vrot.slane %v3411_v7, 3 }
 0xc04   :  { %v3416_v47 = vsel %vm909_vm9, %v1649_v50, %v1648_v55 }
 0xc05   :  { %2323 = vmatmul.msk.f32.vlgmr.msra.gmra.mxu3 %vm172_vm0, %v3416_v47  ;;  %2324 = vmatmul.msk.f32.vlgmr.msra.gmra.mxu1 %vm172_vm0, %v3416_v47 }
 0xc06   :  { %2325 = vmatmul.msk.f32.vlgmr.msra.gmra.mxu2 %vm172_vm0, %v3416_v47  ;;  %2077 = vmatpush.msra.mxu3 %v3341_v57 }
 0xc08   :  { %2078 = vmatpush.msra.mxu3 %v3353_v62 }
 0xc0a   :  { %2079 = vmatpush.msra.mxu3 %v3365_v19 }
 0xc0c   :  { %2080 = vmatpush.msra.mxu3 %v3377_v23 }
 0xc82   :  { %v1690_v46 = vpop.f32.mrf.mxu1 }
 0xc83   :  { %v1759_v52 = vrot.slane %v1690_v46, 3  ;;  %v1760_v53 = vrot.slane %v1690_v46, 4 }
 0xc85   :  { %v1763_v54 = vadd.f32 %v1759_v52, %v3124_v18  ;;  %v1764_v56 = vadd.f32 %v1760_v53, %v3140_v27 }
 0xc87   :  { %v2328_v40 = vmul.f32 -1.442695, %v1763_v54  ;;  %v2329_v62 = vmul.f32 -1.442695, %v1764_v56 }
 0xc88   :  { %v1670_v29 = vpop.f32.mrf.mxu3 }
 0xc89   :  { %v1714_v58 = vrot.slane %v1670_v29, 3  ;;  %v1715_v59 = vrot.slane %v1670_v29, 4  ;;  %2497 = vpow2.f32 %v2328_v40  ;;  %v1710_v34 = vpop.f32.mrf.mxu2 }
 0xc8a   :  { %v1711_v38 = vadd.f32 %v3438_v42, %v1710_v34 }
 0xc8b   :  { %v1718_v63 = vadd.f32 %v1714_v58, %v3036_v60  ;;  %v1719_v57 = vadd.f32 %v1715_v59, %v3137_v22 }
 0xc8c   :  { %v1804_v33 = vrot.slane %v1711_v38, 3  ;;  %v1805_v48 = vrot.slane %v1711_v38, 4 }
 0xc8d   :  { %v2326_v17 = vmul.f32 -1.442695, %v1718_v63  ;;  %v2327_v19 = vmul.f32 -1.442695, %v1719_v57 }
 0xc8f   :  { %2499 = vpow2.f32 %v2326_v17  ;;  %v2498_v23 = vpop.eup %2497 }
 0xc90   :  { %2501 = vpow2.f32 %v2327_v19  ;;  %v3432_v28 = vadd.f32 1.0, %v2498_v23 }
 0xc91   :  { %2503 = vpow2.f32 %v2329_v62 }
 0xc92   :  { %v1784_v63 = vand.u32 2147483648, %v3432_v28  ;;  %vm1778_vm5 = vweird.f32 %v3432_v28  ;;  %v1782_v19 = vand.u32 2147483647, %v3432_v28 }
 0xc95   :  { %v2500_v20 = vpop.eup %2499 }
 0xc96   :  { %v2502_v21 = vpop.eup %2501  ;;  %v1726_v24 = vadd.f32 1.0, %v2500_v20 }
 0xc97   :  { %v2504_v25 = vpop.eup %2503  ;;  %v1727_v26 = vadd.f32 1.0, %v2502_v21 }
 0xc98   :  { %2505 = vrcp.f32 %v1726_v24  ;;  %v3434_v30 = vadd.f32 1.0, %v2504_v25  ;;  %v1739_v0 = vand.u32 2147483648, %v1726_v24  ;;  %v1737_v3 = vand.u32 2147483647, %v1726_v24 }
 0xc99   :  { %2507 = vrcp.f32 %v1727_v26  ;;  %v1754_v4 = vand.u32 2147483648, %v1727_v26  ;;  %v1752_v32 = vand.u32 2147483647, %v1727_v26  ;;  %vm1733_vm11 = vweird.f32 %v1726_v24 }
 0xc9a   :  { %2509 = vrcp.f32 %v3432_v28  ;;  %v1740_v12 = vor.u32 1.1754944e-38, %v1739_v0  ;;  %vm1748_vm13 = vweird.f32 %v1727_v26  ;;  %vm1738_vm14 = vcmp.eq.f32.partialorder %v1737_v3, 8.507059e+37 }
 0xc9b   :  { %2511 = vrcp.f32 %v3434_v30  ;;  %v1755_v6 = vor.u32 1.1754944e-38, %v1754_v4  ;;  %vm1753_vm2 = vcmp.eq.f32.partialorder %v1752_v32, 8.507059e+37  ;;  %v1799_v23 = vand.u32 2147483648, %v3434_v30 }
 0xc9c   :  { %vm1793_vm7 = vweird.f32 %v3434_v30  ;;  %v1797_v21 = vand.u32 2147483647, %v3434_v30 }
 0xc9e   :  { %v2506_v31 = vpop.eup %2505 }
 0xc9f   :  { %v2508_v61 = vpop.eup %2507  ;;  %v1729_v36 = vmul.f32 %v2506_v31, %v1726_v24  ;;  %vm1734_vm8 = vweird.f32 %v2506_v31 }
 0xca0   :  { %v1744_v15 = vmul.f32 %v2508_v61, %v1727_v26  ;;  %v3441_v2 = vpop.eup %2509  ;;  %vm1749_vm10 = vweird.f32 %v2508_v61  ;;  %vm1735_vm12 = vmor %vm1733_vm11, %vm1734_vm8  ;;  %v1785_v26 = vor.u32 1.1754944e-38, %v1784_v63  ;;  %vm1798_vm11 = vcmp.eq.f32.partialorder %v1797_v21, 8.507059e+37 }
 0xca1   :  { %v1730_v35 = vsub.f32 1.0, %v1729_v36  ;;  %v2512_v37 = vpop.eup %2511  ;;  %v1774_v11 = vmul.f32 %v3441_v2, %v3432_v28  ;;  %vm1750_vm1 = vmor %vm1748_vm13, %vm1749_vm10  ;;  %vm1779_vm3 = vweird.f32 %v3441_v2  ;;  %vm1783_vm10 = vcmp.eq.f32.partialorder %v1782_v19, 8.507059e+37 }
 0xca2   :  { %v1745_v1 = vsub.f32 1.0, %v1744_v15  ;;  %v1789_v41 = vmul.f32 %v2512_v37, %v3434_v30  ;;  %vm1794_vm4 = vweird.f32 %v2512_v37  ;;  %vm1780_vm6 = vmor %vm1778_vm5, %vm1779_vm3 }
 0xca3   :  { %v1731_v5 = vmul.f32 %v2506_v31, %v1730_v35  ;;  %v1775_v46 = vsub.f32 1.0, %v1774_v11  ;;  %vm1795_vm8 = vmor %vm1793_vm7, %vm1794_vm4 }
 0xca4   :  { %v1746_v8 = vmul.f32 %v2508_v61, %v1745_v1  ;;  %v1790_v53 = vsub.f32 1.0, %v1789_v41 }
 0xca5   :  { %v1732_v14 = vadd.f32 %v2506_v31, %v1731_v5  ;;  %v1776_v56 = vmul.f32 %v3441_v2, %v1775_v46 }
 0xca6   :  { %v1747_v39 = vadd.f32 %v2508_v61, %v1746_v8  ;;  %v1791_v58 = vmul.f32 %v2512_v37, %v1790_v53 }
 0xca7   :  { %v1736_v13 = vsel %vm1735_vm12, %v2506_v31, %v1732_v14  ;;  %v1777_v59 = vadd.f32 %v3441_v2, %v1776_v56 }
 0xca8   :  { %v1741_v44 = vsel %vm1738_vm14, %v1740_v12, %v1736_v13  ;;  %v1751_v45 = vsel %vm1750_vm1, %v2508_v61, %v1747_v39  ;;  %v1792_v57 = vadd.f32 %v2512_v37, %v1791_v58  ;;  %v1800_v61 = vor.u32 1.1754944e-38, %v1799_v23 }
 0xca9   :  { %v1756_v55 = vsel %vm1753_vm2, %v1755_v6, %v1751_v45  ;;  %v1808_v50 = vmul.f32 %v1804_v33, %v1741_v44  ;;  %v1781_v24 = vsel %vm1780_vm6, %v3441_v2, %v1777_v59 }
 0xcaa   :  { %v1809_v52 = vmul.f32 %v1805_v48, %v1756_v55  ;;  %v1796_v31 = vsel %vm1795_vm8, %v2512_v37, %v1792_v57  ;;  %v1786_v36 = vsel %vm1783_vm10, %v1785_v26, %v1781_v24 }
 0xcab   :  { %v1810_v54 = vadd.f32 %v1808_v50, %v3153_v51  ;;  %v1801_v38 = vsel %vm1798_vm11, %v1800_v61, %v1796_v31 }
 0xcac   :  { %v1811_v29 = vadd.f32 %v1809_v52, %v3156_v10 }
 0xcad   :  { %2513 = vtanh.f32 %v1810_v54 }
 0xcae   :  { %2515 = vtanh.f32 %v1811_v29 }
 0xcb3   :  { %v2514_v40 = vpop.eup %2513 }
 0xcb4   :  { %v2516_v62 = vpop.eup %2515  ;;  %v1816_v17 = vrot.slane %v2514_v40, 1 }
 0xcb5   :  { %v1817_v20 = vrot.slane %v2516_v62, 1 }
 0xcb6   :  { %v1820_v25 = vsub.f32 %v3409_v49, %v1816_v17 }
 0xcb7   :  { %v1821_v34 = vsub.f32 %v3411_v7, %v1817_v20 }
 0xcb8   :  { %v1824_v28 = vrot.slane %v1820_v25, 7 }
 0xcb9   :  { %v1825_v15 = vrot.slane %v1821_v34, 7 }
 0xcba   :  { %v1828_v35 = vmul.f32 %v1824_v28, %v1786_v36 }
 0xcbb   :  { %v1829_v0 = vmul.f32 %v1825_v15, %v1801_v38 }
 0xcbc   :  { %v3460_v1 = vadd.f32 %v2514_v40, %v1828_v35 }
 0xcbd   :  { %v3462_v30 = vadd.f32 %v2516_v62, %v1829_v0 }
 0xcbe   :  { %v1834_v2 = vrot.slane %v3460_v1, 5 }
 0xcbf   :  { %v1835_v49 = vrot.slane %v3462_v30, 4 }
 0xcc1   :  { %v1836_v5 = vsel %vm909_vm9, %v1835_v49, %v1834_v2 }
 0xcc2   :  { %2215 = vrot.lane.b32.xlu0 %v1836_v5, %s2735_s20  ;;  %2330 = vmatmul.msk.f32.vlgmr.msra.gmra.mxu0 %vm172_vm0, %v1836_v5 }
 0xcc3   :  { %2331 = vmatmul.msk.f32.vlgmr.msrb.gmra.mxu3 %vm172_vm0, %v1836_v5  ;;  %2332 = vmatmul.msk.f32.vlgmr.msrb.gmra.mxu1 %vm172_vm0, %v1836_v5 }
 0xd3f   :  { %v1856_v7 = vpop.f32.mrf.mxu0 }
 0xd40   :  { %v1900_v3 = vrot.slane %v1856_v7, 2  ;;  %v1901_v4 = vrot.slane %v1856_v7, 3  ;;  %v1896_v54 = vpop.f32.mrf.mxu1 }
 0xd41   :  { %v1897_v40 = vadd.f32 %v3438_v42, %v1896_v54 }
 0xd42   :  { %v1904_v37 = vadd.f32 %v1900_v3, %v3036_v60  ;;  %v1905_v8 = vadd.f32 %v1901_v4, %v3137_v22 }
 0xd43   :  { %v1990_v26 = vrot.slane %v1897_v40, 2  ;;  %v1991_v2 = vrot.slane %v1897_v40, 3 }
 0xd44   :  { %v2333_v32 = vmul.f32 -1.442695, %v1904_v37  ;;  %v2334_v14 = vmul.f32 -1.442695, %v1905_v8 }
 0xd46   :  { %2517 = vpow2.f32 %v2333_v32  ;;  %v1876_v33 = vpop.f32.mrf.mxu3 }
 0xd47   :  { %2519 = vpow2.f32 %v2334_v14  ;;  %v1945_v11 = vrot.slane %v1876_v33, 2  ;;  %v1946_v12 = vrot.slane %v1876_v33, 3 }
 0xd49   :  { %v1949_v39 = vadd.f32 %v1945_v11, %v3124_v18  ;;  %v1950_v41 = vadd.f32 %v1946_v12, %v3140_v27 }
 0xd4b   :  { %v2335_v13 = vmul.f32 -1.442695, %v1949_v39  ;;  %v2336_v6 = vmul.f32 -1.442695, %v1950_v41 }
 0xd4c   :  { %v2518_v44 = vpop.eup %2517 }
 0xd4d   :  { %v2520_v45 = vpop.eup %2519  ;;  %v1912_v48 = vadd.f32 1.0, %v2518_v44  ;;  %2521 = vpow2.f32 %v2335_v13 }
 0xd4e   :  { %v1913_v55 = vadd.f32 1.0, %v2520_v45  ;;  %2523 = vpow2.f32 %v2336_v6 }
 0xd4f   :  { %2525 = vrcp.f32 %v1912_v48  ;;  %v1925_v57 = vand.u32 2147483648, %v1912_v48  ;;  %v1923_v19 = vand.u32 2147483647, %v1912_v48  ;;  %vm1919_vm14 = vweird.f32 %v1912_v48 }
 0xd50   :  { %2527 = vrcp.f32 %v1913_v55  ;;  %v1940_v23 = vand.u32 2147483648, %v1913_v55  ;;  %v1938_v21 = vand.u32 2147483647, %v1913_v55  ;;  %vm1934_vm2 = vweird.f32 %v1913_v55 }
 0xd51   :  { %v1926_v34 = vor.u32 1.1754944e-38, %v1925_v57  ;;  %vm1924_vm3 = vcmp.eq.f32.partialorder %v1923_v19, 8.507059e+37 }
 0xd52   :  { %v1941_v15 = vor.u32 1.1754944e-38, %v1940_v23  ;;  %vm1939_vm5 = vcmp.eq.f32.partialorder %v1938_v21, 8.507059e+37 }
 0xd53   :  { %v2522_v50 = vpop.eup %2521 }
 0xd54   :  { %v2524_v46 = vpop.eup %2523  ;;  %v3475_v52 = vadd.f32 1.0, %v2522_v50 }
 0xd55   :  { %v2526_v53 = vpop.eup %2525  ;;  %v3477_v29 = vadd.f32 1.0, %v2524_v46 }
 0xd56   :  { %v2528_v56 = vpop.eup %2527  ;;  %v1915_v58 = vmul.f32 %v2526_v53, %v1912_v48  ;;  %2529 = vrcp.f32 %v3475_v52  ;;  %vm1920_vm12 = vweird.f32 %v2526_v53  ;;  %v1970_v12 = vand.u32 2147483648, %v3475_v52 }
 0xd57   :  { %v1930_v59 = vmul.f32 %v2528_v56, %v1913_v55  ;;  %2531 = vrcp.f32 %v3477_v29  ;;  %vm1935_vm13 = vweird.f32 %v2528_v56  ;;  %vm1921_vm1 = vmor %vm1919_vm14, %vm1920_vm12  ;;  %vm1964_vm8 = vweird.f32 %v3475_v52 }
 0xd58   :  { %v1916_v63 = vsub.f32 1.0, %v1915_v58  ;;  %vm1936_vm4 = vmor %vm1934_vm2, %vm1935_vm13  ;;  %v1968_v6 = vand.u32 2147483647, %v3475_v52  ;;  %v1985_v44 = vand.u32 2147483648, %v3477_v29  ;;  %vm1979_vm11 = vweird.f32 %v3477_v29 }
 0xd59   :  { %v1931_v62 = vsub.f32 1.0, %v1930_v59  ;;  %v1983_v48 = vand.u32 2147483647, %v3477_v29  ;;  %v1971_v46 = vor.u32 1.1754944e-38, %v1970_v12 }
 0xd5a   :  { %v1917_v17 = vmul.f32 %v2526_v53, %v1916_v63  ;;  %vm1969_vm13 = vcmp.eq.f32.partialorder %v1968_v6, 8.507059e+37 }
 0xd5b   :  { %v1932_v20 = vmul.f32 %v2528_v56, %v1931_v62  ;;  %vm1984_vm14 = vcmp.eq.f32.partialorder %v1983_v48, 8.507059e+37 }
 0xd5c   :  { %v2530_v24 = vpop.eup %2529  ;;  %v1918_v25 = vadd.f32 %v2526_v53, %v1917_v17 }
 0xd5d   :  { %v2532_v31 = vpop.eup %2531  ;;  %v1933_v61 = vadd.f32 %v2528_v56, %v1932_v20  ;;  %v1960_v28 = vmul.f32 %v2530_v24, %v3475_v52  ;;  %vm1965_vm6 = vweird.f32 %v2530_v24 }
 0xd5e   :  { %v1922_v36 = vsel %vm1921_vm1, %v2526_v53, %v1918_v25  ;;  %v1975_v38 = vmul.f32 %v2532_v31, %v3477_v29  ;;  %vm1980_vm7 = vweird.f32 %v2532_v31  ;;  %vm1966_vm10 = vmor %vm1964_vm8, %vm1965_vm6 }
 0xd5f   :  { %v1927_v35 = vsel %vm1924_vm3, %v1926_v34, %v1922_v36  ;;  %v1937_v0 = vsel %vm1936_vm4, %v2528_v56, %v1933_v61  ;;  %v1961_v3 = vsub.f32 1.0, %v1960_v28  ;;  %vm1981_vm12 = vmor %vm1979_vm11, %vm1980_vm7  ;;  %v1986_v56 = vor.u32 1.1754944e-38, %v1985_v44 }
 0xd60   :  { %v1942_v49 = vsel %vm1939_vm5, %v1941_v15, %v1937_v0  ;;  %v1994_v5 = vmul.f32 %v1990_v26, %v1927_v35  ;;  %v1976_v37 = vsub.f32 1.0, %v1975_v38 }
 0xd61   :  { %v1995_v7 = vmul.f32 %v1991_v2, %v1942_v49  ;;  %v1962_v32 = vmul.f32 %v2530_v24, %v1961_v3 }
 0xd62   :  { %v1996_v4 = vadd.f32 %v1994_v5, %v3153_v51  ;;  %v1977_v14 = vmul.f32 %v2532_v31, %v1976_v37 }
 0xd63   :  { %v1997_v8 = vadd.f32 %v1995_v7, %v3156_v10  ;;  %v1963_v33 = vadd.f32 %v2530_v24, %v1962_v32 }
 0xd64   :  { %2533 = vtanh.f32 %v1996_v4  ;;  %v1978_v39 = vadd.f32 %v2532_v31, %v1977_v14 }
 0xd65   :  { %2535 = vtanh.f32 %v1997_v8  ;;  %v1967_v55 = vsel %vm1966_vm10, %v2530_v24, %v1963_v33 }
 0xd66   :  { %v1982_v53 = vsel %vm1981_vm12, %v2532_v31, %v1978_v39  ;;  %v1972_v52 = vsel %vm1969_vm13, %v1971_v46, %v1967_v55 }
 0xd67   :  { %v1987_v40 = vsel %vm1984_vm14, %v1986_v56, %v1982_v53 }
 0xd6a   :  { %v2534_v11 = vpop.eup %2533 }
 0xd6b   :  { %v2536_v41 = vpop.eup %2535  ;;  %v2002_v13 = vrot.slane %v2534_v11, 1 }
 0xd6c   :  { %v2003_v45 = vrot.slane %v2536_v41, 1 }
 0xd6d   :  { %v2006_v50 = vsub.f32 %v3460_v1, %v2002_v13 }
 0xd6e   :  { %v2007_v54 = vsub.f32 %v3462_v30, %v2003_v45 }
 0xd6f   :  { %v2010_v58 = vrot.slane %v2006_v50, 7 }
 0xd70   :  { %v2011_v59 = vrot.slane %v2007_v54, 7 }
 0xd71   :  { %v2014_v63 = vmul.f32 %v2010_v58, %v1972_v52 }
 0xd72   :  { %v2015_v57 = vmul.f32 %v2011_v59, %v1987_v40 }
 0xd73   :  { %v3494_v62 = vadd.f32 %v2534_v11, %v2014_v63 }
 0xd74   :  { %v3496_v29 = vadd.f32 %v2536_v41, %v2015_v57 }
 0xd75   :  { %v2020_v17 = vrot.slane %v3494_v62, 6 }
 0xd76   :  { %v2021_v1 = vrot.slane %v3496_v29, 5 }
 0xd78   :  { %v2022_v19 = vsel %vm909_vm9, %v2021_v1, %v2020_v17 }
 0xd79   :  { %2218 = vrot.lane.b32.xlu2 %v2022_v19, %s2734_s23  ;;  %2337 = vmatmul.msk.f32.vlgmr.msrb.gmra.mxu2 %vm172_vm0, %v2022_v19 }
 0xd7a   :  { %2338 = vmatmul.msk.f32.vlgmr.msrb.gmra.mxu0 %vm172_vm0, %v2022_v19  ;;  %2339 = vmatmul.msk.f32.vlgmr.msra.gmra.mxu3 %vm172_vm0, %v2022_v19 }
 0xd81   :  { %2208 = vrot.lane.b32.xlu2 %v3273_v9, %s2734_s23 }
 0xdf7   :  { %v2062_v30 = vpop.f32.mrf.mxu0 }
 0xdf8   :  { %v2131_v23 = vrot.slane %v2062_v30, 1  ;;  %v2132_v20 = vrot.slane %v2062_v30, 2 }
 0xdfa   :  { %v2135_v21 = vadd.f32 %v2131_v23, %v3124_v18  ;;  %v2136_v25 = vadd.f32 %v2132_v20, %v3140_v27 }
 0xdfc   :  { %v2042_v24 = vpop.f32.mrf.mxu2  ;;  %v2342_v34 = vmul.f32 -1.442695, %v2135_v21  ;;  %v2343_v36 = vmul.f32 -1.442695, %v2136_v25 }
 0xdfd   :  { %v2086_v26 = vrot.slane %v2042_v24, 1  ;;  %v2087_v31 = vrot.slane %v2042_v24, 2  ;;  %v2082_v5 = vpop.f32.mrf.mxu3 }
 0xdfe   :  { %2537 = vpow2.f32 %v2342_v34  ;;  %v2083_v37 = vadd.f32 %v3438_v42, %v2082_v5 }
 0xdff   :  { %v2090_v61 = vadd.f32 %v2086_v26, %v3036_v60  ;;  %v2091_v28 = vadd.f32 %v2087_v31, %v3137_v22 }
 0xe00   :  { %v2176_v45 = vrot.slane %v2083_v37, 1  ;;  %v2177_v58 = vrot.slane %v2083_v37, 2 }
 0xe01   :  { %v2340_v15 = vmul.f32 -1.442695, %v2090_v61  ;;  %v2341_v38 = vmul.f32 -1.442695, %v2091_v28 }
 0xe03   :  { %2539 = vpow2.f32 %v2340_v15 }
 0xe04   :  { %2541 = vpow2.f32 %v2341_v38  ;;  %v2538_v9 = vpop.eup %2537 }
 0xe05   :  { %2543 = vpow2.f32 %v2343_v36  ;;  %v3511_v49 = vadd.f32 1.0, %v2538_v9 }
 0xe07   :  { %v2156_v21 = vand.u32 2147483648, %v3511_v49  ;;  %vm2150_vm12 = vweird.f32 %v3511_v49 }
 0xe09   :  { %v2540_v35 = vpop.eup %2539  ;;  %v2157_v36 = vor.u32 1.1754944e-38, %v2156_v21 }
 0xe0a   :  { %v2542_v18 = vpop.eup %2541  ;;  %v2098_v0 = vadd.f32 1.0, %v2540_v35 }
 0xe0b   :  { %v2544_v2 = vpop.eup %2543  ;;  %v2099_v27 = vadd.f32 1.0, %v2542_v18 }
 0xe0c   :  { %2545 = vrcp.f32 %v2098_v0  ;;  %v3513_v60 = vadd.f32 1.0, %v2544_v2  ;;  %v2111_v32 = vand.u32 2147483648, %v2098_v0  ;;  %v2109_v12 = vand.u32 2147483647, %v2098_v0 }
 0xe0d   :  { %2547 = vrcp.f32 %v2099_v27  ;;  %v2126_v39 = vand.u32 2147483648, %v2099_v27  ;;  %v2124_v6 = vand.u32 2147483647, %v2099_v27  ;;  %vm2105_vm3 = vweird.f32 %v2098_v0 }
 0xe0e   :  { %2549 = vrcp.f32 %v3511_v49  ;;  %v2112_v42 = vor.u32 1.1754944e-38, %v2111_v32  ;;  %vm2120_vm5 = vweird.f32 %v2099_v27  ;;  %vm2110_vm6 = vcmp.eq.f32.partialorder %v2109_v12, 8.507059e+37 }
 0xe0f   :  { %2551 = vrcp.f32 %v3513_v60  ;;  %v2127_v53 = vor.u32 1.1754944e-38, %v2126_v39  ;;  %vm2125_vm8 = vcmp.eq.f32.partialorder %v2124_v6, 8.507059e+37  ;;  %vm2165_vm14 = vweird.f32 %v3513_v60 }
 0xe10   :  { %v2169_v31 = vand.u32 2147483647, %v3513_v60 }
 0xe12   :  { %v2546_v22 = vpop.eup %2545 }
 0xe13   :  { %v2548_v7 = vpop.eup %2547  ;;  %v2101_v3 = vmul.f32 %v2546_v22, %v2098_v0  ;;  %vm2106_vm1 = vweird.f32 %v2546_v22 }
 0xe14   :  { %v2116_v4 = vmul.f32 %v2548_v7, %v2099_v27  ;;  %v3518_v33 = vpop.eup %2549  ;;  %vm2121_vm2 = vweird.f32 %v2548_v7  ;;  %vm2107_vm4 = vmor %vm2105_vm3, %vm2106_vm1  ;;  %vm2170_vm3 = vcmp.eq.f32.partialorder %v2169_v31, 8.507059e+37 }
 0xe15   :  { %v2102_v8 = vsub.f32 1.0, %v2101_v3  ;;  %v2552_v41 = vpop.eup %2551  ;;  %v2146_v48 = vmul.f32 %v3518_v33, %v3511_v49  ;;  %vm2122_vm7 = vmor %vm2120_vm5, %vm2121_vm2  ;;  %vm2151_vm10 = vweird.f32 %v3518_v33 }
 0xe16   :  { %v2117_v14 = vsub.f32 1.0, %v2116_v4  ;;  %v2161_v50 = vmul.f32 %v2552_v41, %v3513_v60  ;;  %vm2166_vm11 = vweird.f32 %v2552_v41  ;;  %vm2152_vm13 = vmor %vm2150_vm12, %vm2151_vm10 }
 0xe17   :  { %v2103_v11 = vmul.f32 %v2546_v22, %v2102_v8  ;;  %v2147_v40 = vsub.f32 1.0, %v2146_v48  ;;  %vm2167_vm1 = vmor %vm2165_vm14, %vm2166_vm11  ;;  %v2206_v8 = vpop.permute.xlu1 %2205 }
 0xe18   :  { %v2118_v13 = vmul.f32 %v2548_v7, %v2117_v14  ;;  %v2162_v57 = vsub.f32 1.0, %v2161_v50 }
 0xe19   :  { %v2104_v44 = vadd.f32 %v2546_v22, %v2103_v11  ;;  %v2148_v19 = vmul.f32 %v3518_v33, %v2147_v40  ;;  %v2229_v11 = vsel %vm172_vm0, %v3170_v43, %v2206_v8 }
 0xe1a   :  { %v2119_v55 = vadd.f32 %v2548_v7, %v2118_v13  ;;  %v2163_v30 = vmul.f32 %v2552_v41, %v2162_v57 }
 0xe1b   :  { %v2108_v46 = vsel %vm2107_vm4, %v2546_v22, %v2104_v44  ;;  %v2149_v23 = vadd.f32 %v3518_v33, %v2148_v19  ;;  %vm2231_vm4 = vcmask 785408  }
 0xe1c   :  { %v2113_v54 = vsel %vm2110_vm6, %v2112_v42, %v2108_v46  ;;  %v2123_v56 = vsel %vm2122_vm7, %v2548_v7, %v2119_v55  ;;  %v2164_v24 = vadd.f32 %v2552_v41, %v2163_v30 }
 0xe1d   :  { %v2128_v52 = vsel %vm2125_vm8, %v2127_v53, %v2123_v56  ;;  %v2180_v59 = vmul.f32 %v2176_v45, %v2113_v54  ;;  %v2153_v61 = vsel %vm2152_vm13, %v3518_v33, %v2149_v23 }
 0xe1e   :  { %v2181_v63 = vmul.f32 %v2177_v58, %v2128_v52  ;;  %v2168_v15 = vsel %vm2167_vm1, %v2552_v41, %v2164_v24 }
 0xe1f   :  { %v2182_v17 = vadd.f32 %v2180_v59, %v3153_v51  ;;  %v2154_v51 = vand.u32 2147483647, %v3511_v49 }
 0xe20   :  { %v2183_v1 = vadd.f32 %v2181_v63, %v3156_v10  ;;  %v2171_v10 = vand.u32 2147483648, %v3513_v60 }
 0xe21   :  { %2553 = vtanh.f32 %v2182_v17  ;;  %vm2155_vm2 = vcmp.eq.f32.partialorder %v2154_v51, 8.507059e+37 }
 0xe22   :  { %2555 = vtanh.f32 %v2183_v1  ;;  %v2172_v9 = vor.u32 1.1754944e-38, %v2171_v10  ;;  %v2158_v18 = vsel %vm2155_vm2, %v2157_v36, %v2153_v61 }
 0xe24   :  { %v2173_v2 = vsel %vm2170_vm3, %v2172_v9, %v2168_v15 }
 0xe27   :  { %v2554_v20 = vpop.eup %2553 }
 0xe28   :  { %v2556_v25 = vpop.eup %2555  ;;  %v2188_v26 = vrot.slane %v2554_v20, 1 }
 0xe29   :  { %v2189_v34 = vrot.slane %v2556_v25, 1 }
 0xe2a   :  { %v2192_v28 = vsub.f32 %v3494_v62, %v2188_v26  ;;  %v2216_v62 = vpop.permute.xlu0 %2215 }
 0xe2b   :  { %v2193_v38 = vsub.f32 %v3496_v29, %v2189_v34  ;;  %v2219_v29 = vpop.permute.xlu2 %2218  ;;  %v2233_v37 = vsel %vm172_vm0, %v3416_v47, %v2216_v62 }
 0xe2c   :  { %v2196_v35 = vrot.slane %v2192_v28, 7  ;;  %v2234_v32 = vsel %vm564_vm15, %v2233_v37, %v2219_v29 }
 0xe2d   :  { %v2197_v0 = vrot.slane %v2193_v38, 7 }
 0xe2e   :  { %v2200_v27 = vmul.f32 %v2196_v35, %v2158_v18 }
 0xe2f   :  { %v2201_v49 = vmul.f32 %v2197_v0, %v2173_v2 }
 0xe30   :  { %v2202_v60 = vadd.f32 %v2554_v20, %v2200_v27 }
 0xe31   :  { %v2203_v22 = vadd.f32 %v2556_v25, %v2201_v49 }
 0xe32   :  { %v2223_v5 = vrot.slane %v2202_v60, 7 }
 0xe33   :  { %v2224_v7 = vrot.slane %v2203_v22, 6  ;;  %v2209_v14 = vpop.permute.xlu2 %2208 }
 0xe34   :  { %v2230_v12 = vsel %vm564_vm15, %v2229_v11, %v2209_v14 }
 0xe35   :  { %v2225_v3 = vsel %vm909_vm9, %v2224_v7, %v2223_v5  ;;  %vm2239_vm9 = vcmask 1041408  }
 0xe36   :  { %2226 = vrot.lane.b32.xlu0 %v2225_v3, %s2733_s29 }
 0xe3e   :  { %2211 = vrot.lane.b32.xlu0 %v3330_v16, %s2733_s29 }
 0xea8   :  { %v2227_v4 = vpop.permute.xlu0 %2226 }
 0xea9   :  { %v2235_v33 = vsel %vm2231_vm4, %v2234_v32, %v2227_v4 }
 0xeaa   :  { %v2238_v39 = vrot.slane %v2235_v33, 6 }
 0xeb0   :  { %v2212_v16 = vpop.permute.xlu0 %2211 }
 0xeb1   :  { %v2232_v41 = vsel %vm2231_vm4, %v2230_v12, %v2212_v16 }
 0xeb2   :  { %v2240_v13 = vsel %vm2239_vm9, %v2232_v41, %v2238_v39 }
 0xeb3   :  { %2242 = vst [vmem:[%s3572_s22] sm:$0xf] %v2240_v13 }
 0xeb4   :  { %2247 = vsyncpa [#allocation3], 1 }
 0xeb5   :  { %2248 = vsyncpa [#allocation5], 1 }
 0xeb6   :  { %2249 = vsyncpa [#allocation8], 1 }
 0xeb7   :  { %2250 = vsyncpa [#allocation11], 1 }

</bundles_post_ra>
